<compile_context>
chip_gen: v6e
topology: v6e:2x2x1
jax: 0.10.0
libtpu: 0.0.40
codegen_flags: <defaults>
</compile_context>

<pallas_src>
from types import SimpleNamespace

import numpy as np
import jax
import jax.numpy as jnp
from jax.experimental import pallas as pl
from jax.experimental.pallas import tpu as pltpu

CPAD = 128           # lane-padded channel width used for every layer inside the kernel
NEG_SLOPE = 0.2


# -----------------------------------------------------------------------------
# Skeleton topology helpers (pure python glue, mirrors the original repo)
# -----------------------------------------------------------------------------
def calc_edge_mat(edges):
    edge_num = len(edges)
    edge_mat = [[100000] * edge_num for _ in range(edge_num)]
    for i in range(edge_num):
        edge_mat[i][i] = 0
    for i, a in enumerate(edges):
        for j, b in enumerate(edges):
            link = 0
            for x in range(2):
                for y in range(2):
                    if a[x] == b[y]:
                        link = 1
            if link:
                edge_mat[i][j] = 1
    for k in range(edge_num):
        for i in range(edge_num):
            for j in range(edge_num):
                edge_mat[i][j] = min(edge_mat[i][j], edge_mat[i][k] + edge_mat[k][j])
    return edge_mat


def find_neighbor(edges, d):
    edge_mat = calc_edge_mat(edges)
    edge_num = len(edge_mat)
    neighbor_list = []
    for i in range(edge_num):
        neighbor = [j for j in range(edge_num) if edge_mat[i][j] <= d]
        neighbor_list.append(neighbor)
    # global part (kept identical to original, including its known quirk)
    global_part_neighbor = neighbor_list[0].copy()
    for i in global_part_neighbor:
        neighbor_list[i].append(edge_num)
    global_part_neighbor.append(edge_num)
    neighbor_list.append(global_part_neighbor)
    return neighbor_list


def skeleton_conv_mask(neighbour_list, in_channels, out_channels, joint_num, kernel_size):
    in_cpj = in_channels // joint_num
    out_cpj = out_channels // joint_num
    mask = np.zeros((out_channels, in_channels, kernel_size), dtype=np.float32)
    for i, neighbour in enumerate(neighbour_list):
        expanded = []
        for k in neighbour:
            expanded.extend(range(k * in_cpj, (k + 1) * in_cpj))
        mask[i * out_cpj:(i + 1) * out_cpj, expanded, :] = 1.0
    return mask


def skeleton_pool_weight(edges, channels_per_edge, last_pool):
    edge_num = len(edges) + 1
    seq_list, pooling_list, new_edges = [], [], []
    degree = [0] * 200
    for e in edges:
        degree[e[0]] += 1
        degree[e[1]] += 1

    def find_seq(j, seq):
        if degree[j] > 2 and j != 0:
            seq_list.append(seq)
            seq = []
        if degree[j] == 1:
            seq_list.append(seq)
            return
        for idx, e in enumerate(edges):
            if e[0] == j:
                find_seq(e[1], seq + [idx])

    find_seq(0, [])
    for seq in seq_list:
        if last_pool:
            pooling_list.append(seq)
            continue
        if len(seq) % 2 == 1:
            pooling_list.append([seq[0]])
            new_edges.append(edges[seq[0]])
            seq = seq[1:]
        for i in range(0, len(seq), 2):
            pooling_list.append([seq[i], seq[i + 1]])
            new_edges.append([edges[seq[i]][0], edges[seq[i + 1]][1]])
    pooling_list.append([edge_num - 1])  # global position

    weight = np.zeros((len(pooling_list) * channels_per_edge, edge_num * channels_per_edge),
                      dtype=np.float32)
    for i, pair in enumerate(pooling_list):
        for j in pair:
            for c in range(channels_per_edge):
                weight[i * channels_per_edge + c, j * channels_per_edge + c] = 1.0 / len(pair)
    return weight, new_edges, pooling_list


def skeleton_unpool_weight(pooling_list, channels_per_edge):
    input_edge_num = len(pooling_list)
    output_edge_num = sum(len(p) for p in pooling_list)
    weight = np.zeros((output_edge_num * channels_per_edge, input_edge_num * channels_per_edge),
                      dtype=np.float32)
    for i, pair in enumerate(pooling_list):
        for j in pair:
            for c in range(channels_per_edge):
                weight[j * channels_per_edge + c, i * channels_per_edge + c] = 1.0
    return weight


# -----------------------------------------------------------------------------
# Build-time folding of conv/pool/unpool/upsample into (M_k, G_k, bias) per layer
# -----------------------------------------------------------------------------
def _strided_select_mat(t_in, t_out, stride, k, pad):
    """S[t, j] = 1 iff j == stride*t + k - pad and 0 <= j < t_in (zero-pad handled implicitly)."""
    s = np.zeros((t_out, t_in), np.float32)
    for t in range(t_out):
        j = stride * t + k - pad
        if 0 <= j < t_in:
            s[t, j] = 1.0
    return s


def _upsample_x2_mat(t_in):
    """nn.Upsample(scale_factor=2, mode='linear', align_corners=False) along time, as a matrix."""
    u = np.zeros((2 * t_in, t_in), np.float32)
    for i in range(2 * t_in):
        src = max((i + 0.5) / 2.0 - 0.5, 0.0)
        i0 = min(int(np.floor(src)), t_in - 1)
        i1 = min(i0 + 1, t_in - 1)
        lam = src - i0
        u[i, i0] += 1.0 - lam
        u[i, i1] += lam
    return u


def build_ae_params(args, topology, key, b_tile=8):
    KS = args.kernel_size
    pad = (KS - 1) // 2
    nl = args.num_layers
    T = args.window_size
    t_big = b_tile * T
    assert t_big % 8 == 0, "b_tile * window_size must be a multiple of 8 (sublane alignment)"

    channel_base = [6]                       # rotation_6d
    for _ in range(nl):
        channel_base.append(channel_base[-1] * args.scale_factor)

    topologies = [list(topology)]
    edge_num = [len(topology) + 1]
    pooling_lists = []
    channel_list = []
    enc_raw, dec_raw = [], []

    keys = jax.random.split(key, 4 * nl)
    ki = 0

    # ---------------- Encoder parameters ----------------
    for i in range(nl):
        neighbour = find_neighbor(topologies[i], args.skeleton_dist)
        in_ch = channel_base[i] * edge_num[i]
        out_ch = channel_base[i + 1] * edge_num[i]
        if i == 0:
            channel_list.append(in_ch)
        channel_list.append(out_ch)
        mask = skeleton_conv_mask(neighbour, in_ch, out_ch, edge_num[i], KS)
        w = np.asarray(jax.random.uniform(keys[ki], (out_ch, in_ch, KS), jnp.float32, -0.1, 0.1)) * mask
        b = np.asarray(jax.random.uniform(keys[ki + 1], (out_ch,), jnp.float32, -0.1, 0.1))
        ki += 2
        last_pool = (i == nl - 1)
        pool_w, new_edges, pooling_list = skeleton_pool_weight(
            topologies[i], out_ch // len(neighbour), last_pool)
        enc_raw.append(dict(w=w, b=b, pool=pool_w))
        pooling_lists.append(pooling_list)
        topologies.append(new_edges)
        edge_num.append(len(new_edges) + 1)

    # ---------------- Decoder parameters ----------------
    for i in range(nl):
        in_ch = channel_list[nl - i]
        out_ch = in_ch // args.scale_factor
        neighbour = find_neighbor(topologies[nl - i - 1], args.skeleton_dist)
        unpool_w = skeleton_unpool_weight(pooling_lists[nl - i - 1], in_ch // len(neighbour))
        mask = skeleton_conv_mask(neighbour, in_ch, out_ch, edge_num[nl - i - 1], KS)
        w = np.asarray(jax.random.uniform(keys[ki], (out_ch, in_ch, KS), jnp.float32, -0.1, 0.1)) * mask
        use_bias = (i == 0) or (i == nl - 1)       # matches PyTorch Decoder bias gating
        if use_bias:
            b = np.asarray(jax.random.uniform(keys[ki + 1], (out_ch,), jnp.float32, -0.1, 0.1))
        else:
            b = np.zeros((out_ch,), np.float32)
        ki += 2
        dec_raw.append(dict(w=w, b=b, unpool=unpool_w))

    # -------- fold every layer into (kron-batched M_k, tap-stacked G, bias) --------
    n_layers = 2 * nl
    time_mats = np.zeros((n_layers, KS, t_big, t_big), np.float32)
    g_enc = np.zeros((nl, KS * CPAD, CPAD), np.float32)
    g_dec = np.zeros((nl, CPAD, KS * CPAD), np.float32)
    biases = np.zeros((n_layers, 1, CPAD), np.float32)
    acts = []
    eye_b = np.eye(b_tile, dtype=np.float32)

    t_in = T
    for l, lp in enumerate(enc_raw):         # SkeletonConv(stride 2) + SkeletonPool + LeakyReLU
        t_out = (t_in + 2 * pad - KS) // 2 + 1
        for k in range(KS):
            m = _strided_select_mat(t_in, t_out, 2, k, pad)
            mk = np.kron(eye_b, m)
            time_mats[l, k, :mk.shape[0], :mk.shape[1]] = mk
            g = lp['w'][:, :, k].T @ lp['pool'].T          # conv tap fused with pool
            assert g.shape[0] <= CPAD and g.shape[1] <= CPAD, \
                f"fused channel dims {g.shape} exceed CPAD={CPAD}; bump CPAD"
            g_enc[l, k * CPAD:k * CPAD + g.shape[0], :g.shape[1]] = g
        pb = lp['pool'] @ lp['b']
        biases[l, 0, :pb.shape[0]] = pb
        acts.append(True)
        t_in = t_out
    t_latent = t_in

    for i, lp in enumerate(dec_raw):          # Upsample(x2 linear) + SkeletonUnpool + SkeletonConv
        l = nl + i
        t_out = 2 * t_in
        u = _upsample_x2_mat(t_in)
        for k in range(KS):
            m = _strided_select_mat(t_out, t_out, 1, k, pad) @ u
            mk = np.kron(eye_b, m)
            time_mats[l, k, :mk.shape[0], :mk.shape[1]] = mk
            g = lp['unpool'].T @ lp['w'][:, :, k].T         # unpool fused into conv tap
            assert g.shape[0] <= CPAD and g.shape[1] <= CPAD, \
                f"fused channel dims {g.shape} exceed CPAD={CPAD}; bump CPAD"
            g_dec[i, :g.shape[0], k * CPAD:k * CPAD + g.shape[1]] = g
        biases[l, 0, :lp['b'].shape[0]] = lp['b']
        acts.append(i != nl - 1)              # LeakyReLU on all but the last decoder layer
        t_in = t_out
    assert t_in == T

    fused = dict(
        tmats=jnp.asarray(time_mats),         # (n_layers, K, t_big, t_big) kron-batched, padded
        g_enc=jnp.asarray(g_enc),             # (nl, K*CPAD, CPAD)  vstack([G_0;G_1;G_2]) per layer
        g_dec=jnp.asarray(g_dec),             # (nl, CPAD, K*CPAD)  hstack([G_0|G_1|G_2]) per layer
        biases=jnp.asarray(biases),           # (n_layers, 1, CPAD) f32
        acts=tuple(acts),
        n_enc=nl, n_layers=n_layers, ksize=KS,
        b_tile=b_tile, t_big=t_big,
        c_in=channel_list[0],
        c_latent=enc_raw[-1]['pool'].shape[0],
        c_out=dec_raw[-1]['w'].shape[0],
        d=channel_base[0],
        t_latent=t_latent,
        window=T,
    )
    return dict(fused=fused, enc_raw=enc_raw, dec_raw=dec_raw)


# -----------------------------------------------------------------------------
# Pallas kernel: whole AE forward for a tile of B_TILE batch elements per grid step
# -----------------------------------------------------------------------------
def _make_ae_kernel(n_layers, n_enc, ksize, acts, lat_rows):
    def kernel(x_ref, tm_ref, ge_ref, gd_ref, b_ref, lat_ref, out_ref):
        cdt = x_ref.dtype                    # compute dtype of the matmul operands (f32 or bf16)
        h = x_ref[0]                         # (t_big, CPAD) channel-last slab, batch-flattened
        for l in range(n_layers):
            hd = h.astype(cdt)
            bias = b_ref[l]                  # (1, CPAD) f32, broadcasts over rows
            if l < n_enc:
                # encoder: shrink time first, then ONE wide-K channel matmul (K = ksize*CPAD)
                taps = [
                    jnp.dot(tm_ref[l, k], hd,
                            preferred_element_type=jnp.float32).astype(cdt)
                    for k in range(ksize)
                ]
                p = jnp.concatenate(taps, axis=1)              # (t_big, ksize*CPAD)
                acc = jnp.dot(p, ge_ref[l],
                              preferred_element_type=jnp.float32) + bias
            else:
                # decoder: ONE wide-N channel matmul first, then the (cheap) time matmuls
                q = jnp.dot(hd, gd_ref[l - n_enc],
                            preferred_element_type=jnp.float32).astype(cdt)  # (t_big, ksize*CPAD)
                acc = jnp.dot(tm_ref[l, 0], q[:, :CPAD],
                              preferred_element_type=jnp.float32)
                for k in range(1, ksize):
                    acc = acc + jnp.dot(tm_ref[l, k], q[:, k * CPAD:(k + 1) * CPAD],
                                        preferred_element_type=jnp.float32)
                acc = acc + bias
            h = jnp.where(acc >= 0.0, acc, NEG_SLOPE * acc) if acts[l] else acc
            if l == n_enc - 1:
                lat_ref[0] = h[:lat_rows]    # latent = encoder output (real rows are at the top)
        out_ref[0] = h.astype(out_ref.dtype)

    return kernel


def ae_forward(x, params, compute_dtype=jnp.float32):
    """x: (B, joint_num, 6, window) -> (latent (B, C_lat, T_lat), result (B, J, 6, window))."""
    fused = params['fused']
    B = x.shape[0]
    T = fused['window']
    bt = fused['b_tile']
    t_big = fused['t_big']

    # same reshape as the PyTorch Encoder, then channel-last, lane-pad once, batch-tile
    h = x.reshape(B, -1, T)
    h = jnp.transpose(h, (0, 2, 1))
    h = jnp.pad(h, ((0, 0), (0, 0), (0, CPAD - fused['c_in'])))
    n_tiles = pl.cdiv(B, bt)
    Bp = n_tiles * bt
    if Bp != B:
        h = jnp.pad(h, ((0, Bp - B), (0, 0), (0, 0)))
    h = h.reshape(n_tiles, t_big, CPAD).astype(compute_dtype)

    tmats = fused['tmats'].astype(compute_dtype)
    g_enc = fused['g_enc'].astype(compute_dtype)
    g_dec = fused['g_dec'].astype(compute_dtype)
    biases = fused['biases']                     # stays f32 (accumulation / activation in f32)

    lat_rows = bt * fused['t_latent']
    kernel = _make_ae_kernel(fused['n_layers'], fused['n_enc'], fused['ksize'],
                             fused['acts'], lat_rows)

    lat_p, out_p = pl.pallas_call(
        kernel,
        out_shape=(jax.ShapeDtypeStruct((n_tiles, lat_rows, CPAD), jnp.float32),
                   jax.ShapeDtypeStruct((n_tiles, t_big, CPAD), jnp.float32)),
        grid=(n_tiles,),
        in_specs=[
            pl.BlockSpec((1, t_big, CPAD), lambda b: (b, 0, 0)),
            pl.BlockSpec(tmats.shape, lambda b: (0, 0, 0, 0)),
            pl.BlockSpec(g_enc.shape, lambda b: (0, 0, 0)),
            pl.BlockSpec(g_dec.shape, lambda b: (0, 0, 0)),
            pl.BlockSpec(biases.shape, lambda b: (0, 0, 0)),
        ],
        out_specs=(pl.BlockSpec((1, lat_rows, CPAD), lambda b: (b, 0, 0)),
                   pl.BlockSpec((1, t_big, CPAD), lambda b: (b, 0, 0))),
        compiler_params=pltpu.CompilerParams(dimension_semantics=("parallel",)),
    )(h, tmats, g_enc, g_dec, biases)

    lat = lat_p.reshape(Bp, fused['t_latent'], CPAD)[:B, :, :fused['c_latent']]
    latent = jnp.transpose(lat, (0, 2, 1))                                 # (B, C_lat, T_lat) NCW
    out = out_p.reshape(Bp, T, CPAD)[:B, :, :fused['c_out']]
    res = jnp.transpose(out, (0, 2, 1))                                    # (B, C0, window)
    result = res.reshape(B, -1, fused['d'], T)                             # (B, J, 6, window)
    return latent, result


# -----------------------------------------------------------------------------
# Pure-JAX reference mirroring the PyTorch ops (conv1d / pool / upsample / unpool / conv1d)
# -----------------------------------------------------------------------------
def _upsample_linear_x2_ref(x):
    """(B, C, T) -> (B, C, 2T): nn.Upsample(scale_factor=2, mode='linear', align_corners=False)."""
    T = x.shape[-1]
    i = jnp.arange(2 * T)
    src = jnp.maximum((i + 0.5) / 2.0 - 0.5, 0.0)
    i0 = jnp.minimum(jnp.floor(src).astype(jnp.int32), T - 1)
    i1 = jnp.minimum(i0 + 1, T - 1)
    lam = src - i0.astype(jnp.float32)
    return x[:, :, i0] * (1.0 - lam) + x[:, :, i1] * lam


def reference_forward(x, params):
    hp_prec = jax.lax.Precision.HIGHEST
    enc_raw, dec_raw = params['enc_raw'], params['dec_raw']
    B = x.shape[0]
    h = x.reshape(B, -1, x.shape[-1])
    for lp in enc_raw:
        hp = jnp.pad(h, ((0, 0), (0, 0), (1, 1)))
        conv = jax.lax.conv_general_dilated(hp, jnp.asarray(lp['w']), (2,), 'VALID',
                                            dimension_numbers=("NCH", "OIH", "NCH"),
                                            precision=hp_prec)
        conv = conv + jnp.asarray(lp['b'])[None, :, None]
        pooled = jnp.einsum('pc,bct->bpt', jnp.asarray(lp['pool']), conv, precision=hp_prec)
        h = jnp.where(pooled >= 0.0, pooled, NEG_SLOPE * pooled)
    latent = h
    for i, lp in enumerate(dec_raw):
        h = _upsample_linear_x2_ref(h)
        h = jnp.einsum('oc,bct->bot', jnp.asarray(lp['unpool']), h, precision=hp_prec)
        hp = jnp.pad(h, ((0, 0), (0, 0), (1, 1)))
        conv = jax.lax.conv_general_dilated(hp, jnp.asarray(lp['w']), (1,), 'VALID',
                                            dimension_numbers=("NCH", "OIH", "NCH"),
                                            precision=hp_prec)
        conv = conv + jnp.asarray(lp['b'])[None, :, None]
        h = jnp.where(conv >= 0.0, conv, NEG_SLOPE * conv) if i != len(dec_raw) - 1 else conv
    result = h.reshape(B, -1, 6, x.shape[-1])
    return latent, result


if __name__ == "__main__":
    args = SimpleNamespace(
        rotation="rotation_6d", rotation_data="rotation_6d", kernel_size=3, num_layers=2,
        scale_factor=2, skeleton_dist=1, skeleton_pool="mean", padding_mode="zeros",
        skeleton_info="offset", window_size=16, extra_conv=0, upsampling="linear",
        last_sigmoid=False, with_root=False, velocity_virtual_node=False,
        v_connect_all_joints=False, pos_repr="3d",
    )
    # small star skeleton: root 0 with three chains of 3 edges (9 edges -> 10 joints)
    topology = [[0, 1], [1, 2], [2, 3],
                [0, 4], [4, 5], [5, 6],
                [0, 7], [7, 8], [8, 9]]

    B_TILE = 8                      # batch elements per grid step (kron-batched time matrices)
    B = 16                          # -> grid=(2,): both v7x TensorCores used, overhead amortized
    key = jax.random.PRNGKey(0)
    key_params, key_x = jax.random.split(key)
    params = build_ae_params(args, topology, key_params, b_tile=B_TILE)

    # AE.forward input shape: (batch_size, joint_num, 6, window_size)
    x = jax.random.normal(key_x, (B, 10, 6, 16), dtype=jnp.float32)

    lat_ref, res_ref = reference_forward(x, params)

    # f32 matmul-operand path: tight tolerance (catches any fusion/layout bug)
    fwd_f32 = jax.jit(lambda xx: ae_forward(xx, params, jnp.float32))
    latent, result = jax.block_until_ready(fwd_f32(x))
    np.testing.assert_allclose(np.asarray(latent), np.asarray(lat_ref), rtol=1e-4, atol=1e-5)
    np.testing.assert_allclose(np.asarray(result), np.asarray(res_ref), rtol=1e-4, atol=1e-5)

    # bf16 matmul-operand path (native bf16 MXU on v6e/v7x), f32 accumulation: loose tolerance
    fwd_bf16 = jax.jit(lambda xx: ae_forward(xx, params, jnp.bfloat16))
    latent_b, result_b = jax.block_until_ready(fwd_bf16(x))
    np.testing.assert_allclose(np.asarray(latent_b), np.asarray(lat_ref), rtol=2e-2, atol=2e-2)
    np.testing.assert_allclose(np.asarray(result_b), np.asarray(res_ref), rtol=2e-2, atol=2e-2)

    print("KERNEL_OK")
</pallas_src>

<mosaic_0001>
module attributes {stable_mosaic.version = 11 : i64} {
  func.func @kernel(%arg0: i32, %arg1: memref<1x128x128xf32, #tpu.memory_space<vmem>>, %arg2: memref<4x3x128x128xf32, #tpu.memory_space<vmem>>, %arg3: memref<2x384x128xf32, #tpu.memory_space<vmem>>, %arg4: memref<2x128x384xf32, #tpu.memory_space<vmem>>, %arg5: memref<4x1x128xf32, #tpu.memory_space<vmem>>, %arg6: memref<1x32x128xf32, #tpu.memory_space<vmem>>, %arg7: memref<1x128x128xf32, #tpu.memory_space<vmem>>) attributes {dimension_semantics = [#tpu.dimension_semantics<parallel>], iteration_bounds = array<i64: 2>, scalar_prefetch = 0 : i64, scratch_operands = 0 : i64, tpu.core_type = #tpu.core_type<tc>, window_params = [{transform_indices = @transform_0, window_bounds = array<i64: 1, 128, 128>}, {pipeline_mode = #tpu.pipeline_mode<synchronous>, transform_indices = @transform_1, window_bounds = array<i64: 4, 3, 128, 128>}, {pipeline_mode = #tpu.pipeline_mode<synchronous>, transform_indices = @transform_2, window_bounds = array<i64: 2, 384, 128>}, {pipeline_mode = #tpu.pipeline_mode<synchronous>, transform_indices = @transform_3, window_bounds = array<i64: 2, 128, 384>}, {pipeline_mode = #tpu.pipeline_mode<synchronous>, transform_indices = @transform_4, window_bounds = array<i64: 4, 1, 128>}, {transform_indices = @transform_5, window_bounds = array<i64: 1, 32, 128>}, {transform_indices = @transform_6, window_bounds = array<i64: 1, 128, 128>}]} {
    %c0 = arith.constant 0 : index
    %c0_0 = arith.constant 0 : index
    %c0_1 = arith.constant 0 : index
    %0 = vector.load %arg1[%c0, %c0_0, %c0_1] : memref<1x128x128xf32, #tpu.memory_space<vmem>>, vector<1x128x128xf32>
    %1 = vector.shape_cast %0 : vector<1x128x128xf32> to vector<128x128xf32>
    %c0_2 = arith.constant 0 : index
    %c0_3 = arith.constant 0 : index
    %c0_4 = arith.constant 0 : index
    %2 = vector.load %arg5[%c0_2, %c0_3, %c0_4] : memref<4x1x128xf32, #tpu.memory_space<vmem>>, vector<1x1x128xf32>
    %3 = vector.shape_cast %2 : vector<1x1x128xf32> to vector<1x128xf32>
    %c0_5 = arith.constant 0 : index
    %c0_6 = arith.constant 0 : index
    %c0_7 = arith.constant 0 : index
    %c0_8 = arith.constant 0 : index
    %4 = vector.load %arg2[%c0_5, %c0_6, %c0_7, %c0_8] : memref<4x3x128x128xf32, #tpu.memory_space<vmem>>, vector<1x1x128x128xf32>
    %5 = vector.shape_cast %4 : vector<1x1x128x128xf32> to vector<128x128xf32>
    %cst = arith.constant dense<0.000000e+00> : vector<128x128xf32>
    %6 = tpu.matmul %5, %1, %cst {dimension_numbers = #tpu.dot_dimension_numbers<[1], [0], [0], [1], [0, 0, 1, 1], [], []>} : vector<128x128xf32>, vector<128x128xf32>, vector<128x128xf32> -> vector<128x128xf32>
    %c0_9 = arith.constant 0 : index
    %c1 = arith.constant 1 : index
    %c0_10 = arith.constant 0 : index
    %c0_11 = arith.constant 0 : index
    %7 = vector.load %arg2[%c0_9, %c1, %c0_10, %c0_11] : memref<4x3x128x128xf32, #tpu.memory_space<vmem>>, vector<1x1x128x128xf32>
    %8 = vector.shape_cast %7 : vector<1x1x128x128xf32> to vector<128x128xf32>
    %cst_12 = arith.constant dense<0.000000e+00> : vector<128x128xf32>
    %9 = tpu.matmul %8, %1, %cst_12 {dimension_numbers = #tpu.dot_dimension_numbers<[1], [0], [0], [1], [0, 0, 1, 1], [], []>} : vector<128x128xf32>, vector<128x128xf32>, vector<128x128xf32> -> vector<128x128xf32>
    %c0_13 = arith.constant 0 : index
    %c2 = arith.constant 2 : index
    %c0_14 = arith.constant 0 : index
    %c0_15 = arith.constant 0 : index
    %10 = vector.load %arg2[%c0_13, %c2, %c0_14, %c0_15] : memref<4x3x128x128xf32, #tpu.memory_space<vmem>>, vector<1x1x128x128xf32>
    %11 = vector.shape_cast %10 : vector<1x1x128x128xf32> to vector<128x128xf32>
    %cst_16 = arith.constant dense<0.000000e+00> : vector<128x128xf32>
    %12 = tpu.matmul %11, %1, %cst_16 {dimension_numbers = #tpu.dot_dimension_numbers<[1], [0], [0], [1], [0, 0, 1, 1], [], []>} : vector<128x128xf32>, vector<128x128xf32>, vector<128x128xf32> -> vector<128x128xf32>
    %13 = tpu.concatenate %6, %9, %12 in 1 : vector<128x128xf32>, vector<128x128xf32>, vector<128x128xf32> -> vector<128x384xf32>
    %c0_17 = arith.constant 0 : index
    %c0_18 = arith.constant 0 : index
    %c0_19 = arith.constant 0 : index
    %14 = vector.load %arg3[%c0_17, %c0_18, %c0_19] : memref<2x384x128xf32, #tpu.memory_space<vmem>>, vector<1x384x128xf32>
    %15 = vector.shape_cast %14 : vector<1x384x128xf32> to vector<384x128xf32>
    %cst_20 = arith.constant dense<0.000000e+00> : vector<128x128xf32>
    %16 = tpu.matmul %13, %15, %cst_20 {dimension_numbers = #tpu.dot_dimension_numbers<[1], [0], [0], [1], [0, 0, 1, 1], [], []>} : vector<128x384xf32>, vector<384x128xf32>, vector<128x128xf32> -> vector<128x128xf32>
    %17 = vector.broadcast %3 : vector<1x128xf32> to vector<128x128xf32>
    %18 = arith.addf %16, %17 : vector<128x128xf32>
    %cst_21 = arith.constant 0.000000e+00 : f32
    %19 = vector.broadcast %cst_21 : f32 to vector<128x128xf32>
    %20 = arith.cmpf oge, %18, %19 : vector<128x128xf32>
    %cst_22 = arith.constant 2.000000e-01 : f32
    %21 = vector.broadcast %cst_22 : f32 to vector<128x128xf32>
    %22 = arith.mulf %21, %18 : vector<128x128xf32>
    %23 = arith.select %20, %18, %22 : vector<128x128xi1>, vector<128x128xf32>
    %c1_23 = arith.constant 1 : index
    %c0_24 = arith.constant 0 : index
    %c0_25 = arith.constant 0 : index
    %24 = vector.load %arg5[%c1_23, %c0_24, %c0_25] : memref<4x1x128xf32, #tpu.memory_space<vmem>>, vector<1x1x128xf32>
    %25 = vector.shape_cast %24 : vector<1x1x128xf32> to vector<1x128xf32>
    %c1_26 = arith.constant 1 : index
    %c0_27 = arith.constant 0 : index
    %c0_28 = arith.constant 0 : index
    %c0_29 = arith.constant 0 : index
    %26 = vector.load %arg2[%c1_26, %c0_27, %c0_28, %c0_29] : memref<4x3x128x128xf32, #tpu.memory_space<vmem>>, vector<1x1x128x128xf32>
    %27 = vector.shape_cast %26 : vector<1x1x128x128xf32> to vector<128x128xf32>
    %cst_30 = arith.constant dense<0.000000e+00> : vector<128x128xf32>
    %28 = tpu.matmul %27, %23, %cst_30 {dimension_numbers = #tpu.dot_dimension_numbers<[1], [0], [0], [1], [0, 0, 1, 1], [], []>} : vector<128x128xf32>, vector<128x128xf32>, vector<128x128xf32> -> vector<128x128xf32>
    %c1_31 = arith.constant 1 : index
    %c1_32 = arith.constant 1 : index
    %c0_33 = arith.constant 0 : index
    %c0_34 = arith.constant 0 : index
    %29 = vector.load %arg2[%c1_31, %c1_32, %c0_33, %c0_34] : memref<4x3x128x128xf32, #tpu.memory_space<vmem>>, vector<1x1x128x128xf32>
    %30 = vector.shape_cast %29 : vector<1x1x128x128xf32> to vector<128x128xf32>
    %cst_35 = arith.constant dense<0.000000e+00> : vector<128x128xf32>
    %31 = tpu.matmul %30, %23, %cst_35 {dimension_numbers = #tpu.dot_dimension_numbers<[1], [0], [0], [1], [0, 0, 1, 1], [], []>} : vector<128x128xf32>, vector<128x128xf32>, vector<128x128xf32> -> vector<128x128xf32>
    %c1_36 = arith.constant 1 : index
    %c2_37 = arith.constant 2 : index
    %c0_38 = arith.constant 0 : index
    %c0_39 = arith.constant 0 : index
    %32 = vector.load %arg2[%c1_36, %c2_37, %c0_38, %c0_39] : memref<4x3x128x128xf32, #tpu.memory_space<vmem>>, vector<1x1x128x128xf32>
    %33 = vector.shape_cast %32 : vector<1x1x128x128xf32> to vector<128x128xf32>
    %cst_40 = arith.constant dense<0.000000e+00> : vector<128x128xf32>
    %34 = tpu.matmul %33, %23, %cst_40 {dimension_numbers = #tpu.dot_dimension_numbers<[1], [0], [0], [1], [0, 0, 1, 1], [], []>} : vector<128x128xf32>, vector<128x128xf32>, vector<128x128xf32> -> vector<128x128xf32>
    %35 = tpu.concatenate %28, %31, %34 in 1 : vector<128x128xf32>, vector<128x128xf32>, vector<128x128xf32> -> vector<128x384xf32>
    %c1_41 = arith.constant 1 : index
    %c0_42 = arith.constant 0 : index
    %c0_43 = arith.constant 0 : index
    %36 = vector.load %arg3[%c1_41, %c0_42, %c0_43] : memref<2x384x128xf32, #tpu.memory_space<vmem>>, vector<1x384x128xf32>
    %37 = vector.shape_cast %36 : vector<1x384x128xf32> to vector<384x128xf32>
    %cst_44 = arith.constant dense<0.000000e+00> : vector<128x128xf32>
    %38 = tpu.matmul %35, %37, %cst_44 {dimension_numbers = #tpu.dot_dimension_numbers<[1], [0], [0], [1], [0, 0, 1, 1], [], []>} : vector<128x384xf32>, vector<384x128xf32>, vector<128x128xf32> -> vector<128x128xf32>
    %39 = vector.broadcast %25 : vector<1x128xf32> to vector<128x128xf32>
    %40 = arith.addf %38, %39 : vector<128x128xf32>
    %cst_45 = arith.constant 0.000000e+00 : f32
    %41 = vector.broadcast %cst_45 : f32 to vector<128x128xf32>
    %42 = arith.cmpf oge, %40, %41 : vector<128x128xf32>
    %cst_46 = arith.constant 2.000000e-01 : f32
    %43 = vector.broadcast %cst_46 : f32 to vector<128x128xf32>
    %44 = arith.mulf %43, %40 : vector<128x128xf32>
    %45 = arith.select %42, %40, %44 : vector<128x128xi1>, vector<128x128xf32>
    %46 = vector.extract_strided_slice %45 {offsets = [0, 0], sizes = [32, 128], strides = [1, 1]} : vector<128x128xf32> to vector<32x128xf32>
    %c0_47 = arith.constant 0 : index
    %c0_48 = arith.constant 0 : index
    %c0_49 = arith.constant 0 : index
    %47 = vector.load %arg6[%c0_47, %c0_48, %c0_49] : memref<1x32x128xf32, #tpu.memory_space<vmem>>, vector<1x32x128xf32>
    %48 = vector.shape_cast %47 : vector<1x32x128xf32> to vector<32x128xf32>
    %49 = vector.shape_cast %46 : vector<32x128xf32> to vector<1x32x128xf32>
    tpu.vector_store %arg6[%c0_47, %c0_48, %c0_49], %49 {strides = array<i32>} : memref<1x32x128xf32, #tpu.memory_space<vmem>>, vector<1x32x128xf32>,
    %c2_50 = arith.constant 2 : index
    %c0_51 = arith.constant 0 : index
    %c0_52 = arith.constant 0 : index
    %50 = vector.load %arg5[%c2_50, %c0_51, %c0_52] : memref<4x1x128xf32, #tpu.memory_space<vmem>>, vector<1x1x128xf32>
    %51 = vector.shape_cast %50 : vector<1x1x128xf32> to vector<1x128xf32>
    %c0_53 = arith.constant 0 : index
    %c0_54 = arith.constant 0 : index
    %c0_55 = arith.constant 0 : index
    %52 = vector.load %arg4[%c0_53, %c0_54, %c0_55] : memref<2x128x384xf32, #tpu.memory_space<vmem>>, vector<1x128x384xf32>
    %53 = vector.shape_cast %52 : vector<1x128x384xf32> to vector<128x384xf32>
    %cst_56 = arith.constant dense<0.000000e+00> : vector<128x384xf32>
    %54 = tpu.matmul %45, %53, %cst_56 {dimension_numbers = #tpu.dot_dimension_numbers<[1], [0], [0], [1], [0, 0, 1, 1], [], []>} : vector<128x128xf32>, vector<128x384xf32>, vector<128x384xf32> -> vector<128x384xf32>
    %c2_57 = arith.constant 2 : index
    %c0_58 = arith.constant 0 : index
    %c0_59 = arith.constant 0 : index
    %c0_60 = arith.constant 0 : index
    %55 = vector.load %arg2[%c2_57, %c0_58, %c0_59, %c0_60] : memref<4x3x128x128xf32, #tpu.memory_space<vmem>>, vector<1x1x128x128xf32>
    %56 = vector.shape_cast %55 : vector<1x1x128x128xf32> to vector<128x128xf32>
    %57 = vector.extract_strided_slice %54 {offsets = [0, 0], sizes = [128, 128], strides = [1, 1]} : vector<128x384xf32> to vector<128x128xf32>
    %cst_61 = arith.constant dense<0.000000e+00> : vector<128x128xf32>
    %58 = tpu.matmul %56, %57, %cst_61 {dimension_numbers = #tpu.dot_dimension_numbers<[1], [0], [0], [1], [0, 0, 1, 1], [], []>} : vector<128x128xf32>, vector<128x128xf32>, vector<128x128xf32> -> vector<128x128xf32>
    %c2_62 = arith.constant 2 : index
    %c1_63 = arith.constant 1 : index
    %c0_64 = arith.constant 0 : index
    %c0_65 = arith.constant 0 : index
    %59 = vector.load %arg2[%c2_62, %c1_63, %c0_64, %c0_65] : memref<4x3x128x128xf32, #tpu.memory_space<vmem>>, vector<1x1x128x128xf32>
    %60 = vector.shape_cast %59 : vector<1x1x128x128xf32> to vector<128x128xf32>
    %61 = vector.extract_strided_slice %54 {offsets = [0, 128], sizes = [128, 128], strides = [1, 1]} : vector<128x384xf32> to vector<128x128xf32>
    %cst_66 = arith.constant dense<0.000000e+00> : vector<128x128xf32>
    %62 = tpu.matmul %60, %61, %cst_66 {dimension_numbers = #tpu.dot_dimension_numbers<[1], [0], [0], [1], [0, 0, 1, 1], [], []>} : vector<128x128xf32>, vector<128x128xf32>, vector<128x128xf32> -> vector<128x128xf32>
    %63 = arith.addf %58, %62 : vector<128x128xf32>
    %c2_67 = arith.constant 2 : index
    %c2_68 = arith.constant 2 : index
    %c0_69 = arith.constant 0 : index
    %c0_70 = arith.constant 0 : index
    %64 = vector.load %arg2[%c2_67, %c2_68, %c0_69, %c0_70] : memref<4x3x128x128xf32, #tpu.memory_space<vmem>>, vector<1x1x128x128xf32>
    %65 = vector.shape_cast %64 : vector<1x1x128x128xf32> to vector<128x128xf32>
    %66 = vector.extract_strided_slice %54 {offsets = [0, 256], sizes = [128, 128], strides = [1, 1]} : vector<128x384xf32> to vector<128x128xf32>
    %cst_71 = arith.constant dense<0.000000e+00> : vector<128x128xf32>
    %67 = tpu.matmul %65, %66, %cst_71 {dimension_numbers = #tpu.dot_dimension_numbers<[1], [0], [0], [1], [0, 0, 1, 1], [], []>} : vector<128x128xf32>, vector<128x128xf32>, vector<128x128xf32> -> vector<128x128xf32>
    %68 = arith.addf %63, %67 : vector<128x128xf32>
    %69 = vector.broadcast %51 : vector<1x128xf32> to vector<128x128xf32>
    %70 = arith.addf %68, %69 : vector<128x128xf32>
    %cst_72 = arith.constant 0.000000e+00 : f32
    %71 = vector.broadcast %cst_72 : f32 to vector<128x128xf32>
    %72 = arith.cmpf oge, %70, %71 : vector<128x128xf32>
    %cst_73 = arith.constant 2.000000e-01 : f32
    %73 = vector.broadcast %cst_73 : f32 to vector<128x128xf32>
    %74 = arith.mulf %73, %70 : vector<128x128xf32>
    %75 = arith.select %72, %70, %74 : vector<128x128xi1>, vector<128x128xf32>
    %c3 = arith.constant 3 : index
    %c0_74 = arith.constant 0 : index
    %c0_75 = arith.constant 0 : index
    %76 = vector.load %arg5[%c3, %c0_74, %c0_75] : memref<4x1x128xf32, #tpu.memory_space<vmem>>, vector<1x1x128xf32>
    %77 = vector.shape_cast %76 : vector<1x1x128xf32> to vector<1x128xf32>
    %c1_76 = arith.constant 1 : index
    %c0_77 = arith.constant 0 : index
    %c0_78 = arith.constant 0 : index
    %78 = vector.load %arg4[%c1_76, %c0_77, %c0_78] : memref<2x128x384xf32, #tpu.memory_space<vmem>>, vector<1x128x384xf32>
    %79 = vector.shape_cast %78 : vector<1x128x384xf32> to vector<128x384xf32>
    %cst_79 = arith.constant dense<0.000000e+00> : vector<128x384xf32>
    %80 = tpu.matmul %75, %79, %cst_79 {dimension_numbers = #tpu.dot_dimension_numbers<[1], [0], [0], [1], [0, 0, 1, 1], [], []>} : vector<128x128xf32>, vector<128x384xf32>, vector<128x384xf32> -> vector<128x384xf32>
    %c3_80 = arith.constant 3 : index
    %c0_81 = arith.constant 0 : index
    %c0_82 = arith.constant 0 : index
    %c0_83 = arith.constant 0 : index
    %81 = vector.load %arg2[%c3_80, %c0_81, %c0_82, %c0_83] : memref<4x3x128x128xf32, #tpu.memory_space<vmem>>, vector<1x1x128x128xf32>
    %82 = vector.shape_cast %81 : vector<1x1x128x128xf32> to vector<128x128xf32>
    %83 = vector.extract_strided_slice %80 {offsets = [0, 0], sizes = [128, 128], strides = [1, 1]} : vector<128x384xf32> to vector<128x128xf32>
    %cst_84 = arith.constant dense<0.000000e+00> : vector<128x128xf32>
    %84 = tpu.matmul %82, %83, %cst_84 {dimension_numbers = #tpu.dot_dimension_numbers<[1], [0], [0], [1], [0, 0, 1, 1], [], []>} : vector<128x128xf32>, vector<128x128xf32>, vector<128x128xf32> -> vector<128x128xf32>
    %c3_85 = arith.constant 3 : index
    %c1_86 = arith.constant 1 : index
    %c0_87 = arith.constant 0 : index
    %c0_88 = arith.constant 0 : index
    %85 = vector.load %arg2[%c3_85, %c1_86, %c0_87, %c0_88] : memref<4x3x128x128xf32, #tpu.memory_space<vmem>>, vector<1x1x128x128xf32>
    %86 = vector.shape_cast %85 : vector<1x1x128x128xf32> to vector<128x128xf32>
    %87 = vector.extract_strided_slice %80 {offsets = [0, 128], sizes = [128, 128], strides = [1, 1]} : vector<128x384xf32> to vector<128x128xf32>
    %cst_89 = arith.constant dense<0.000000e+00> : vector<128x128xf32>
    %88 = tpu.matmul %86, %87, %cst_89 {dimension_numbers = #tpu.dot_dimension_numbers<[1], [0], [0], [1], [0, 0, 1, 1], [], []>} : vector<128x128xf32>, vector<128x128xf32>, vector<128x128xf32> -> vector<128x128xf32>
    %89 = arith.addf %84, %88 : vector<128x128xf32>
    %c3_90 = arith.constant 3 : index
    %c2_91 = arith.constant 2 : index
    %c0_92 = arith.constant 0 : index
    %c0_93 = arith.constant 0 : index
    %90 = vector.load %arg2[%c3_90, %c2_91, %c0_92, %c0_93] : memref<4x3x128x128xf32, #tpu.memory_space<vmem>>, vector<1x1x128x128xf32>
    %91 = vector.shape_cast %90 : vector<1x1x128x128xf32> to vector<128x128xf32>
    %92 = vector.extract_strided_slice %80 {offsets = [0, 256], sizes = [128, 128], strides = [1, 1]} : vector<128x384xf32> to vector<128x128xf32>
    %cst_94 = arith.constant dense<0.000000e+00> : vector<128x128xf32>
    %93 = tpu.matmul %91, %92, %cst_94 {dimension_numbers = #tpu.dot_dimension_numbers<[1], [0], [0], [1], [0, 0, 1, 1], [], []>} : vector<128x128xf32>, vector<128x128xf32>, vector<128x128xf32> -> vector<128x128xf32>
    %94 = arith.addf %89, %93 : vector<128x128xf32>
    %95 = vector.broadcast %77 : vector<1x128xf32> to vector<128x128xf32>
    %96 = arith.addf %94, %95 : vector<128x128xf32>
    %c0_95 = arith.constant 0 : index
    %c0_96 = arith.constant 0 : index
    %c0_97 = arith.constant 0 : index
    %97 = vector.load %arg7[%c0_95, %c0_96, %c0_97] : memref<1x128x128xf32, #tpu.memory_space<vmem>>, vector<1x128x128xf32>
    %98 = vector.shape_cast %97 : vector<1x128x128xf32> to vector<128x128xf32>
    %99 = vector.shape_cast %96 : vector<128x128xf32> to vector<1x128x128xf32>
    tpu.vector_store %arg7[%c0_95, %c0_96, %c0_97], %99 {strides = array<i32>} : memref<1x128x128xf32, #tpu.memory_space<vmem>>, vector<1x128x128xf32>,
    return
  }
  func.func @transform_0(%arg0: i32) -> (i32, i32, i32) {
    %c0_i32 = arith.constant 0 : i32
    %c0_i32_0 = arith.constant 0 : i32
    %c0_i32_1 = arith.constant 0 : i32
    return %arg0, %c0_i32, %c0_i32_0 : i32, i32, i32
  }
  func.func @transform_1(%arg0: i32) -> (i32, i32, i32, i32) {
    %c0_i32 = arith.constant 0 : i32
    %c0_i32_0 = arith.constant 0 : i32
    %c0_i32_1 = arith.constant 0 : i32
    %c0_i32_2 = arith.constant 0 : i32
    %c0_i32_3 = arith.constant 0 : i32
    return %c0_i32, %c0_i32_0, %c0_i32_1, %c0_i32_2 : i32, i32, i32, i32
  }
  func.func @transform_2(%arg0: i32) -> (i32, i32, i32) {
    %c0_i32 = arith.constant 0 : i32
    %c0_i32_0 = arith.constant 0 : i32
    %c0_i32_1 = arith.constant 0 : i32
    %c0_i32_2 = arith.constant 0 : i32
    return %c0_i32, %c0_i32_0, %c0_i32_1 : i32, i32, i32
  }
  func.func @transform_3(%arg0: i32) -> (i32, i32, i32) {
    %c0_i32 = arith.constant 0 : i32
    %c0_i32_0 = arith.constant 0 : i32
    %c0_i32_1 = arith.constant 0 : i32
    %c0_i32_2 = arith.constant 0 : i32
    return %c0_i32, %c0_i32_0, %c0_i32_1 : i32, i32, i32
  }
  func.func @transform_4(%arg0: i32) -> (i32, i32, i32) {
    %c0_i32 = arith.constant 0 : i32
    %c0_i32_0 = arith.constant 0 : i32
    %c0_i32_1 = arith.constant 0 : i32
    %c0_i32_2 = arith.constant 0 : i32
    return %c0_i32, %c0_i32_0, %c0_i32_1 : i32, i32, i32
  }
  func.func @transform_5(%arg0: i32) -> (i32, i32, i32) {
    %c0_i32 = arith.constant 0 : i32
    %c0_i32_0 = arith.constant 0 : i32
    %c0_i32_1 = arith.constant 0 : i32
    return %arg0, %c0_i32, %c0_i32_0 : i32, i32, i32
  }
  func.func @transform_6(%arg0: i32) -> (i32, i32, i32) {
    %c0_i32 = arith.constant 0 : i32
    %c0_i32_0 = arith.constant 0 : i32
    %c0_i32_1 = arith.constant 0 : i32
    return %arg0, %c0_i32, %c0_i32_0 : i32, i32, i32
  }
}

</mosaic_0001>

<bundles_post_ra>
// kernel: _lambda_.1
= control target key start
LH: loop header
LB: loop body
LE: loop exit
PB: predicated region body
PF: predicated region fallthrough
CT: control target
= control target key end

     0   :  { %12 = vsyncpa [#allocation3], 0  ;;  %s7319_s0 = inlined_call_operand.vmem [shape: f32[2,128,128], index: 0, kind: input, shape index: {}]   ;;  %s7320_s1 = inlined_call_operand.vmem [shape: f32[4,3,128,128], index: 1, kind: input, shape index: {}]   ;;  %s7321_s2 = inlined_call_operand.hbm [shape: f32[2,384,128], index: 2, kind: input, shape index: {}]   ;;  %s7322_s3 = inlined_call_operand.hbm [shape: f32[2,128,384], index: 3, kind: input, shape index: {}]   ;;  %s7323_s4 = inlined_call_operand.vmem [shape: f32[4,1,128], index: 4, kind: input, shape index: {}]   ;;  %s7324_s5 = inlined_call_operand.vmem [shape: f32[2,32,128], index: 5, kind: output, shape index: {0}]   ;;  %s7325_s6 = inlined_call_operand.vmem [shape: f32[2,128,128], index: 6, kind: output, shape index: {1}]  }
   0x1   :  { %13 = vsyncpa [#allocation5], 0  ;;  %s5924_s21 = smov 0  }
   0x2 LB: > { %s5882_s22 = smov [#allocation2]   ;;  %s5930_s24 = sadd.s32 4294967295, %s5880_s21   ;;  %s5880_s21 = sphi %s5924_s21, %s19_s21  }
   0x3   : > { %s201_s23 = sshll.u32 %s5882_s22, 4  ;;  %p4011_p0 = scmp.ge.s32.totalorder %s5880_s21, 1  ;;  %s202_s23 = int_to_ptr.vmem [resolvable:$true] %s201_s23 }
   0x4   : > { %p186_p1 = scmp.lt.s32.totalorder %s5880_s21, 3  ;;  %p5795_p3 = scmp.eq.s32.totalorder %s5930_s24, 0 }
   0x5   : > { %s5883_s26 = smov [#allocation4]   ;;  %s5825_s29 = scalar_lea.vmem %s202_s23, 12288 }
   0x6   : > { %p5934_p2 = pnand %p4011_p0, %p186_p1  ;;  %s214_s27 = sshll.u32 %s5883_s26, 4  ;;  %s215_s27 = int_to_ptr.vmem [resolvable:$true] %s214_s27 }
   0x7   : > { %p5826_p7 = scmp.ne.s32.totalorder %s202_s23, %s5825_s29  ;;  %p5833_p10 = scmp.lt.s32.totalorder %s202_s23, %s202_s23 }
   0x8   : > { %p5788_p4 = pneg %p5934_p2  ;;  %p5834_p11 = scmp.lt.s32.totalorder %s5825_s29, %s5825_s29 }
   0xa   : > { %p5943_p5 = pnand %p5795_p3, %p5788_p4  ;;  %p5835_p12 = por %p5834_p11, %p5833_p10 }
   0xc   : > { %p5816_p6 = pneg %p5943_p5 }
   0xe   : > { %p5828_p8 = pnand %p5826_p7, %p5816_p6 }
  0x10   : > { %p5829_p9 = pneg %p5828_p8 }
  0x12   : > { %p5836_p13 = pnand %p5835_p12, %p5829_p9 }
  0x14   : > { %5839 = shalt.err (!%p5836_p13)
}
  0x15   : > { %s5884_s30 = smov 128   ;;  %s5885_s7 = smov 8  }
  0x16   : > { %5791 = dma.hbm_to_vmem [thread:$0]  (!%p5943_p5), %s7321_s2, 12288, %s202_s23, [#allocation3], %s5884_s30, %s5884_s30, %s5885_s7  }
  0x17   : > { %s5851_s10 = scalar_lea.vmem %s215_s27, 12288  ;;  %p5859_p7 = scmp.lt.s32.totalorder %s215_s27, %s215_s27 }
  0x18   : > { %p5852_p0 = scmp.ne.s32.totalorder %s215_s27, %s5851_s10  ;;  %p5860_p8 = scmp.lt.s32.totalorder %s5851_s10, %s5851_s10 }
  0x1a   : > { %p5854_p1 = pnand %p5852_p0, %p5816_p6  ;;  %p5861_p10 = por %p5860_p8, %p5859_p7 }
  0x1c   : > { %p5855_p4 = pneg %p5854_p1 }
  0x1e   : > { %p5862_p9 = pnand %p5861_p10, %p5855_p4 }
  0x20   : > { %5865 = shalt.err (!%p5862_p9)
}
  0x21   : > { %s5886_s11 = smov 384   ;;  %s5887_s12 = smov 24  }
  0x22   : > { %5794 = dma.hbm_to_vmem [thread:$0]  (!%p5943_p5), %s7322_s3, 12288, %s215_s27, [#allocation5], %s5886_s11, %s5886_s11, %s5887_s12  }
  0x23   : > { %241 = sbr.rel (%p5934_p2) target bundleno = 2070 (0x816), region = 40 }
  0x28   : > { %5871 = dma.done.wait (%p5795_p3), [#allocation3], 12288  }
  0x29   : > { %5873 = vsyncadd (%p5795_p3), [#allocation3], 4294955008 }
  0x2a   : > { %5875 = dma.done.wait (%p5795_p3), [#allocation5], 12288  }
  0x2b   : > { %5877 = vsyncadd (%p5795_p3), [#allocation5], 4294955008  ;;  %p280_p6 = scmp.lt.s32.totalorder %s5930_s24, 1  ;;  %v312_v16 = vld [vmem:[%s7320_s1] sm:$0xff]  ;;  %v313_v18 = vld [vmem:[%s7320_s1 + $0x8] sm:$0xff] }
  0x2c   : > { %v4024_v17 = vld [vmem:[%s7320_s1 + $0x80] sm:$0xff]  ;;  %v4025_v19 = vld [vmem:[%s7320_s1 + $0x88] sm:$0xff]  ;;  %4916 = vmatprep.mubr.f32.mxu0 %v312_v16  ;;  %v314_v20 = vld [vmem:[%s7320_s1 + $0x10] sm:$0xff] }
  0x2d   : > { %s7329_s24 = smov (!%p280_p6, %s5930_s24), 1  ;;  %4972 = vmatprep.mubr.f32.mxu1 %v4024_v17  ;;  %v4026_v21 = vld [vmem:[%s7320_s1 + $0x90] sm:$0xff]  ;;  %v828_v22 = vld [vmem:[#allocation2 + $0xf8] sm:$0xff]  ;;  %v316_v25 = vld [vmem:[%s7320_s1 + $0x20] sm:$0xff] }
  0x2e   : > { %s4209_s15 = sshll.u32 %s7329_s24, 7  ;;  %v4027_v23 = vld [vmem:[%s7320_s1 + $0x98] sm:$0xff]  ;;  %v4028_v26 = vld [vmem:[%s7320_s1 + $0xa0] sm:$0xff]  ;;  %v4029_v27 = vld [vmem:[%s7320_s1 + $0xa8] sm:$0xff]  ;;  %s4210_s28 = sshll.u32 %s7329_s24, 5 }
  0x2f   : > { %s5985_s18 = scalar_lea.vmem %s7319_s0, %s4209_s15  ;;  %v315_v24 = vld [vmem:[%s7320_s1 + $0x18] sm:$0xff]  ;;  %v317_v28 = vld [vmem:[%s7320_s1 + $0x28] sm:$0xff]  ;;  %v318_v29 = vld [vmem:[%s7320_s1 + $0x30] sm:$0xff]  ;;  %s6656_s7 = scalar_lea.vmem %s7324_s5, %s4210_s28 }
  0x30   : > { %v5988_v0 = vld [vmem:[%s5985_s18 + $0x78] sm:$0xff]  ;;  %v5991_v1 = vld [vmem:[%s5985_s18 + $0x70] sm:$0xff]  ;;  %v5998_v2 = vld [vmem:[%s5985_s18 + $0x68] sm:$0xff] }
  0x31   : > { %4884 = vmatprep.subr.mxu0 %v5988_v0  ;;  %4940 = vmatprep.subr.mxu1 %v5988_v0  ;;  %v6005_v3 = vld [vmem:[%s5985_s18 + $0x60] sm:$0xff]  ;;  %v6012_v4 = vld [vmem:[%s5985_s18 + $0x58] sm:$0xff]  ;;  %v6019_v5 = vld [vmem:[%s5985_s18 + $0x50] sm:$0xff] }
  0x32   : > { %4885 = vmatpush3.msra.mxu0 %v5988_v0  ;;  %4941 = vmatpush3.msra.mxu1 %v5988_v0  ;;  %v6026_v6 = vld [vmem:[%s5985_s18 + $0x48] sm:$0xff]  ;;  %v6033_v7 = vld [vmem:[%s5985_s18 + $0x40] sm:$0xff]  ;;  %v6040_v8 = vld [vmem:[%s5985_s18 + $0x38] sm:$0xff] }
  0x33   : > { %4886 = vmatprep.subr.mxu0 %v5991_v1  ;;  %4942 = vmatprep.subr.mxu1 %v5991_v1  ;;  %v6047_v9 = vld [vmem:[%s5985_s18 + $0x30] sm:$0xff]  ;;  %v6054_v10 = vld [vmem:[%s5985_s18 + $0x28] sm:$0xff]  ;;  %v6061_v11 = vld [vmem:[%s5985_s18 + $0x20] sm:$0xff] }
  0x34   : > { %4887 = vmatpush3.msra.mxu0 %v5991_v1  ;;  %4943 = vmatpush3.msra.mxu1 %v5991_v1  ;;  %v6068_v12 = vld [vmem:[%s5985_s18 + $0x18] sm:$0xff]  ;;  %v6075_v13 = vld [vmem:[%s5985_s18 + $0x10] sm:$0xff]  ;;  %v6082_v14 = vld [vmem:[%s5985_s18 + $0x8] sm:$0xff] }
  0x35   : > { %4888 = vmatprep.subr.mxu0 %v5998_v2  ;;  %4944 = vmatprep.subr.mxu1 %v5998_v2  ;;  %v6089_v15 = vld [vmem:[%s5985_s18] sm:$0xff]  ;;  %v4030_v30 = vld [vmem:[%s7320_s1 + $0xb0] sm:$0xff]  ;;  %v4031_v31 = vld [vmem:[%s7320_s1 + $0xb8] sm:$0xff]  ;;  %s7277_s18 = scalar_lea.vmem %s7325_s6, %s4209_s15 }
  0x36   : > { %4889 = vmatpush3.msra.mxu0 %v5998_v2  ;;  %4945 = vmatpush3.msra.mxu1 %v5998_v2  ;;  %v319_v32 = vld [vmem:[%s7320_s1 + $0x38] sm:$0xff]  ;;  %v320_v33 = vld [vmem:[%s7320_s1 + $0x40] sm:$0xff]  ;;  %v4033_v35 = vld [vmem:[%s7320_s1 + $0xc8] sm:$0xff] }
  0x37   : > { %4890 = vmatprep.subr.mxu0 %v6005_v3  ;;  %4946 = vmatprep.subr.mxu1 %v6005_v3  ;;  %v4032_v34 = vld [vmem:[%s7320_s1 + $0xc0] sm:$0xff]  ;;  %v321_v36 = vld [vmem:[%s7320_s1 + $0x48] sm:$0xff]  ;;  %v322_v37 = vld [vmem:[%s7320_s1 + $0x50] sm:$0xff] }
  0x38   : > { %4891 = vmatpush3.msra.mxu0 %v6005_v3  ;;  %4947 = vmatpush3.msra.mxu1 %v6005_v3  ;;  %v4034_v38 = vld [vmem:[%s7320_s1 + $0xd0] sm:$0xff]  ;;  %v4035_v39 = vld [vmem:[%s7320_s1 + $0xd8] sm:$0xff]  ;;  %v324_v41 = vld [vmem:[%s7320_s1 + $0x60] sm:$0xff] }
  0x39   : > { %4892 = vmatprep.subr.mxu0 %v6012_v4  ;;  %4948 = vmatprep.subr.mxu1 %v6012_v4  ;;  %v323_v40 = vld [vmem:[%s7320_s1 + $0x58] sm:$0xff]  ;;  %v4036_v42 = vld [vmem:[%s7320_s1 + $0xe0] sm:$0xff]  ;;  %v4037_v43 = vld [vmem:[%s7320_s1 + $0xe8] sm:$0xff] }
  0x3a   : > { %4893 = vmatpush3.msra.mxu0 %v6012_v4  ;;  %4949 = vmatpush3.msra.mxu1 %v6012_v4  ;;  %v325_v44 = vld [vmem:[%s7320_s1 + $0x68] sm:$0xff]  ;;  %v326_v45 = vld [vmem:[%s7320_s1 + $0x70] sm:$0xff]  ;;  %v4039_v47 = vld [vmem:[%s7320_s1 + $0xf8] sm:$0xff] }
  0x3b   : > { %4894 = vmatprep.subr.mxu0 %v6019_v5  ;;  %4950 = vmatprep.subr.mxu1 %v6019_v5  ;;  %v4038_v46 = vld [vmem:[%s7320_s1 + $0xf0] sm:$0xff]  ;;  %v327_v48 = vld [vmem:[%s7320_s1 + $0x78] sm:$0xff]  ;;  %v4040_v49 = vld [vmem:[%s7320_s1 + $0x100] sm:$0xff] }
  0x3c   : > { %4895 = vmatpush3.msra.mxu0 %v6019_v5  ;;  %4951 = vmatpush3.msra.mxu1 %v6019_v5  ;;  %v812_v50 = vld [vmem:[#allocation2 + $0x78] sm:$0xff]  ;;  %v827_v51 = vld [vmem:[#allocation2 + $0xf0] sm:$0xff]  ;;  %v4041_v52 = vld [vmem:[%s7320_s1 + $0x108] sm:$0xff] }
  0x3d   : > { %4896 = vmatprep.subr.mxu0 %v6026_v6  ;;  %4952 = vmatprep.subr.mxu1 %v6026_v6  ;;  %v811_v53 = vld [vmem:[#allocation2 + $0x70] sm:$0xff]  ;;  %v826_v55 = vld [vmem:[#allocation2 + $0xe8] sm:$0xff]  ;;  %v825_v57 = vld [vmem:[#allocation2 + $0xe0] sm:$0xff] }
  0x3e   : > { %4897 = vmatpush3.msra.mxu0 %v6026_v6  ;;  %4953 = vmatpush3.msra.mxu1 %v6026_v6  ;;  %v4042_v54 = vld [vmem:[%s7320_s1 + $0x110] sm:$0xff]  ;;  %v810_v56 = vld [vmem:[#allocation2 + $0x68] sm:$0xff]  ;;  %v4043_v58 = vld [vmem:[%s7320_s1 + $0x118] sm:$0xff] }
  0x3f   : > { %4898 = vmatprep.subr.mxu0 %v6033_v7  ;;  %4954 = vmatprep.subr.mxu1 %v6033_v7  ;;  %v809_v59 = vld [vmem:[#allocation2 + $0x60] sm:$0xff]  ;;  %v824_v61 = vld [vmem:[#allocation2 + $0xd8] sm:$0xff]  ;;  %v823_v63 = vld [vmem:[#allocation2 + $0xd0] sm:$0xff] }
  0x40   : > { %4899 = vmatpush3.msra.mxu0 %v6033_v7  ;;  %4955 = vmatpush3.msra.mxu1 %v6033_v7  ;;  %v4044_v60 = vld [vmem:[%s7320_s1 + $0x120] sm:$0xff]  ;;  %v808_v62 = vld [vmem:[#allocation2 + $0x58] sm:$0xff]  ;;  %v802_v16 = vld [vmem:[#allocation2 + $0x28] sm:$0xff] }
  0x41   : > { %4900 = vmatprep.subr.mxu0 %v6040_v8  ;;  %4956 = vmatprep.subr.mxu1 %v6040_v8  ;;  %v817_v17 = vld [vmem:[#allocation2 + $0xa0] sm:$0xff] }
  0x42   : > { %4901 = vmatpush3.msra.mxu0 %v6040_v8  ;;  %4957 = vmatpush3.msra.mxu1 %v6040_v8 }
  0x43   : > { %4902 = vmatprep.subr.mxu0 %v6047_v9  ;;  %4958 = vmatprep.subr.mxu1 %v6047_v9 }
  0x44   : > { %4903 = vmatpush3.msra.mxu0 %v6047_v9  ;;  %4959 = vmatpush3.msra.mxu1 %v6047_v9 }
  0x45   : > { %4904 = vmatprep.subr.mxu0 %v6054_v10  ;;  %4960 = vmatprep.subr.mxu1 %v6054_v10 }
  0x46   : > { %4905 = vmatpush3.msra.mxu0 %v6054_v10  ;;  %4961 = vmatpush3.msra.mxu1 %v6054_v10 }
  0x47   : > { %4906 = vmatprep.subr.mxu0 %v6061_v11  ;;  %4962 = vmatprep.subr.mxu1 %v6061_v11 }
  0x48   : > { %4907 = vmatpush3.msra.mxu0 %v6061_v11  ;;  %4963 = vmatpush3.msra.mxu1 %v6061_v11 }
  0x49   : > { %4908 = vmatprep.subr.mxu0 %v6068_v12  ;;  %4964 = vmatprep.subr.mxu1 %v6068_v12 }
  0x4a   : > { %4909 = vmatpush3.msra.mxu0 %v6068_v12  ;;  %4965 = vmatpush3.msra.mxu1 %v6068_v12 }
  0x4b   : > { %4910 = vmatprep.subr.mxu0 %v6075_v13  ;;  %4966 = vmatprep.subr.mxu1 %v6075_v13 }
  0x4c   : > { %4911 = vmatpush3.msra.mxu0 %v6075_v13  ;;  %4967 = vmatpush3.msra.mxu1 %v6075_v13 }
  0x4d   : > { %4912 = vmatprep.subr.mxu0 %v6082_v14  ;;  %4968 = vmatprep.subr.mxu1 %v6082_v14 }
  0x4e   : > { %4913 = vmatpush3.msra.mxu0 %v6082_v14  ;;  %4969 = vmatpush3.msra.mxu1 %v6082_v14 }
  0x4f   : > { %4914 = vmatprep.subr.mxu0 %v6089_v15  ;;  %4970 = vmatprep.subr.mxu1 %v6089_v15 }
  0x50   : > { %4915 = vmatpush3.msra.mxu0 %v6089_v15  ;;  %4971 = vmatpush3.msra.mxu1 %v6089_v15 }
  0x51   : > { %4917 = vmatmul.mubr.f32.vlgmr.msra.gmra.mxu0 %v313_v18  ;;  %4973 = vmatmul.mubr.f32.vlgmr.msra.gmra.mxu1 %v4025_v19  ;;  %v4051_v18 = vld [vmem:[%s7320_s1 + $0x158] sm:$0xff]  ;;  %v801_v19 = vld [vmem:[#allocation2 + $0x20] sm:$0xff] }
  0x52   : > { %4996 = vmatprep.subr.mxu0 %v5988_v0  ;;  %4919 = vmatprep.mubr.f32.mxu0 %v314_v20  ;;  %v4052_v20 = vld [vmem:[%s7320_s1 + $0x160] sm:$0xff] }
  0x53   : > { %4997 = vmatpush3.msra.mxu0 %v5988_v0  ;;  %4975 = vmatprep.mubr.f32.mxu1 %v4026_v21  ;;  %v4045_v0 = vld [vmem:[%s7320_s1 + $0x128] sm:$0xff]  ;;  %v816_v21 = vld [vmem:[#allocation2 + $0x98] sm:$0xff] }
  0x54   : > { %4998 = vmatprep.subr.mxu0 %v5991_v1  ;;  %4308 = vmatprep.subr.mxu1 %v828_v22  ;;  %v800_v22 = vld [vmem:[#allocation2 + $0x18] sm:$0xff] }
  0x55   : > { %4999 = vmatpush3.msra.mxu0 %v5991_v1  ;;  %4976 = vmatmul.mubr.f32.gmra.mxu1 %v4027_v23  ;;  %v807_v1 = vld [vmem:[#allocation2 + $0x50] sm:$0xff] }
  0x56   : > { %4920 = vmatmul.mubr.f32.gmra.mxu0 %v315_v24  ;;  %5000 = vmatprep.subr.mxu0 %v5998_v2  ;;  %v815_v23 = vld [vmem:[#allocation2 + $0x90] sm:$0xff]  ;;  %v4053_v24 = vld [vmem:[%s7320_s1 + $0x168] sm:$0xff] }
  0x57   : > { %5001 = vmatpush3.msra.mxu0 %v5998_v2  ;;  %4922 = vmatprep.mubr.f32.mxu0 %v316_v25  ;;  %v4046_v2 = vld [vmem:[%s7320_s1 + $0x130] sm:$0xff] }
  0x58   : > { %5002 = vmatprep.subr.mxu0 %v6005_v3  ;;  %4978 = vmatprep.mubr.f32.mxu1 %v4028_v26  ;;  %v799_v25 = vld [vmem:[#allocation2 + $0x10] sm:$0xff] }
  0x59   : > { %5003 = vmatpush3.msra.mxu0 %v6005_v3  ;;  %4979 = vmatmul.mubr.f32.gmra.mxu1 %v4029_v27  ;;  %v822_v3 = vld [vmem:[#allocation2 + $0xc8] sm:$0xff]  ;;  %v4054_v26 = vld [vmem:[%s7320_s1 + $0x170] sm:$0xff]  ;;  %v4055_v27 = vld [vmem:[%s7320_s1 + $0x178] sm:$0xff] }
  0x5a   : > { %4923 = vmatmul.mubr.f32.gmra.mxu0 %v317_v28  ;;  %5004 = vmatprep.subr.mxu0 %v6012_v4  ;;  %v814_v28 = vld [vmem:[#allocation2 + $0x88] sm:$0xff] }
  0x5b   : > { %5005 = vmatpush3.msra.mxu0 %v6012_v4  ;;  %4925 = vmatprep.mubr.f32.mxu0 %v318_v29  ;;  %v806_v4 = vld [vmem:[#allocation2 + $0x48] sm:$0xff] }
  0x5c   : > { %5006 = vmatprep.subr.mxu0 %v6019_v5  ;;  %4981 = vmatprep.mubr.f32.mxu1 %v4030_v30  ;;  %v798_v29 = vld [vmem:[#allocation2 + $0x8] sm:$0xff]  ;;  %v813_v30 = vld [vmem:[#allocation2 + $0x80] sm:$0xff] }
  0x5d   : > { %5007 = vmatpush3.msra.mxu0 %v6019_v5  ;;  %4982 = vmatmul.mubr.f32.gmra.mxu1 %v4031_v31  ;;  %v821_v5 = vld [vmem:[#allocation2 + $0xc0] sm:$0xff] }
  0x5e   : > { %4926 = vmatmul.mubr.f32.gmra.mxu0 %v319_v32  ;;  %5008 = vmatprep.subr.mxu0 %v6026_v6  ;;  %v797_v31 = vld [vmem:[#allocation2] sm:$0xff]  ;;  %v844_v32 = vld [vmem:[#allocation2 + $0x178] sm:$0xff] }
  0x5f   : > { %5009 = vmatpush3.msra.mxu0 %v6026_v6  ;;  %4928 = vmatprep.mubr.f32.mxu0 %v320_v33  ;;  %v4047_v6 = vld [vmem:[%s7320_s1 + $0x138] sm:$0xff]  ;;  %v843_v33 = vld [vmem:[#allocation2 + $0x170] sm:$0xff] }
  0x60   : > { %5010 = vmatprep.subr.mxu0 %v6033_v7  ;;  %4984 = vmatprep.mubr.f32.mxu1 %v4032_v34  ;;  %v842_v34 = vld [vmem:[#allocation2 + $0x168] sm:$0xff] }
  0x61   : > { %5011 = vmatpush3.msra.mxu0 %v6033_v7  ;;  %4985 = vmatmul.mubr.f32.gmra.mxu1 %v4033_v35  ;;  %v805_v7 = vld [vmem:[#allocation2 + $0x40] sm:$0xff] }
  0x62   : > { %4929 = vmatmul.mubr.f32.gmra.mxu0 %v321_v36  ;;  %5012 = vmatprep.subr.mxu0 %v6040_v8  ;;  %v841_v35 = vld [vmem:[#allocation2 + $0x160] sm:$0xff]  ;;  %v840_v36 = vld [vmem:[#allocation2 + $0x158] sm:$0xff] }
  0x63   : > { %5013 = vmatpush3.msra.mxu0 %v6040_v8  ;;  %4931 = vmatprep.mubr.f32.mxu0 %v322_v37  ;;  %v4048_v8 = vld [vmem:[%s7320_s1 + $0x140] sm:$0xff]  ;;  %v839_v37 = vld [vmem:[#allocation2 + $0x150] sm:$0xff] }
  0x64   : > { %5014 = vmatprep.subr.mxu0 %v6047_v9  ;;  %4987 = vmatprep.mubr.f32.mxu1 %v4034_v38  ;;  %v838_v38 = vld [vmem:[#allocation2 + $0x148] sm:$0xff] }
  0x65   : > { %5015 = vmatpush3.msra.mxu0 %v6047_v9  ;;  %4988 = vmatmul.mubr.f32.gmra.mxu1 %v4035_v39  ;;  %v820_v9 = vld [vmem:[#allocation2 + $0xb8] sm:$0xff]  ;;  %v837_v39 = vld [vmem:[#allocation2 + $0x140] sm:$0xff] }
  0x66   : > { %4932 = vmatmul.mubr.f32.gmra.mxu0 %v323_v40  ;;  %5016 = vmatprep.subr.mxu0 %v6054_v10  ;;  %v836_v40 = vld [vmem:[#allocation2 + $0x138] sm:$0xff] }
  0x67   : > { %5017 = vmatpush3.msra.mxu0 %v6054_v10  ;;  %4934 = vmatprep.mubr.f32.mxu0 %v324_v41  ;;  %v804_v10 = vld [vmem:[#allocation2 + $0x38] sm:$0xff]  ;;  %v835_v41 = vld [vmem:[#allocation2 + $0x130] sm:$0xff] }
  0x68   : > { %5018 = vmatprep.subr.mxu0 %v6061_v11  ;;  %4990 = vmatprep.mubr.f32.mxu1 %v4036_v42  ;;  %v834_v42 = vld [vmem:[#allocation2 + $0x128] sm:$0xff] }
  0x69   : > { %5019 = vmatpush3.msra.mxu0 %v6061_v11  ;;  %4991 = vmatmul.mubr.f32.gmra.mxu1 %v4037_v43  ;;  %v819_v11 = vld [vmem:[#allocation2 + $0xb0] sm:$0xff]  ;;  %v833_v43 = vld [vmem:[#allocation2 + $0x120] sm:$0xff] }
  0x6a   : > { %4935 = vmatmul.mubr.f32.gmra.mxu0 %v325_v44  ;;  %5020 = vmatprep.subr.mxu0 %v6068_v12  ;;  %v832_v44 = vld [vmem:[#allocation2 + $0x118] sm:$0xff] }
  0x6b   : > { %5021 = vmatpush3.msra.mxu0 %v6068_v12  ;;  %4937 = vmatprep.mubr.f32.mxu0 %v326_v45  ;;  %v4049_v12 = vld [vmem:[%s7320_s1 + $0x148] sm:$0xff]  ;;  %v831_v45 = vld [vmem:[#allocation2 + $0x110] sm:$0xff] }
  0x6c   : > { %5022 = vmatprep.subr.mxu0 %v6075_v13  ;;  %4993 = vmatprep.mubr.f32.mxu1 %v4038_v46  ;;  %v830_v46 = vld [vmem:[#allocation2 + $0x108] sm:$0xff] }
  0x6d   : > { %5023 = vmatpush3.msra.mxu0 %v6075_v13  ;;  %4994 = vmatmul.mubr.f32.gmra.mxu1 %v4039_v47  ;;  %v803_v13 = vld [vmem:[#allocation2 + $0x30] sm:$0xff]  ;;  %v829_v47 = vld [vmem:[#allocation2 + $0x100] sm:$0xff] }
  0x6e   : > { %4938 = vmatmul.mubr.f32.gmra.mxu0 %v327_v48  ;;  %5024 = vmatprep.subr.mxu0 %v6082_v14 }
  0x6f   : > { %5025 = vmatpush3.msra.mxu0 %v6082_v14  ;;  %5028 = vmatprep.mubr.f32.mxu0 %v4040_v49  ;;  %v4050_v14 = vld [vmem:[%s7320_s1 + $0x150] sm:$0xff] }
  0x70   : > { %5026 = vmatprep.subr.mxu0 %v6089_v15  ;;  %4309 = vmatpush3.msra.mxu1 %v812_v50 }
  0x71   : > { %5027 = vmatpush3.msra.mxu0 %v6089_v15  ;;  %4310 = vmatprep.subr.mxu1 %v827_v51  ;;  %v818_v15 = vld [vmem:[#allocation2 + $0xa8] sm:$0xff] }
  0x72   : > { %5029 = vmatmul.mubr.f32.vlgmr.msra.gmra.mxu0 %v4041_v52  ;;  %4311 = vmatpush3.msra.mxu1 %v811_v53 }
  0x73   : > { %5031 = vmatprep.mubr.f32.mxu0 %v4042_v54  ;;  %4312 = vmatprep.subr.mxu1 %v826_v55 }
  0x74   : > { %4313 = vmatpush3.msra.mxu1 %v810_v56  ;;  %5052 = vmatprep.subr.mxu0 %v844_v32 }
  0x75   : > { %4314 = vmatprep.subr.mxu1 %v825_v57  ;;  %5053 = vmatpush3.msra.mxu0 %v844_v32  ;;  %v4058_v32 = vld [vmem:[%s7320_s1 + $0x180] sm:$0xff] }
  0x76   : > { %5032 = vmatmul.mubr.f32.gmra.mxu0 %v4043_v58  ;;  %4315 = vmatpush3.msra.mxu1 %v809_v59 }
  0x77   : > { %5034 = vmatprep.mubr.f32.mxu0 %v4044_v60  ;;  %4316 = vmatprep.subr.mxu1 %v824_v61 }
  0x78   : > { %4317 = vmatpush3.msra.mxu1 %v808_v62  ;;  %5054 = vmatprep.subr.mxu0 %v843_v33 }
  0x79   : > { %4318 = vmatprep.subr.mxu1 %v823_v63  ;;  %5055 = vmatpush3.msra.mxu0 %v843_v33  ;;  %v4074_v33 = vld [vmem:[%s7320_s1 + $0x200] sm:$0xff] }
  0x7a   : > { %5035 = vmatmul.mubr.f32.gmra.mxu0 %v4045_v0  ;;  %4319 = vmatpush3.msra.mxu1 %v807_v1 }
  0x7b   : > { %5037 = vmatprep.mubr.f32.mxu0 %v4046_v2  ;;  %4320 = vmatprep.subr.mxu1 %v822_v3 }
  0x7c   : > { %4321 = vmatpush3.msra.mxu1 %v806_v4  ;;  %5056 = vmatprep.subr.mxu0 %v842_v34 }
  0x7d   : > { %4322 = vmatprep.subr.mxu1 %v821_v5  ;;  %5057 = vmatpush3.msra.mxu0 %v842_v34 }
  0x7e   : > { %5038 = vmatmul.mubr.f32.gmra.mxu0 %v4047_v6  ;;  %4323 = vmatpush3.msra.mxu1 %v805_v7 }
  0x7f   : > { %5040 = vmatprep.mubr.f32.mxu0 %v4048_v8  ;;  %4324 = vmatprep.subr.mxu1 %v820_v9 }
  0x80   : > { %4325 = vmatpush3.msra.mxu1 %v804_v10  ;;  %5058 = vmatprep.subr.mxu0 %v841_v35 }
  0x81   : > { %4326 = vmatprep.subr.mxu1 %v819_v11  ;;  %5059 = vmatpush3.msra.mxu0 %v841_v35 }
  0x82   : > { %5041 = vmatmul.mubr.f32.gmra.mxu0 %v4049_v12  ;;  %4327 = vmatpush3.msra.mxu1 %v803_v13 }
  0x83   : > { %5043 = vmatprep.mubr.f32.mxu0 %v4050_v14  ;;  %4328 = vmatprep.subr.mxu1 %v818_v15 }
  0x84   : > { %4329 = vmatpush3.msra.mxu1 %v802_v16  ;;  %5060 = vmatprep.subr.mxu0 %v840_v36 }
  0x85   : > { %4330 = vmatprep.subr.mxu1 %v817_v17  ;;  %5061 = vmatpush3.msra.mxu0 %v840_v36 }
  0x86   : > { %5044 = vmatmul.mubr.f32.gmra.mxu0 %v4051_v18  ;;  %4331 = vmatpush3.msra.mxu1 %v801_v19 }
  0x87   : > { %5046 = vmatprep.mubr.f32.mxu0 %v4052_v20  ;;  %4332 = vmatprep.subr.mxu1 %v816_v21 }
  0x88   : > { %4333 = vmatpush3.msra.mxu1 %v800_v22  ;;  %5062 = vmatprep.subr.mxu0 %v839_v37 }
  0x89   : > { %4334 = vmatprep.subr.mxu1 %v815_v23  ;;  %5063 = vmatpush3.msra.mxu0 %v839_v37 }
  0x8a   : > { %5047 = vmatmul.mubr.f32.gmra.mxu0 %v4053_v24  ;;  %4335 = vmatpush3.msra.mxu1 %v799_v25 }
  0x8b   : > { %5049 = vmatprep.mubr.f32.mxu0 %v4054_v26  ;;  %4336 = vmatprep.subr.mxu1 %v814_v28 }
  0x8c   : > { %4337 = vmatpush3.msra.mxu1 %v798_v29  ;;  %5064 = vmatprep.subr.mxu0 %v838_v38 }
  0x8d   : > { %4338 = vmatprep.subr.mxu1 %v813_v30  ;;  %5065 = vmatpush3.msra.mxu0 %v838_v38 }
  0x8e   : > { %5050 = vmatmul.mubr.f32.gmra.mxu0 %v4055_v27  ;;  %4339 = vmatpush3.msra.mxu1 %v797_v31 }
  0x8f   : > { %5066 = vmatprep.subr.mxu0 %v837_v39 }
  0x90   : > { %5067 = vmatpush3.msra.mxu0 %v837_v39 }
  0x91   : > { %5068 = vmatprep.subr.mxu0 %v836_v40 }
  0x92   : > { %5069 = vmatpush3.msra.mxu0 %v836_v40 }
  0x93   : > { %5070 = vmatprep.subr.mxu0 %v835_v41 }
  0x94   : > { %5071 = vmatpush3.msra.mxu0 %v835_v41 }
  0x95   : > { %5072 = vmatprep.subr.mxu0 %v834_v42 }
  0x96   : > { %5073 = vmatpush3.msra.mxu0 %v834_v42 }
  0x97   : > { %5074 = vmatprep.subr.mxu0 %v833_v43 }
  0x98   : > { %5075 = vmatpush3.msra.mxu0 %v833_v43 }
  0x99   : > { %5076 = vmatprep.subr.mxu0 %v832_v44 }
  0x9a   : > { %5077 = vmatpush3.msra.mxu0 %v832_v44 }
  0x9b   : > { %5078 = vmatprep.subr.mxu0 %v831_v45 }
  0x9c   : > { %5079 = vmatpush3.msra.mxu0 %v831_v45 }
  0x9d   : > { %5080 = vmatprep.subr.mxu0 %v830_v46 }
  0x9e   : > { %5081 = vmatpush3.msra.mxu0 %v830_v46 }
  0x9f   : > { %5082 = vmatprep.subr.mxu0 %v829_v47 }
  0xa0   : > { %5083 = vmatpush3.msra.mxu0 %v829_v47 }
 0x111   : > { %v4918_v48 = vpop.f32.mrf.mxu0  ;;  %v4974_v49 = vpop.f32.mrf.mxu1 }
 0x113   : > { %v394_v50 = vpop.f32.mrf.mxu0  ;;  %v556_v51 = vpop.f32.mrf.mxu1 }
 0x114   : > { %915 = vmatprep.mubr.f32.mxu1 %v556_v51 }
 0x115   : > { %916 = vmatmul.mubr.f32.vlgmr.msra.gmra.mxu1 %v394_v50  ;;  %v4977_v52 = vpop.f32.mrf.mxu1 }
 0x116   : > { %v4921_v53 = vpop.f32.mrf.mxu0  ;;  %920 = vmatprep.mubr.f32.mxu1 %v4974_v49 }
 0x117   : > { %v566_v54 = vpop.f32.mrf.mxu1 }
 0x118   : > { %v404_v55 = vpop.f32.mrf.mxu0 }
 0x119   : > { %921 = vmatmul.mubr.f32.gmra.mxu1 %v4918_v48  ;;  %v4980_v57 = vpop.f32.mrf.mxu1 }
 0x11a   : > { %v4924_v56 = vpop.f32.mrf.mxu0  ;;  %925 = vmatprep.mubr.f32.mxu1 %v566_v54 }
 0x11b   : > { %v576_v60 = vpop.f32.mrf.mxu1 }
 0x11c   : > { %v414_v58 = vpop.f32.mrf.mxu0 }
 0x11d   : > { %926 = vmatmul.mubr.f32.gmra.mxu1 %v404_v55  ;;  %v4983_v63 = vpop.f32.mrf.mxu1 }
 0x11e   : > { %v4927_v59 = vpop.f32.mrf.mxu0  ;;  %930 = vmatprep.mubr.f32.mxu1 %v4977_v52 }
 0x11f   : > { %v586_v2 = vpop.f32.mrf.mxu1 }
 0x120   : > { %v424_v61 = vpop.f32.mrf.mxu0 }
 0x121   : > { %931 = vmatmul.mubr.f32.gmra.mxu1 %v4921_v53  ;;  %v4986_v5 = vpop.f32.mrf.mxu1 }
 0x122   : > { %v4930_v62 = vpop.f32.mrf.mxu0  ;;  %935 = vmatprep.mubr.f32.mxu1 %v576_v60 }
 0x123   : > { %v596_v8 = vpop.f32.mrf.mxu1 }
 0x124   : > { %v434_v0 = vpop.f32.mrf.mxu0 }
 0x125   : > { %936 = vmatmul.mubr.f32.gmra.mxu1 %v414_v58  ;;  %v4989_v11 = vpop.f32.mrf.mxu1 }
 0x126   : > { %v4933_v1 = vpop.f32.mrf.mxu0  ;;  %940 = vmatprep.mubr.f32.mxu1 %v4980_v57 }
 0x127   : > { %v606_v14 = vpop.f32.mrf.mxu1 }
 0x128   : > { %v444_v3 = vpop.f32.mrf.mxu0 }
 0x129   : > { %941 = vmatmul.mubr.f32.gmra.mxu1 %v4924_v56  ;;  %v4992_v17 = vpop.f32.mrf.mxu1 }
 0x12a   : > { %v4936_v4 = vpop.f32.mrf.mxu0  ;;  %945 = vmatprep.mubr.f32.mxu1 %v586_v2 }
 0x12b   : > { %v616_v20 = vpop.f32.mrf.mxu1 }
 0x12c   : > { %v454_v6 = vpop.f32.mrf.mxu0 }
 0x12d   : > { %946 = vmatmul.mubr.f32.gmra.mxu1 %v424_v61  ;;  %v4995_v23 = vpop.f32.mrf.mxu1 }
 0x12e   : > { %v4939_v7 = vpop.f32.mrf.mxu0  ;;  %950 = vmatprep.mubr.f32.mxu1 %v4983_v63 }
 0x12f   : > { %v626_v26 = vpop.f32.mrf.mxu1 }
 0x130   : > { %v464_v9 = vpop.f32.mrf.mxu0 }
 0x131   : > { %951 = vmatmul.mubr.f32.gmra.mxu1 %v4927_v59 }
 0x132   : > { %v5030_v10 = vpop.f32.mrf.mxu0  ;;  %955 = vmatprep.mubr.f32.mxu1 %v596_v8 }
 0x134   : > { %v718_v12 = vpop.f32.mrf.mxu0 }
 0x135   : > { %5084 = vmatprep.mubr.f32.mxu0 %v718_v12  ;;  %956 = vmatmul.mubr.f32.gmra.mxu1 %v434_v0 }
 0x136   : > { %v5033_v13 = vpop.f32.mrf.mxu0  ;;  %5085 = vmatmul.mubr.f32.vlgmr.msra.gmra.mxu0 %v5030_v10  ;;  %960 = vmatprep.mubr.f32.mxu1 %v4986_v5 }
 0x138   : > { %v728_v15 = vpop.f32.mrf.mxu0 }
 0x139   : > { %5087 = vmatprep.mubr.f32.mxu0 %v728_v15  ;;  %961 = vmatmul.mubr.f32.gmra.mxu1 %v4930_v62 }
 0x13a   : > { %v5036_v16 = vpop.f32.mrf.mxu0  ;;  %5088 = vmatmul.mubr.f32.gmra.mxu0 %v5033_v13  ;;  %965 = vmatprep.mubr.f32.mxu1 %v606_v14 }
 0x13c   : > { %v738_v18 = vpop.f32.mrf.mxu0 }
 0x13d   : > { %5090 = vmatprep.mubr.f32.mxu0 %v738_v18  ;;  %966 = vmatmul.mubr.f32.gmra.mxu1 %v444_v3 }
 0x13e   : > { %v5039_v19 = vpop.f32.mrf.mxu0  ;;  %5091 = vmatmul.mubr.f32.gmra.mxu0 %v5036_v16  ;;  %970 = vmatprep.mubr.f32.mxu1 %v4989_v11  ;;  %v6330_v16 = vld [vmem:[%s7323_s4] ss:$0 sm:$0xff] }
 0x140   : > { %v748_v21 = vpop.f32.mrf.mxu0 }
 0x141   : > { %5093 = vmatprep.mubr.f32.mxu0 %v748_v21  ;;  %971 = vmatmul.mubr.f32.gmra.mxu1 %v4933_v1 }
 0x142   : > { %v5042_v22 = vpop.f32.mrf.mxu0  ;;  %5094 = vmatmul.mubr.f32.gmra.mxu0 %v5039_v19  ;;  %975 = vmatprep.mubr.f32.mxu1 %v616_v20 }
 0x144   : > { %v758_v24 = vpop.f32.mrf.mxu0 }
 0x145   : > { %5096 = vmatprep.mubr.f32.mxu0 %v758_v24  ;;  %976 = vmatmul.mubr.f32.gmra.mxu1 %v454_v6 }
 0x146   : > { %v5045_v25 = vpop.f32.mrf.mxu0  ;;  %5097 = vmatmul.mubr.f32.gmra.mxu0 %v5042_v22  ;;  %980 = vmatprep.mubr.f32.mxu1 %v4992_v17 }
 0x148   : > { %v768_v27 = vpop.f32.mrf.mxu0 }
 0x149   : > { %5099 = vmatprep.mubr.f32.mxu0 %v768_v27  ;;  %981 = vmatmul.mubr.f32.gmra.mxu1 %v4936_v4 }
 0x14a   : > { %v5048_v28 = vpop.f32.mrf.mxu0  ;;  %5100 = vmatmul.mubr.f32.gmra.mxu0 %v5045_v25  ;;  %985 = vmatprep.mubr.f32.mxu1 %v626_v26 }
 0x14c   : > { %v778_v29 = vpop.f32.mrf.mxu0 }
 0x14d   : > { %5102 = vmatprep.mubr.f32.mxu0 %v778_v29  ;;  %986 = vmatmul.mubr.f32.gmra.mxu1 %v464_v9 }
 0x14e   : > { %v5051_v30 = vpop.f32.mrf.mxu0  ;;  %5103 = vmatmul.mubr.f32.gmra.mxu0 %v5048_v28  ;;  %990 = vmatprep.mubr.f32.mxu1 %v4995_v23 }
 0x150   : > { %v788_v31 = vpop.f32.mrf.mxu0 }
 0x151   : > { %5105 = vmatprep.mubr.f32.mxu0 %v788_v31  ;;  %991 = vmatmul.mubr.f32.gmra.mxu1 %v4939_v7 }
 0x152   : > { %5106 = vmatmul.mubr.f32.gmra.mxu0 %v5051_v30  ;;  %5196 = vmatprep.mubr.f32.mxu1 %v4074_v33 }
 0x153   : > { %5140 = vmatprep.mubr.f32.mxu0 %v4058_v32 }
 0x1d5   : > { %v6281_v34 = vpop.f32.mrf.mxu1 }
 0x1d7   : > { %v6283_v35 = vpop.f32.mrf.mxu1 }
 0x1d9   : > { %v6285_v36 = vpop.f32.mrf.mxu1 }
 0x1db   : > { %v6287_v37 = vpop.f32.mrf.mxu1 }
 0x1dd   : > { %v6289_v38 = vpop.f32.mrf.mxu1 }
 0x1df   : > { %v6291_v39 = vpop.f32.mrf.mxu1 }
 0x1e1   : > { %v6293_v40 = vpop.f32.mrf.mxu1 }
 0x1e3   : > { %v6295_v41 = vpop.f32.mrf.mxu1 }
 0x1e5   : > { %v6297_v42 = vpop.f32.mrf.mxu1 }
 0x1e7   : > { %v6299_v43 = vpop.f32.mrf.mxu1 }
 0x1e9   : > { %v6301_v44 = vpop.f32.mrf.mxu1 }
 0x1eb   : > { %v6303_v45 = vpop.f32.mrf.mxu1 }
 0x1ed   : > { %v6305_v46 = vpop.f32.mrf.mxu1 }
 0x1ef   : > { %v6307_v47 = vpop.f32.mrf.mxu1 }
 0x1f1   : > { %v4361_v48 = vpop.f32.mrf.mxu1 }
 0x1f3   : > { %v4362_v49 = vpop.f32.mrf.mxu1 }
 0x1f5   : > { %v4364_v50 = vpop.f32.mrf.mxu1 }
 0x1f6   : > { %v6309_v51 = vpop.f32.mrf.mxu0 }
 0x1f7   : > { %v4365_v52 = vpop.f32.mrf.mxu1 }
 0x1f8   : > { %v6311_v53 = vpop.f32.mrf.mxu0 }
 0x1f9   : > { %v4367_v54 = vpop.f32.mrf.mxu1 }
 0x1fa   : > { %v6313_v55 = vpop.f32.mrf.mxu0 }
 0x1fb   : > { %v4368_v56 = vpop.f32.mrf.mxu1 }
 0x1fc   : > { %v6315_v57 = vpop.f32.mrf.mxu0  ;;  %v4369_v32 = vadd.f32 %v4368_v56, %v4367_v54 }
 0x1fd   : > { %v4370_v58 = vpop.f32.mrf.mxu1 }
 0x1fe   : > { %v6317_v59 = vpop.f32.mrf.mxu0  ;;  %v963_v54 = vadd.f32 %v4369_v32, %v6330_v16 }
 0x1ff   : > { %v4371_v60 = vpop.f32.mrf.mxu1 }
 0x200   : > { %v6319_v61 = vpop.f32.mrf.mxu0  ;;  %v4372_v28 = vadd.f32 %v4371_v60, %v4370_v58  ;;  %v4363_v58 = vadd.f32 %v4362_v49, %v4361_v48 }
 0x201   : > { %v4373_v62 = vpop.f32.mrf.mxu1 }
 0x202   : > { %v6321_v63 = vpop.f32.mrf.mxu0 }
 0x203   : > { %v4374_v0 = vpop.f32.mrf.mxu1 }
 0x204   : > { %v6323_v1 = vpop.f32.mrf.mxu0  ;;  %v4375_v25 = vadd.f32 %v4374_v0, %v4373_v62  ;;  %v968_v62 = vadd.f32 %v4372_v28, %v6330_v16 }
 0x205   : > { %v4376_v2 = vpop.f32.mrf.mxu1 }
 0x206   : > { %v5098_v3 = vpop.f32.mrf.mxu0  ;;  %v973_v33 = vadd.f32 %v4375_v25, %v6330_v16 }
 0x207   : > { %v4377_v4 = vpop.f32.mrf.mxu1  ;;  %v1108_v48 = vadd.f32 %v5098_v3, %v963_v54  ;;  %v4062_v54 = vld [vmem:[%s7320_s1 + $0x1a0] sm:$0xff] }
 0x208   : > { %v6325_v5 = vpop.f32.mrf.mxu0  ;;  %v4378_v21 = vadd.f32 %v4377_v4, %v4376_v2  ;;  %v4366_v4 = vadd.f32 %v4365_v52, %v4364_v50  ;;  %v4360_v50 = vadd.f32 %v6307_v47, %v6305_v46  ;;  %v953_v46 = vadd.f32 %v4363_v58, %v6330_v16  ;;  %v4061_v58 = vld [vmem:[%s7320_s1 + $0x198] sm:$0xff] }
 0x209   : > { %v4379_v6 = vpop.f32.mrf.mxu1  ;;  %vm1150_vm6 = vcmp.ge.f32.partialorder %v1108_v48, 0.0 }
 0x20a   : > { %v5101_v7 = vpop.f32.mrf.mxu0  ;;  %v978_v30 = vadd.f32 %v4378_v21, %v6330_v16  ;;  %v958_v49 = vadd.f32 %v4366_v4, %v6330_v16  ;;  %v4060_v4 = vld [vmem:[%s7320_s1 + $0x190] sm:$0xff] }
 0x20b   : > { %v4380_v8 = vpop.f32.mrf.mxu1 }
 0x20c   : > { %v1112_v9 = vpop.f32.mrf.mxu0  ;;  %v4381_v13 = vadd.f32 %v4380_v8, %v4379_v6  ;;  %v1103_v47 = vadd.f32 %v6325_v5, %v958_v49  ;;  %v948_v5 = vadd.f32 %v4360_v50, %v6330_v16  ;;  %v4080_v50 = vld [vmem:[%s7320_s1 + $0x230] sm:$0xff]  ;;  %v4065_v49 = vld [vmem:[%s7320_s1 + $0x1b8] sm:$0xff] }
 0x20d   : > { %v4382_v10 = vpop.f32.mrf.mxu1  ;;  %v1113_v56 = vadd.f32 %v1112_v9, %v968_v62  ;;  %v4357_v9 = vadd.f32 %v6303_v45, %v6301_v44  ;;  %v4354_v44 = vadd.f32 %v6299_v43, %v6297_v42  ;;  %v1098_v45 = vadd.f32 %v6321_v63, %v953_v46  ;;  %v1709_v62 = vld [vmem:[#allocation2 + $0x278] sm:$0xff]  ;;  %v4067_v46 = vld [vmem:[%s7320_s1 + $0x1c8] sm:$0xff] }
 0x20e   : > { %v5104_v11 = vpop.f32.mrf.mxu0  ;;  %v983_v22 = vadd.f32 %v4381_v13, %v6330_v16  ;;  %v4351_v42 = vadd.f32 %v6295_v41, %v6293_v40  ;;  %v1093_v63 = vadd.f32 %v6323_v1, %v948_v5  ;;  %v4348_v40 = vadd.f32 %v6291_v39, %v6289_v38  ;;  %v4086_v5 = vld [vmem:[%s7320_s1 + $0x260] sm:$0xff] }
 0x20f   : > { %v4383_v12 = vpop.f32.mrf.mxu1  ;;  %v1167_v3 = vmul.f32 0.2, %v1113_v56  ;;  %vm1151_vm5 = vcmp.ge.f32.partialorder %v1113_v56, 0.0  ;;  %v943_v43 = vadd.f32 %v4357_v9, %v6330_v16  ;;  %vm1149_vm7 = vcmp.ge.f32.partialorder %v1103_v47, 0.0  ;;  %v4083_v9 = vld [vmem:[%s7320_s1 + $0x248] sm:$0xff] }
 0x210   : > { %v4384_v14 = vadd.f32 %v4383_v12, %v4382_v10  ;;  %v1122_v15 = vpop.f32.mrf.mxu0  ;;  %v1128_v29 = vadd.f32 %v5104_v11, %v983_v22  ;;  %v1118_v10 = vadd.f32 %v5101_v7, %v973_v33  ;;  %v938_v1 = vadd.f32 %v4354_v44, %v6330_v16  ;;  %v4069_v44 = vld [vmem:[%s7320_s1 + $0x1d8] sm:$0xff] }
 0x211   : > { %v4385_v17 = vpop.f32.mrf.mxu1  ;;  %v1123_v6 = vadd.f32 %v1122_v15, %v978_v30  ;;  %v1088_v41 = vadd.f32 %v6317_v59, %v943_v43  ;;  %v4345_v38 = vadd.f32 %v6287_v37, %v6285_v36  ;;  %vm1148_vm8 = vcmp.ge.f32.partialorder %v1098_v45, 0.0  ;;  %v4088_v43 = vld [vmem:[%s7320_s1 + $0x270] sm:$0xff] }
 0x212   : > { %v5107_v18 = vpop.f32.mrf.mxu0  ;;  %v988_v19 = vadd.f32 %v4384_v14, %v6330_v16  ;;  %v1170_v0 = vmul.f32 0.2, %v1128_v29  ;;  %vm1154_vm2 = vcmp.ge.f32.partialorder %v1128_v29, 0.0  ;;  %v1168_v52 = vmul.f32 0.2, %v1118_v10 }
 0x213   : > { %v4386_v20 = vpop.f32.mrf.mxu1  ;;  %v1169_v60 = vmul.f32 0.2, %v1123_v6  ;;  %vm1153_vm3 = vcmp.ge.f32.partialorder %v1123_v6, 0.0  ;;  %vm1152_vm4 = vcmp.ge.f32.partialorder %v1118_v10, 0.0  ;;  %v1166_v14 = vmul.f32 0.2, %v1108_v48 }
 0x214   : > { %v4387_v23 = vadd.f32 %v4386_v20, %v4385_v17  ;;  %v1132_v24 = vpop.f32.mrf.mxu0  ;;  %v6353_v7 = vsel %vm1154_vm2, %v1128_v29, %v1170_v0  ;;  %v6375_v15 = vsel %vm1152_vm4, %v1118_v10, %v1168_v52  ;;  %v1165_v17 = vmul.f32 0.2, %v1103_v47  ;;  %v4076_v10 = vld [vmem:[%s7320_s1 + $0x210] sm:$0xff]  ;;  %v4077_v0 = vld [vmem:[%s7320_s1 + $0x218] sm:$0xff]  ;;  %v4066_v52 = vld [vmem:[%s7320_s1 + $0x1c0] sm:$0xff] }
 0x215   : > { %v1133_v27 = vadd.f32 %v1132_v24, %v988_v19  ;;  %v6364_v13 = vsel %vm1153_vm3, %v1123_v6, %v1169_v60  ;;  %v1164_v19 = vmul.f32 0.2, %v1098_v45  ;;  %v6397_v20 = vsel %vm1150_vm6, %v1108_v48, %v1166_v14  ;;  %v4063_v60 = vld [vmem:[%s7320_s1 + $0x1a8] sm:$0xff]  ;;  %v4081_v48 = vld [vmem:[%s7320_s1 + $0x238] sm:$0xff] }
 0x216   : > { %v993_v26 = vadd.f32 %v4387_v23, %v6330_v16  ;;  %v933_v39 = vadd.f32 %v4351_v42, %v6330_v16  ;;  %v1083_v59 = vadd.f32 %v6319_v61, %v938_v1  ;;  %v1163_v21 = vmul.f32 0.2, %v1093_v63  ;;  %v4087_v14 = vld [vmem:[%s7320_s1 + $0x268] sm:$0xff]  ;;  %v4072_v42 = vld [vmem:[%s7320_s1 + $0x1f0] sm:$0xff] }
 0x217   : > { %v1171_v2 = vmul.f32 0.2, %v1133_v27  ;;  %vm1155_vm1 = vcmp.ge.f32.partialorder %v1133_v27, 0.0  ;;  %v6408_v22 = vsel %vm1149_vm7, %v1103_v47, %v1165_v17  ;;  %v4342_v36 = vadd.f32 %v6283_v35, %v6281_v34  ;;  %v4068_v47 = vld [vmem:[%s7320_s1 + $0x1d0] sm:$0xff]  ;;  %v4073_v17 = vld [vmem:[%s7320_s1 + $0x1f8] sm:$0xff]  ;;  %v4091_v1 = vld [vmem:[%s7320_s1 + $0x288] sm:$0xff] }
 0x218   : > { %v1138_v31 = vadd.f32 %v5107_v18, %v993_v26  ;;  %v6386_v18 = vsel %vm1151_vm5, %v1113_v56, %v1167_v3  ;;  %vm1147_vm9 = vcmp.ge.f32.partialorder %v1093_v63, 0.0  ;;  %v1078_v37 = vadd.f32 %v6313_v55, %v933_v39  ;;  %v4078_v56 = vld [vmem:[%s7320_s1 + $0x220] sm:$0xff]  ;;  %v4084_v3 = vld [vmem:[%s7320_s1 + $0x250] sm:$0xff]  ;;  %v1691_v39 = vld [vmem:[#allocation2 + $0x1e8] sm:$0xff] }
 0x219   : > { %v6343_v11 = vsel %vm1155_vm1, %v1133_v27, %v1171_v2  ;;  %v928_v61 = vadd.f32 %v4348_v40, %v6330_v16  ;;  %v1162_v23 = vmul.f32 0.2, %v1088_v41  ;;  %v6419_v24 = vsel %vm1148_vm8, %v1098_v45, %v1164_v19  ;;  %v4075_v2 = vld [vmem:[%s7320_s1 + $0x208] sm:$0xff]  ;;  %v4070_v45 = vld [vmem:[%s7320_s1 + $0x1e0] sm:$0xff]  ;;  %v1693_v40 = vld [vmem:[#allocation2 + $0x1f8] sm:$0xff] }
 0x21a   : > { %vm1156_vm0 = vcmp.ge.f32.partialorder %v1138_v31, 0.0  ;;  %v1172_v8 = vmul.f32 0.2, %v1138_v31  ;;  %vm1146_vm10 = vcmp.ge.f32.partialorder %v1088_v41, 0.0  ;;  %v923_v34 = vadd.f32 %v4345_v38, %v6330_v16  ;;  %v1692_v19 = vld [vmem:[#allocation2 + $0x1f0] sm:$0xff]  ;;  %v1707_v38 = vld [vmem:[#allocation2 + $0x268] sm:$0xff] }
 0x21b   : > { %v1073_v35 = vadd.f32 %v6315_v57, %v928_v61  ;;  %v1161_v55 = vmul.f32 0.2, %v1083_v59  ;;  %v6427_v25 = vsel %vm1147_vm9, %v1093_v63, %v1163_v21  ;;  %vm1145_vm11 = vcmp.ge.f32.partialorder %v1083_v59, 0.0  ;;  %v4089_v63 = vld [vmem:[%s7320_s1 + $0x278] sm:$0xff] }
 0x21c   : > { %v6338_v12 = vsel %vm1156_vm0, %v1138_v31, %v1172_v8  ;;  %v1068_v26 = vadd.f32 %v6309_v51, %v923_v34  ;;  %v918_v27 = vadd.f32 %v4342_v36, %v6330_v16  ;;  %v1160_v28 = vmul.f32 0.2, %v1078_v37  ;;  %v4059_v8 = vld [vmem:[%s7320_s1 + $0x188] sm:$0xff]  ;;  %v4093_v21 = vld [vmem:[%s7320_s1 + $0x298] sm:$0xff]  ;;  %v4094_v36 = vld [vmem:[%s7320_s1 + $0x2a0] sm:$0xff] }
 0x21d   : > { %5108 = vmatprep.subr.mxu0 %v6338_v12  ;;  %5164 = vmatprep.subr.mxu1 %v6338_v12  ;;  %v6435_v29 = vsel %vm1146_vm10, %v1088_v41, %v1162_v23  ;;  %vm1144_vm12 = vcmp.ge.f32.partialorder %v1078_v37, 0.0  ;;  %v1159_v30 = vmul.f32 0.2, %v1073_v35  ;;  %v6442_v31 = vsel %vm1145_vm11, %v1083_v59, %v1161_v55  ;;  %v1708_v41 = vld [vmem:[#allocation2 + $0x270] sm:$0xff]  ;;  %v1706_v59 = vld [vmem:[#allocation2 + $0x260] sm:$0xff]  ;;  %v1689_v61 = vld [vmem:[#allocation2 + $0x1d8] sm:$0xff] }
 0x21e   : > { %5109 = vmatpush3.msra.mxu0 %v6338_v12  ;;  %5165 = vmatpush3.msra.mxu1 %v6338_v12  ;;  %v1063_v57 = vadd.f32 %v6311_v53, %v918_v27  ;;  %vm1143_vm13 = vcmp.ge.f32.partialorder %v1073_v35, 0.0  ;;  %v1158_v51 = vmul.f32 0.2, %v1068_v26  ;;  %v6448_v16 = vsel %vm1144_vm12, %v1078_v37, %v1160_v28  ;;  %v1705_v37 = vld [vmem:[#allocation2 + $0x258] sm:$0xff]  ;;  %v1704_v23 = vld [vmem:[#allocation2 + $0x250] sm:$0xff]  ;;  %v1703_v55 = vld [vmem:[#allocation2 + $0x248] sm:$0xff] }
 0x21f   : > { %5110 = vmatprep.subr.mxu0 %v6343_v11  ;;  %5166 = vmatprep.subr.mxu1 %v6343_v11  ;;  %vm1142_vm14 = vcmp.ge.f32.partialorder %v1068_v26, 0.0  ;;  %v6454_v32 = vsel %vm1143_vm13, %v1073_v35, %v1159_v30  ;;  %v1688_v34 = vld [vmem:[#allocation2 + $0x1d0] sm:$0xff]  ;;  %v4097_v27 = vld [vmem:[%s7320_s1 + $0x2b8] sm:$0xff]  ;;  %v1686_v28 = vld [vmem:[#allocation2 + $0x1c0] sm:$0xff] }
 0x220   : > { %5111 = vmatpush3.msra.mxu0 %v6343_v11  ;;  %5167 = vmatpush3.msra.mxu1 %v6343_v11  ;;  %v1157_v53 = vmul.f32 0.2, %v1063_v57  ;;  %vm1141_vm15 = vcmp.ge.f32.partialorder %v1063_v57, 0.0  ;;  %v6460_v33 = vsel %vm1142_vm14, %v1068_v26, %v1158_v51  ;;  %v4096_v35 = vld [vmem:[%s7320_s1 + $0x2b0] sm:$0xff]  ;;  %v1702_v26 = vld [vmem:[#allocation2 + $0x240] sm:$0xff]  ;;  %v1685_v30 = vld [vmem:[#allocation2 + $0x1b8] sm:$0xff] }
 0x221   : > { %5112 = vmatprep.subr.mxu0 %v6353_v7  ;;  %5168 = vmatprep.subr.mxu1 %v6353_v7  ;;  %v4099_v51 = vld [vmem:[%s7320_s1 + $0x2c8] sm:$0xff] }
 0x222   : > { %5113 = vmatpush3.msra.mxu0 %v6353_v7  ;;  %5169 = vmatpush3.msra.mxu1 %v6353_v7  ;;  %v6466_v6 = vsel %vm1141_vm15, %v1063_v57, %v1157_v53  ;;  %v1701_v57 = vld [vmem:[#allocation2 + $0x238] sm:$0xff]  ;;  %v4100_v53 = vld [vmem:[%s7320_s1 + $0x2d0] sm:$0xff] }
 0x223   : > { %5114 = vmatprep.subr.mxu0 %v6364_v13  ;;  %5170 = vmatprep.subr.mxu1 %v6364_v13 }
 0x224   : > { %5115 = vmatpush3.msra.mxu0 %v6364_v13  ;;  %5171 = vmatpush3.msra.mxu1 %v6364_v13 }
 0x225   : > { %5116 = vmatprep.subr.mxu0 %v6375_v15  ;;  %5172 = vmatprep.subr.mxu1 %v6375_v15 }
 0x226   : > { %5117 = vmatpush3.msra.mxu0 %v6375_v15  ;;  %5173 = vmatpush3.msra.mxu1 %v6375_v15 }
 0x227   : > { %5118 = vmatprep.subr.mxu0 %v6386_v18  ;;  %5174 = vmatprep.subr.mxu1 %v6386_v18 }
 0x228   : > { %5119 = vmatpush3.msra.mxu0 %v6386_v18  ;;  %5175 = vmatpush3.msra.mxu1 %v6386_v18 }
 0x229   : > { %5120 = vmatprep.subr.mxu0 %v6397_v20  ;;  %5176 = vmatprep.subr.mxu1 %v6397_v20 }
 0x22a   : > { %5121 = vmatpush3.msra.mxu0 %v6397_v20  ;;  %5177 = vmatpush3.msra.mxu1 %v6397_v20 }
 0x22b   : > { %5122 = vmatprep.subr.mxu0 %v6408_v22  ;;  %5178 = vmatprep.subr.mxu1 %v6408_v22 }
 0x22c   : > { %5123 = vmatpush3.msra.mxu0 %v6408_v22  ;;  %5179 = vmatpush3.msra.mxu1 %v6408_v22 }
 0x22d   : > { %5124 = vmatprep.subr.mxu0 %v6419_v24  ;;  %5180 = vmatprep.subr.mxu1 %v6419_v24 }
 0x22e   : > { %5125 = vmatpush3.msra.mxu0 %v6419_v24  ;;  %5181 = vmatpush3.msra.mxu1 %v6419_v24 }
 0x22f   : > { %5126 = vmatprep.subr.mxu0 %v6427_v25  ;;  %5182 = vmatprep.subr.mxu1 %v6427_v25 }
 0x230   : > { %5127 = vmatpush3.msra.mxu0 %v6427_v25  ;;  %5183 = vmatpush3.msra.mxu1 %v6427_v25 }
 0x231   : > { %5128 = vmatprep.subr.mxu0 %v6435_v29  ;;  %5184 = vmatprep.subr.mxu1 %v6435_v29 }
 0x232   : > { %5129 = vmatpush3.msra.mxu0 %v6435_v29  ;;  %5185 = vmatpush3.msra.mxu1 %v6435_v29 }
 0x233   : > { %5130 = vmatprep.subr.mxu0 %v6442_v31  ;;  %5186 = vmatprep.subr.mxu1 %v6442_v31 }
 0x234   : > { %5131 = vmatpush3.msra.mxu0 %v6442_v31  ;;  %5187 = vmatpush3.msra.mxu1 %v6442_v31 }
 0x235   : > { %5132 = vmatprep.subr.mxu0 %v6448_v16  ;;  %5188 = vmatprep.subr.mxu1 %v6448_v16 }
 0x236   : > { %5133 = vmatpush3.msra.mxu0 %v6448_v16  ;;  %5189 = vmatpush3.msra.mxu1 %v6448_v16 }
 0x237   : > { %5134 = vmatprep.subr.mxu0 %v6454_v32  ;;  %5190 = vmatprep.subr.mxu1 %v6454_v32 }
 0x238   : > { %5135 = vmatpush3.msra.mxu0 %v6454_v32  ;;  %5191 = vmatpush3.msra.mxu1 %v6454_v32 }
 0x239   : > { %5136 = vmatprep.subr.mxu0 %v6460_v33  ;;  %5192 = vmatprep.subr.mxu1 %v6460_v33 }
 0x23a   : > { %5137 = vmatpush3.msra.mxu0 %v6460_v33  ;;  %5193 = vmatpush3.msra.mxu1 %v6460_v33 }
 0x23b   : > { %5138 = vmatprep.subr.mxu0 %v6466_v6  ;;  %5194 = vmatprep.subr.mxu1 %v6466_v6 }
 0x23c   : > { %5139 = vmatpush3.msra.mxu0 %v6466_v6  ;;  %5195 = vmatpush3.msra.mxu1 %v6466_v6 }
 0x23d   : > { %5141 = vmatmul.mubr.f32.vlgmr.msra.gmra.mxu0 %v4059_v8  ;;  %5197 = vmatmul.mubr.f32.vlgmr.msra.gmra.mxu1 %v4075_v2  ;;  %v4101_v8 = vld [vmem:[%s7320_s1 + $0x2d8] sm:$0xff]  ;;  %v1682_v2 = vld [vmem:[#allocation2 + $0x1a0] sm:$0xff] }
 0x23e   : > { %5220 = vmatprep.subr.mxu0 %v6338_v12  ;;  %5143 = vmatprep.mubr.f32.mxu0 %v4060_v4  ;;  %v4102_v4 = vld [vmem:[%s7320_s1 + $0x2e0] sm:$0xff] }
 0x23f   : > { %5221 = vmatpush3.msra.mxu0 %v6338_v12  ;;  %5199 = vmatprep.mubr.f32.mxu1 %v4076_v10  ;;  %v4079_v12 = vld [vmem:[%s7320_s1 + $0x228] sm:$0xff]  ;;  %v1697_v10 = vld [vmem:[#allocation2 + $0x218] sm:$0xff] }
 0x240   : > { %5222 = vmatprep.subr.mxu0 %v6343_v11  ;;  %4516 = vmatprep.subr.mxu1 %v1709_v62  ;;  %v1681_v62 = vld [vmem:[#allocation2 + $0x198] sm:$0xff] }
 0x241   : > { %5223 = vmatpush3.msra.mxu0 %v6343_v11  ;;  %5200 = vmatmul.mubr.f32.gmra.mxu1 %v4077_v0  ;;  %v4064_v11 = vld [vmem:[%s7320_s1 + $0x1b0] sm:$0xff] }
 0x242   : > { %5144 = vmatmul.mubr.f32.gmra.mxu0 %v4061_v58  ;;  %5224 = vmatprep.subr.mxu0 %v6353_v7  ;;  %v1696_v0 = vld [vmem:[#allocation2 + $0x210] sm:$0xff]  ;;  %v4103_v58 = vld [vmem:[%s7320_s1 + $0x2e8] sm:$0xff] }
 0x243   : > { %5225 = vmatpush3.msra.mxu0 %v6353_v7  ;;  %5146 = vmatprep.mubr.f32.mxu0 %v4062_v54  ;;  %v4082_v7 = vld [vmem:[%s7320_s1 + $0x240] sm:$0xff]  ;;  %v1680_v54 = vld [vmem:[#allocation2 + $0x190] sm:$0xff] }
 0x244   : > { %5226 = vmatprep.subr.mxu0 %v6364_v13  ;;  %5202 = vmatprep.mubr.f32.mxu1 %v4078_v56  ;;  %v4104_v56 = vld [vmem:[%s7320_s1 + $0x2f0] sm:$0xff] }
 0x245   : > { %5227 = vmatpush3.msra.mxu0 %v6364_v13  ;;  %5203 = vmatmul.mubr.f32.gmra.mxu1 %v4079_v12  ;;  %v4085_v13 = vld [vmem:[%s7320_s1 + $0x258] sm:$0xff] }
 0x246   : > { %5147 = vmatmul.mubr.f32.gmra.mxu0 %v4063_v60  ;;  %5228 = vmatprep.subr.mxu0 %v6375_v15  ;;  %v4105_v12 = vld [vmem:[%s7320_s1 + $0x2f8] sm:$0xff]  ;;  %v1695_v60 = vld [vmem:[#allocation2 + $0x208] sm:$0xff] }
 0x247   : > { %5229 = vmatpush3.msra.mxu0 %v6375_v15  ;;  %5149 = vmatprep.mubr.f32.mxu0 %v4064_v11  ;;  %v4071_v15 = vld [vmem:[%s7320_s1 + $0x1e8] sm:$0xff] }
 0x248   : > { %5230 = vmatprep.subr.mxu0 %v6386_v18  ;;  %5205 = vmatprep.mubr.f32.mxu1 %v4080_v50  ;;  %v1679_v11 = vld [vmem:[#allocation2 + $0x188] sm:$0xff]  ;;  %v1694_v50 = vld [vmem:[#allocation2 + $0x200] sm:$0xff] }
 0x249   : > { %5231 = vmatpush3.msra.mxu0 %v6386_v18  ;;  %5206 = vmatmul.mubr.f32.gmra.mxu1 %v4081_v48  ;;  %v4090_v18 = vld [vmem:[%s7320_s1 + $0x280] sm:$0xff] }
 0x24a   : > { %5150 = vmatmul.mubr.f32.gmra.mxu0 %v4065_v49  ;;  %5232 = vmatprep.subr.mxu0 %v6397_v20  ;;  %v1678_v48 = vld [vmem:[#allocation2 + $0x180] sm:$0xff]  ;;  %v1725_v49 = vld [vmem:[#allocation2 + $0x2f8] sm:$0xff] }
 0x24b   : > { %5233 = vmatpush3.msra.mxu0 %v6397_v20  ;;  %5152 = vmatprep.mubr.f32.mxu0 %v4066_v52  ;;  %v4092_v20 = vld [vmem:[%s7320_s1 + $0x290] sm:$0xff] }
 0x24c   : > { %5234 = vmatprep.subr.mxu0 %v6408_v22  ;;  %5208 = vmatprep.mubr.f32.mxu1 %v4082_v7  ;;  %v1724_v52 = vld [vmem:[#allocation2 + $0x2f0] sm:$0xff]  ;;  %v1723_v7 = vld [vmem:[#allocation2 + $0x2e8] sm:$0xff] }
 0x24d   : > { %5235 = vmatpush3.msra.mxu0 %v6408_v22  ;;  %5209 = vmatmul.mubr.f32.gmra.mxu1 %v4083_v9  ;;  %v1690_v22 = vld [vmem:[#allocation2 + $0x1e0] sm:$0xff] }
 0x24e   : > { %5153 = vmatmul.mubr.f32.gmra.mxu0 %v4067_v46  ;;  %5236 = vmatprep.subr.mxu0 %v6419_v24  ;;  %v1722_v9 = vld [vmem:[#allocation2 + $0x2e0] sm:$0xff]  ;;  %v1721_v46 = vld [vmem:[#allocation2 + $0x2d8] sm:$0xff] }
 0x24f   : > { %5237 = vmatpush3.msra.mxu0 %v6419_v24  ;;  %5155 = vmatprep.mubr.f32.mxu0 %v4068_v47  ;;  %v4095_v24 = vld [vmem:[%s7320_s1 + $0x2a8] sm:$0xff]  ;;  %v1720_v47 = vld [vmem:[#allocation2 + $0x2d0] sm:$0xff] }
 0x250   : > { %5238 = vmatprep.subr.mxu0 %v6427_v25  ;;  %5211 = vmatprep.mubr.f32.mxu1 %v4084_v3  ;;  %v1719_v3 = vld [vmem:[#allocation2 + $0x2c8] sm:$0xff] }
 0x251   : > { %5239 = vmatpush3.msra.mxu0 %v6427_v25  ;;  %5212 = vmatmul.mubr.f32.gmra.mxu1 %v4085_v13  ;;  %v1687_v25 = vld [vmem:[#allocation2 + $0x1c8] sm:$0xff]  ;;  %v1718_v13 = vld [vmem:[#allocation2 + $0x2c0] sm:$0xff] }
 0x252   : > { %5156 = vmatmul.mubr.f32.gmra.mxu0 %v4069_v44  ;;  %5240 = vmatprep.subr.mxu0 %v6435_v29  ;;  %v1717_v44 = vld [vmem:[#allocation2 + $0x2b8] sm:$0xff] }
 0x253   : > { %5241 = vmatpush3.msra.mxu0 %v6435_v29  ;;  %5158 = vmatprep.mubr.f32.mxu0 %v4070_v45  ;;  %v4098_v29 = vld [vmem:[%s7320_s1 + $0x2c0] sm:$0xff]  ;;  %v1716_v45 = vld [vmem:[#allocation2 + $0x2b0] sm:$0xff] }
 0x254   : > { %5242 = vmatprep.subr.mxu0 %v6442_v31  ;;  %5214 = vmatprep.mubr.f32.mxu1 %v4086_v5  ;;  %v1715_v5 = vld [vmem:[#allocation2 + $0x2a8] sm:$0xff] }
 0x255   : > { %5243 = vmatpush3.msra.mxu0 %v6442_v31  ;;  %5215 = vmatmul.mubr.f32.gmra.mxu1 %v4087_v14  ;;  %v1700_v31 = vld [vmem:[#allocation2 + $0x230] sm:$0xff]  ;;  %v1714_v14 = vld [vmem:[#allocation2 + $0x2a0] sm:$0xff] }
 0x256   : > { %5159 = vmatmul.mubr.f32.gmra.mxu0 %v4071_v15  ;;  %5244 = vmatprep.subr.mxu0 %v6448_v16  ;;  %v1713_v15 = vld [vmem:[#allocation2 + $0x298] sm:$0xff] }
 0x257   : > { %5245 = vmatpush3.msra.mxu0 %v6448_v16  ;;  %5161 = vmatprep.mubr.f32.mxu0 %v4072_v42  ;;  %v1684_v16 = vld [vmem:[#allocation2 + $0x1b0] sm:$0xff] }
 0x258   : > { %5246 = vmatprep.subr.mxu0 %v6454_v32  ;;  %5217 = vmatprep.mubr.f32.mxu1 %v4088_v43  ;;  %v1712_v42 = vld [vmem:[#allocation2 + $0x290] sm:$0xff]  ;;  %v1711_v43 = vld [vmem:[#allocation2 + $0x288] sm:$0xff] }
 0x259   : > { %5247 = vmatpush3.msra.mxu0 %v6454_v32  ;;  %5218 = vmatmul.mubr.f32.gmra.mxu1 %v4089_v63  ;;  %v1699_v32 = vld [vmem:[#allocation2 + $0x228] sm:$0xff]  ;;  %v1710_v63 = vld [vmem:[#allocation2 + $0x280] sm:$0xff] }
 0x25a   : > { %5162 = vmatmul.mubr.f32.gmra.mxu0 %v4073_v17  ;;  %5248 = vmatprep.subr.mxu0 %v6460_v33 }
 0x25b   : > { %5249 = vmatpush3.msra.mxu0 %v6460_v33  ;;  %5252 = vmatprep.mubr.f32.mxu0 %v4090_v18  ;;  %v1683_v33 = vld [vmem:[#allocation2 + $0x1a8] sm:$0xff] }
 0x25c   : > { %5250 = vmatprep.subr.mxu0 %v6466_v6  ;;  %4517 = vmatpush3.msra.mxu1 %v1693_v40 }
 0x25d   : > { %5251 = vmatpush3.msra.mxu0 %v6466_v6  ;;  %4518 = vmatprep.subr.mxu1 %v1708_v41  ;;  %v1698_v6 = vld [vmem:[#allocation2 + $0x220] sm:$0xff] }
 0x25e   : > { %5253 = vmatmul.mubr.f32.vlgmr.msra.gmra.mxu0 %v4091_v1  ;;  %4519 = vmatpush3.msra.mxu1 %v1692_v19 }
 0x25f   : > { %5255 = vmatprep.mubr.f32.mxu0 %v4092_v20  ;;  %4520 = vmatprep.subr.mxu1 %v1707_v38 }
 0x260   : > { %4521 = vmatpush3.msra.mxu1 %v1691_v39  ;;  %5276 = vmatprep.subr.mxu0 %v1725_v49 }
 0x261   : > { %4522 = vmatprep.subr.mxu1 %v1706_v59  ;;  %5277 = vmatpush3.msra.mxu0 %v1725_v49  ;;  %v2122_v49 = vld [vmem:[#allocation4 + $0x170] sm:$0xff] }
 0x262   : > { %5256 = vmatmul.mubr.f32.gmra.mxu0 %v4093_v21  ;;  %4523 = vmatpush3.msra.mxu1 %v1690_v22 }
 0x263   : > { %5258 = vmatprep.mubr.f32.mxu0 %v4094_v36  ;;  %4524 = vmatprep.subr.mxu1 %v1705_v37 }
 0x264   : > { %4525 = vmatpush3.msra.mxu1 %v1689_v61  ;;  %5278 = vmatprep.subr.mxu0 %v1724_v52 }
 0x265   : > { %4526 = vmatprep.subr.mxu1 %v1704_v23  ;;  %5279 = vmatpush3.msra.mxu0 %v1724_v52  ;;  %v2121_v52 = vld [vmem:[#allocation4 + $0x168] sm:$0xff] }
 0x266   : > { %5259 = vmatmul.mubr.f32.gmra.mxu0 %v4095_v24  ;;  %4527 = vmatpush3.msra.mxu1 %v1688_v34 }
 0x267   : > { %5261 = vmatprep.mubr.f32.mxu0 %v4096_v35  ;;  %4528 = vmatprep.subr.mxu1 %v1703_v55 }
 0x268   : > { %4529 = vmatpush3.msra.mxu1 %v1687_v25  ;;  %5280 = vmatprep.subr.mxu0 %v1723_v7 }
 0x269   : > { %4530 = vmatprep.subr.mxu1 %v1702_v26  ;;  %5281 = vmatpush3.msra.mxu0 %v1723_v7  ;;  %v2123_v7 = vld [vmem:[#allocation4 + $0x178] sm:$0xff] }
 0x26a   : > { %5262 = vmatmul.mubr.f32.gmra.mxu0 %v4097_v27  ;;  %4531 = vmatpush3.msra.mxu1 %v1686_v28 }
 0x26b   : > { %5264 = vmatprep.mubr.f32.mxu0 %v4098_v29  ;;  %4532 = vmatprep.subr.mxu1 %v1701_v57 }
 0x26c   : > { %4533 = vmatpush3.msra.mxu1 %v1685_v30  ;;  %5282 = vmatprep.subr.mxu0 %v1722_v9 }
 0x26d   : > { %4534 = vmatprep.subr.mxu1 %v1700_v31  ;;  %5283 = vmatpush3.msra.mxu0 %v1722_v9  ;;  %v2119_v9 = vld [vmem:[#allocation4 + $0x158] sm:$0xff] }
 0x26e   : > { %5265 = vmatmul.mubr.f32.gmra.mxu0 %v4099_v51  ;;  %4535 = vmatpush3.msra.mxu1 %v1684_v16 }
 0x26f   : > { %5267 = vmatprep.mubr.f32.mxu0 %v4100_v53  ;;  %4536 = vmatprep.subr.mxu1 %v1699_v32 }
 0x270   : > { %4537 = vmatpush3.msra.mxu1 %v1683_v33  ;;  %5284 = vmatprep.subr.mxu0 %v1721_v46 }
 0x271   : > { %4538 = vmatprep.subr.mxu1 %v1698_v6  ;;  %5285 = vmatpush3.msra.mxu0 %v1721_v46  ;;  %v2118_v46 = vld [vmem:[#allocation4 + $0x150] sm:$0xff] }
 0x272   : > { %5268 = vmatmul.mubr.f32.gmra.mxu0 %v4101_v8  ;;  %4539 = vmatpush3.msra.mxu1 %v1682_v2 }
 0x273   : > { %5270 = vmatprep.mubr.f32.mxu0 %v4102_v4  ;;  %4540 = vmatprep.subr.mxu1 %v1697_v10 }
 0x274   : > { %4541 = vmatpush3.msra.mxu1 %v1681_v62  ;;  %5286 = vmatprep.subr.mxu0 %v1720_v47 }
 0x275   : > { %4542 = vmatprep.subr.mxu1 %v1696_v0  ;;  %5287 = vmatpush3.msra.mxu0 %v1720_v47  ;;  %v2120_v47 = vld [vmem:[#allocation4 + $0x160] sm:$0xff] }
 0x276   : > { %5271 = vmatmul.mubr.f32.gmra.mxu0 %v4103_v58  ;;  %4543 = vmatpush3.msra.mxu1 %v1680_v54 }
 0x277   : > { %5273 = vmatprep.mubr.f32.mxu0 %v4104_v56  ;;  %4544 = vmatprep.subr.mxu1 %v1695_v60 }
 0x278   : > { %4545 = vmatpush3.msra.mxu1 %v1679_v11  ;;  %5288 = vmatprep.subr.mxu0 %v1719_v3 }
 0x279   : > { %4546 = vmatprep.subr.mxu1 %v1694_v50  ;;  %5289 = vmatpush3.msra.mxu0 %v1719_v3  ;;  %v2116_v3 = vld [vmem:[#allocation4 + $0x140] sm:$0xff] }
 0x27a   : > { %5274 = vmatmul.mubr.f32.gmra.mxu0 %v4105_v12  ;;  %4547 = vmatpush3.msra.mxu1 %v1678_v48 }
 0x27b   : > { %5290 = vmatprep.subr.mxu0 %v1718_v13  ;;  %5332 = vmatprep.subr.mxu1 %v2123_v7 }
 0x27c   : > { %5291 = vmatpush3.msra.mxu0 %v1718_v13  ;;  %v2115_v13 = vld [vmem:[#allocation4 + $0x138] sm:$0xff] }
 0x27d   : > { %5292 = vmatprep.subr.mxu0 %v1717_v44 }
 0x27e   : > { %5293 = vmatpush3.msra.mxu0 %v1717_v44  ;;  %v2117_v44 = vld [vmem:[#allocation4 + $0x148] sm:$0xff] }
 0x27f   : > { %5294 = vmatprep.subr.mxu0 %v1716_v45 }
 0x280   : > { %5295 = vmatpush3.msra.mxu0 %v1716_v45  ;;  %v2113_v45 = vld [vmem:[#allocation4 + $0x128] sm:$0xff] }
 0x281   : > { %5296 = vmatprep.subr.mxu0 %v1715_v5 }
 0x282   : > { %5297 = vmatpush3.msra.mxu0 %v1715_v5  ;;  %v2112_v5 = vld [vmem:[#allocation4 + $0x120] sm:$0xff] }
 0x283   : > { %5298 = vmatprep.subr.mxu0 %v1714_v14 }
 0x284   : > { %5299 = vmatpush3.msra.mxu0 %v1714_v14  ;;  %v2114_v14 = vld [vmem:[#allocation4 + $0x130] sm:$0xff] }
 0x285   : > { %5300 = vmatprep.subr.mxu0 %v1713_v15 }
 0x286   : > { %5301 = vmatpush3.msra.mxu0 %v1713_v15  ;;  %v2110_v15 = vld [vmem:[#allocation4 + $0x110] sm:$0xff] }
 0x287   : > { %5302 = vmatprep.subr.mxu0 %v1712_v42 }
 0x288   : > { %5303 = vmatpush3.msra.mxu0 %v1712_v42  ;;  %v2109_v42 = vld [vmem:[#allocation4 + $0x108] sm:$0xff] }
 0x289   : > { %5304 = vmatprep.subr.mxu0 %v1711_v43 }
 0x28a   : > { %5305 = vmatpush3.msra.mxu0 %v1711_v43  ;;  %v2111_v43 = vld [vmem:[#allocation4 + $0x118] sm:$0xff] }
 0x28b   : > { %5306 = vmatprep.subr.mxu0 %v1710_v63 }
 0x28c   : > { %5307 = vmatpush3.msra.mxu0 %v1710_v63  ;;  %v2107_v63 = vld [vmem:[#allocation4 + $0xf8] sm:$0xff] }
 0x28d   : > { %2124 = vmatprep.subr.mxu0 %v2122_v49 }
 0x2fd   : > { %v5142_v17 = vpop.f32.mrf.mxu0  ;;  %v5198_v18 = vpop.f32.mrf.mxu1 }
 0x2ff   : > { %v1274_v40 = vpop.f32.mrf.mxu0  ;;  %v1436_v41 = vpop.f32.mrf.mxu1 }
 0x300   : > { %1796 = vmatprep.mubr.f32.mxu1 %v1436_v41  ;;  %v2103_v41 = vld [vmem:[#allocation4 + $0xd8] sm:$0xff] }
 0x301   : > { %1797 = vmatmul.mubr.f32.vlgmr.msra.gmra.mxu1 %v1274_v40  ;;  %v5201_v1 = vpop.f32.mrf.mxu1  ;;  %v2104_v40 = vld [vmem:[#allocation4 + $0xe0] sm:$0xff] }
 0x302   : > { %v5145_v19 = vpop.f32.mrf.mxu0  ;;  %1801 = vmatprep.mubr.f32.mxu1 %v5198_v18  ;;  %5333 = vmatpush3.msra.mxu1 %v2123_v7  ;;  %v2108_v18 = vld [vmem:[#allocation4 + $0x100] sm:$0xff] }
 0x303   : > { %v1446_v20 = vpop.f32.mrf.mxu1  ;;  %5334 = vmatprep.subr.mxu1 %v2120_v47 }
 0x304   : > { %v1284_v38 = vpop.f32.mrf.mxu0  ;;  %5335 = vmatpush3.msra.mxu1 %v2120_v47 }
 0x305   : > { %1802 = vmatmul.mubr.f32.gmra.mxu1 %v5142_v17  ;;  %v5204_v59 = vpop.f32.mrf.mxu1  ;;  %5336 = vmatprep.subr.mxu1 %v2117_v44  ;;  %v2106_v17 = vld [vmem:[#allocation4 + $0xf0] sm:$0xff] }
 0x306   : > { %v5148_v39 = vpop.f32.mrf.mxu0  ;;  %1806 = vmatprep.mubr.f32.mxu1 %v1446_v20  ;;  %5337 = vmatpush3.msra.mxu1 %v2117_v44  ;;  %v2100_v20 = vld [vmem:[#allocation4 + $0xc0] sm:$0xff] }
 0x307   : > { %v1456_v36 = vpop.f32.mrf.mxu1  ;;  %5338 = vmatprep.subr.mxu1 %v2114_v14 }
 0x308   : > { %v1294_v21 = vpop.f32.mrf.mxu0  ;;  %5339 = vmatpush3.msra.mxu1 %v2114_v14 }
 0x309   : > { %1807 = vmatmul.mubr.f32.gmra.mxu1 %v1284_v38  ;;  %v5207_v23 = vpop.f32.mrf.mxu1  ;;  %5340 = vmatprep.subr.mxu1 %v2111_v43  ;;  %v2102_v38 = vld [vmem:[#allocation4 + $0xd0] sm:$0xff] }
 0x30a   : > { %v5151_v22 = vpop.f32.mrf.mxu0  ;;  %1811 = vmatprep.mubr.f32.mxu1 %v5201_v1  ;;  %5341 = vmatpush3.msra.mxu1 %v2111_v43  ;;  %v2105_v1 = vld [vmem:[#allocation4 + $0xe8] sm:$0xff] }
 0x30b   : > { %v1466_v35 = vpop.f32.mrf.mxu1  ;;  %5342 = vmatprep.subr.mxu1 %v2108_v18 }
 0x30c   : > { %v1304_v37 = vpop.f32.mrf.mxu0  ;;  %5343 = vmatpush3.msra.mxu1 %v2108_v18 }
 0x30d   : > { %1812 = vmatmul.mubr.f32.gmra.mxu1 %v5145_v19  ;;  %v5210_v26 = vpop.f32.mrf.mxu1  ;;  %5344 = vmatprep.subr.mxu1 %v2105_v1  ;;  %v2101_v19 = vld [vmem:[#allocation4 + $0xc8] sm:$0xff] }
 0x30e   : > { %v5154_v61 = vpop.f32.mrf.mxu0  ;;  %1816 = vmatprep.mubr.f32.mxu1 %v1456_v36  ;;  %5345 = vmatpush3.msra.mxu1 %v2105_v1  ;;  %v2094_v36 = vld [vmem:[#allocation4 + $0x90] sm:$0xff] }
 0x30f   : > { %v1476_v29 = vpop.f32.mrf.mxu1  ;;  %5346 = vmatprep.subr.mxu1 %v2102_v38 }
 0x310   : > { %v1314_v24 = vpop.f32.mrf.mxu0  ;;  %5347 = vmatpush3.msra.mxu1 %v2102_v38 }
 0x311   : > { %1817 = vmatmul.mubr.f32.gmra.mxu1 %v1294_v21  ;;  %v5213_v31 = vpop.f32.mrf.mxu1  ;;  %v2099_v21 = vld [vmem:[#allocation4 + $0xb8] sm:$0xff] }
 0x312   : > { %v5157_v34 = vpop.f32.mrf.mxu0  ;;  %1821 = vmatprep.mubr.f32.mxu1 %v5204_v59  ;;  %v2097_v59 = vld [vmem:[#allocation4 + $0xa8] sm:$0xff]  ;;  %5348 = vmatprep.subr.mxu1 %v2099_v21 }
 0x313   : > { %v1486_v53 = vpop.f32.mrf.mxu1  ;;  %5349 = vmatpush3.msra.mxu1 %v2099_v21 }
 0x314   : > { %v1324_v55 = vpop.f32.mrf.mxu0 }
 0x315   : > { %1822 = vmatmul.mubr.f32.gmra.mxu1 %v5148_v39  ;;  %v5216_v6 = vpop.f32.mrf.mxu1  ;;  %v2098_v39 = vld [vmem:[#allocation4 + $0xb0] sm:$0xff] }
 0x316   : > { %v5160_v25 = vpop.f32.mrf.mxu0  ;;  %1826 = vmatprep.mubr.f32.mxu1 %v1466_v35  ;;  %v2088_v35 = vld [vmem:[#allocation4 + $0x60] sm:$0xff] }
 0x317   : > { %v1496_v4 = vpop.f32.mrf.mxu1 }
 0x318   : > { %v1334_v27 = vpop.f32.mrf.mxu0 }
 0x319   : > { %1827 = vmatmul.mubr.f32.gmra.mxu1 %v1304_v37  ;;  %v5219_v0 = vpop.f32.mrf.mxu1  ;;  %v2096_v37 = vld [vmem:[#allocation4 + $0xa0] sm:$0xff] }
 0x31a   : > { %v5163_v28 = vpop.f32.mrf.mxu0  ;;  %1831 = vmatprep.mubr.f32.mxu1 %v5207_v23  ;;  %5350 = vmatprep.subr.mxu1 %v2096_v37  ;;  %v2091_v23 = vld [vmem:[#allocation4 + $0x78] sm:$0xff] }
 0x31b   : > { %v1506_v56 = vpop.f32.mrf.mxu1  ;;  %5351 = vmatpush3.msra.mxu1 %v2096_v37 }
 0x31c   : > { %v1344_v57 = vpop.f32.mrf.mxu0 }
 0x31d   : > { %1832 = vmatmul.mubr.f32.gmra.mxu1 %v5151_v22  ;;  %v2095_v22 = vld [vmem:[#allocation4 + $0x98] sm:$0xff] }
 0x31e   : > { %v5254_v30 = vpop.f32.mrf.mxu0  ;;  %1836 = vmatprep.mubr.f32.mxu1 %v1476_v29  ;;  %v2082_v29 = vld [vmem:[#allocation4 + $0x30] sm:$0xff] }
 0x320   : > { %v1598_v51 = vpop.f32.mrf.mxu0 }
 0x321   : > { %5308 = vmatprep.mubr.f32.mxu0 %v1598_v51  ;;  %1837 = vmatmul.mubr.f32.gmra.mxu1 %v1314_v24  ;;  %v2093_v24 = vld [vmem:[#allocation4 + $0x88] sm:$0xff] }
 0x322   : > { %v5257_v16 = vpop.f32.mrf.mxu0  ;;  %5309 = vmatmul.mubr.f32.vlgmr.msra.gmra.mxu0 %v5254_v30  ;;  %1841 = vmatprep.mubr.f32.mxu1 %v5210_v26  ;;  %v2085_v26 = vld [vmem:[#allocation4 + $0x48] sm:$0xff]  ;;  %v2080_v30 = vld [vmem:[#allocation4 + $0x20] sm:$0xff] }
 0x323   : > { %2125 = vmatpush1.msra.mxu0 %v2121_v52  ;;  %5352 = vmatprep.subr.mxu1 %v2093_v24  ;;  %v2081_v51 = vld [vmem:[#allocation4 + $0x28] sm:$0xff] }
 0x324   : > { %v1608_v32 = vpop.f32.mrf.mxu0  ;;  %2126 = vmatprep.subr.mxu0 %v2119_v9  ;;  %5353 = vmatpush3.msra.mxu1 %v2093_v24  ;;  %v6648_v9 = vld [vmem:[%s7323_s4 + $0x1] ss:$0 sm:$0xff] }
 0x325   : > { %5311 = vmatprep.mubr.f32.mxu0 %v1608_v32  ;;  %1842 = vmatmul.mubr.f32.gmra.mxu1 %v5154_v61  ;;  %v2092_v61 = vld [vmem:[#allocation4 + $0x80] sm:$0xff]  ;;  %v2078_v32 = vld [vmem:[#allocation4 + $0x10] sm:$0xff] }
 0x326   : > { %v5260_v33 = vpop.f32.mrf.mxu0  ;;  %5312 = vmatmul.mubr.f32.gmra.mxu0 %v5257_v16  ;;  %1846 = vmatprep.mubr.f32.mxu1 %v1486_v53  ;;  %v2077_v16 = vld [vmem:[#allocation4 + $0x8] sm:$0xff]  ;;  %v2076_v53 = vld [vmem:[#allocation4] sm:$0xff] }
 0x327   : > { %2127 = vmatpush1.msra.mxu0 %v2118_v46 }
 0x328   : > { %v1618_v8 = vpop.f32.mrf.mxu0  ;;  %2128 = vmatprep.subr.mxu0 %v2116_v3 }
 0x329   : > { %5314 = vmatprep.mubr.f32.mxu0 %v1618_v8  ;;  %1847 = vmatmul.mubr.f32.gmra.mxu1 %v1324_v55  ;;  %v2090_v55 = vld [vmem:[#allocation4 + $0x70] sm:$0xff] }
 0x32a   : > { %v5263_v2 = vpop.f32.mrf.mxu0  ;;  %5315 = vmatmul.mubr.f32.gmra.mxu0 %v5260_v33  ;;  %1851 = vmatprep.mubr.f32.mxu1 %v5213_v31  ;;  %v2079_v31 = vld [vmem:[#allocation4 + $0x18] sm:$0xff]  ;;  %v5888_v33 = vmov 0.0  }
 0x32b   : > { %2129 = vmatpush1.msra.mxu0 %v2115_v13  ;;  %5354 = vmatprep.subr.mxu1 %v2090_v55 }
 0x32c   : > { %v1628_v10 = vpop.f32.mrf.mxu0  ;;  %2130 = vmatprep.subr.mxu0 %v2113_v45  ;;  %5355 = vmatpush3.msra.mxu1 %v2090_v55 }
 0x32d   : > { %5317 = vmatprep.mubr.f32.mxu0 %v1628_v10  ;;  %1852 = vmatmul.mubr.f32.gmra.mxu1 %v5157_v34  ;;  %v2089_v34 = vld [vmem:[#allocation4 + $0x68] sm:$0xff] }
 0x32e   : > { %v5266_v62 = vpop.f32.mrf.mxu0  ;;  %5318 = vmatmul.mubr.f32.gmra.mxu0 %v5263_v2  ;;  %1856 = vmatprep.mubr.f32.mxu1 %v1496_v4 }
 0x32f   : > { %2131 = vmatpush1.msra.mxu0 %v2112_v5 }
 0x330   : > { %v1638_v58 = vpop.f32.mrf.mxu0  ;;  %2132 = vmatprep.subr.mxu0 %v2110_v15 }
 0x331   : > { %5320 = vmatprep.mubr.f32.mxu0 %v1638_v58  ;;  %1857 = vmatmul.mubr.f32.gmra.mxu1 %v1334_v27  ;;  %v2087_v27 = vld [vmem:[#allocation4 + $0x58] sm:$0xff] }
 0x332   : > { %v5269_v54 = vpop.f32.mrf.mxu0  ;;  %5321 = vmatmul.mubr.f32.gmra.mxu0 %v5266_v62  ;;  %1861 = vmatprep.mubr.f32.mxu1 %v5216_v6 }
 0x333   : > { %2133 = vmatpush1.msra.mxu0 %v2109_v42  ;;  %5356 = vmatprep.subr.mxu1 %v2087_v27 }
 0x334   : > { %v1648_v12 = vpop.f32.mrf.mxu0  ;;  %2134 = vmatprep.subr.mxu0 %v2107_v63  ;;  %5357 = vmatpush3.msra.mxu1 %v2087_v27 }
 0x335   : > { %5323 = vmatprep.mubr.f32.mxu0 %v1648_v12  ;;  %1862 = vmatmul.mubr.f32.gmra.mxu1 %v5160_v25  ;;  %v2086_v25 = vld [vmem:[#allocation4 + $0x50] sm:$0xff] }
 0x336   : > { %v5272_v60 = vpop.f32.mrf.mxu0  ;;  %5324 = vmatmul.mubr.f32.gmra.mxu0 %v5269_v54  ;;  %1866 = vmatprep.mubr.f32.mxu1 %v1506_v56 }
 0x337   : > { %2135 = vmatpush1.msra.mxu0 %v2106_v17 }
 0x338   : > { %v1658_v11 = vpop.f32.mrf.mxu0  ;;  %2136 = vmatprep.subr.mxu0 %v2104_v40 }
 0x339   : > { %5326 = vmatprep.mubr.f32.mxu0 %v1658_v11  ;;  %1867 = vmatmul.mubr.f32.gmra.mxu1 %v1344_v57  ;;  %v2084_v57 = vld [vmem:[#allocation4 + $0x40] sm:$0xff] }
 0x33a   : > { %v5275_v50 = vpop.f32.mrf.mxu0  ;;  %5327 = vmatmul.mubr.f32.gmra.mxu0 %v5272_v60  ;;  %1871 = vmatprep.mubr.f32.mxu1 %v5219_v0 }
 0x33b   : > { %2137 = vmatpush1.msra.mxu0 %v2103_v41  ;;  %5358 = vmatprep.subr.mxu1 %v2084_v57 }
 0x33c   : > { %v1668_v48 = vpop.f32.mrf.mxu0  ;;  %2138 = vmatprep.subr.mxu0 %v2101_v19  ;;  %5359 = vmatpush3.msra.mxu1 %v2084_v57 }
 0x33d   : > { %5329 = vmatprep.mubr.f32.mxu0 %v1668_v48  ;;  %1872 = vmatmul.mubr.f32.gmra.mxu1 %v5163_v28  ;;  %v2083_v28 = vld [vmem:[#allocation4 + $0x38] sm:$0xff] }
 0x33e   : > { %5330 = vmatmul.mubr.f32.gmra.mxu0 %v5275_v50  ;;  %5360 = vmatprep.subr.mxu1 %v2081_v51 }
 0x33f   : > { %2139 = vmatpush1.msra.mxu0 %v2100_v20  ;;  %5361 = vmatpush3.msra.mxu1 %v2081_v51 }
 0x340   : > { %2140 = vmatprep.subr.mxu0 %v2098_v39  ;;  %2188 = vmatprep.mubr.f32.mxu0 %v5888_v33 }
 0x341   : > { %2141 = vmatpush1.msra.mxu0 %v2097_v59  ;;  %5362 = vmatprep.subr.mxu1 %v2078_v32 }
 0x342   : > { %2142 = vmatprep.subr.mxu0 %v2095_v22  ;;  %5363 = vmatpush3.msra.mxu1 %v2078_v32 }
 0x343   : > { %2143 = vmatpush1.msra.mxu0 %v2094_v36 }
 0x344   : > { %2144 = vmatprep.subr.mxu0 %v2092_v61 }
 0x345   : > { %2145 = vmatpush1.msra.mxu0 %v2091_v23 }
 0x346   : > { %2146 = vmatprep.subr.mxu0 %v2089_v34 }
 0x347   : > { %2147 = vmatpush1.msra.mxu0 %v2088_v35 }
 0x348   : > { %2148 = vmatprep.subr.mxu0 %v2086_v25 }
 0x349   : > { %2149 = vmatpush1.msra.mxu0 %v2085_v26 }
 0x34a   : > { %2150 = vmatprep.subr.mxu0 %v2083_v28 }
 0x34b   : > { %2151 = vmatpush1.msra.mxu0 %v2082_v29 }
 0x34c   : > { %2152 = vmatprep.subr.mxu0 %v2080_v30 }
 0x34d   : > { %2153 = vmatpush1.msra.mxu0 %v2079_v31 }
 0x34e   : > { %2154 = vmatprep.subr.mxu0 %v2077_v16 }
 0x34f   : > { %2155 = vmatpush1.msra.mxu0 %v2076_v53 }
 0x3c1   : > { %v4548_v6 = vpop.f32.mrf.mxu1 }
 0x3c3   : > { %v4549_v8 = vpop.f32.mrf.mxu1 }
 0x3c4   : > { %v4550_v52 = vadd.f32 %v4549_v8, %v4548_v6 }
 0x3c5   : > { %v4551_v2 = vpop.f32.mrf.mxu1 }
 0x3c6   : > { %v1799_v14 = vadd.f32 %v4550_v52, %v6648_v9 }
 0x3c7   : > { %v4552_v4 = vpop.f32.mrf.mxu1 }
 0x3c8   : > { %v4553_v48 = vadd.f32 %v4552_v4, %v4551_v2 }
 0x3c9   : > { %v4554_v10 = vpop.f32.mrf.mxu1 }
 0x3ca   : > { %v1804_v3 = vadd.f32 %v4553_v48, %v6648_v9 }
 0x3cb   : > { %v4555_v62 = vpop.f32.mrf.mxu1 }
 0x3cc   : > { %v4556_v13 = vadd.f32 %v4555_v62, %v4554_v10 }
 0x3cd   : > { %v4557_v0 = vpop.f32.mrf.mxu1 }
 0x3ce   : > { %v1809_v1 = vadd.f32 %v4556_v13, %v6648_v9 }
 0x3cf   : > { %v4558_v58 = vpop.f32.mrf.mxu1 }
 0x3d0   : > { %v4559_v46 = vadd.f32 %v4558_v58, %v4557_v0 }
 0x3d1   : > { %v4560_v54 = vpop.f32.mrf.mxu1 }
 0x3d2   : > { %v1814_v18 = vadd.f32 %v4559_v46, %v6648_v9 }
 0x3d3   : > { %v4561_v56 = vpop.f32.mrf.mxu1 }
 0x3d4   : > { %v4562_v40 = vadd.f32 %v4561_v56, %v4560_v54 }
 0x3d5   : > { %v4563_v12 = vpop.f32.mrf.mxu1 }
 0x3d6   : > { %v1819_v35 = vadd.f32 %v4562_v40, %v6648_v9 }
 0x3d7   : > { %v4564_v60 = vpop.f32.mrf.mxu1 }
 0x3d8   : > { %v4565_v15 = vadd.f32 %v4564_v60, %v4563_v12 }
 0x3d9   : > { %v4566_v11 = vpop.f32.mrf.mxu1 }
 0x3da   : > { %v1824_v22 = vadd.f32 %v4565_v15, %v6648_v9 }
 0x3db   : > { %v4567_v50 = vpop.f32.mrf.mxu1 }
 0x3dc   : > { %v4568_v24 = vadd.f32 %v4567_v50, %v4566_v11 }
 0x3dd   : > { %v4569_v49 = vpop.f32.mrf.mxu1 }
 0x3de   : > { %v1829_v6 = vadd.f32 %v4568_v24, %v6648_v9 }
 0x3df   : > { %v4570_v7 = vpop.f32.mrf.mxu1 }
 0x3e0   : > { %v4571_v59 = vadd.f32 %v4570_v7, %v4569_v49 }
 0x3e1   : > { %v4572_v47 = vpop.f32.mrf.mxu1 }
 0x3e2   : > { %v5310_v44 = vpop.f32.mrf.mxu0  ;;  %v1834_v31 = vadd.f32 %v4571_v59, %v6648_v9 }
 0x3e3   : > { %v1949_v45 = vadd.f32 %v5310_v44, %v1804_v3  ;;  %v4573_v5 = vpop.f32.mrf.mxu1 }
 0x3e4   : > { %v1943_v42 = vpop.f32.mrf.mxu0  ;;  %v4574_v16 = vadd.f32 %v4573_v5, %v4572_v47 }
 0x3e5   : > { %vm2023_vm0 = vcmp.ge.f32.partialorder %v1949_v45, 0.0  ;;  %v2039_v43 = vmul.f32 0.2, %v1949_v45  ;;  %v1944_v63 = vadd.f32 %v1943_v42, %v1799_v14  ;;  %v4575_v17 = vpop.f32.mrf.mxu1 }
 0x3e6   : > { %v5313_v41 = vpop.f32.mrf.mxu0  ;;  %v1839_v48 = vadd.f32 %v4574_v16, %v6648_v9 }
 0x3e7   : > { %v2055_v19 = vsel %vm2023_vm0, %v1949_v45, %v2039_v43  ;;  %vm2022_vm1 = vcmp.ge.f32.partialorder %v1944_v63, 0.0  ;;  %v2038_v20 = vmul.f32 0.2, %v1944_v63  ;;  %v1959_v38 = vadd.f32 %v5313_v41, %v1814_v18  ;;  %v4576_v39 = vpop.f32.mrf.mxu1 }
 0x3e8   : > { %2071 = vst [vmem:[%s6656_s7 + $0x8] sm:$0xff] %v2055_v19  ;;  %v1953_v21 = vpop.f32.mrf.mxu0  ;;  %v4577_v29 = vadd.f32 %v4576_v39, %v4575_v17 }
 0x3e9   : > { %v2054_v36 = vsel %vm2022_vm1, %v1944_v63, %v2038_v20  ;;  %v2041_v37 = vmul.f32 0.2, %v1959_v38  ;;  %v1954_v61 = vadd.f32 %v1953_v21, %v1809_v1  ;;  %v4578_v23 = vpop.f32.mrf.mxu1  ;;  %vm2025_vm2 = vcmp.ge.f32.partialorder %v1959_v38, 0.0 }
 0x3ea   : > { %2070 = vst [vmem:[%s6656_s7] sm:$0xff] %v2054_v36  ;;  %v5316_v34 = vpop.f32.mrf.mxu0  ;;  %2189 = vmatmul.mubr.f32.vlgmr.msra.gmra.mxu0 %v2054_v36  ;;  %5364 = vmatprep.mubr.f32.mxu1 %v2054_v36  ;;  %v1844_v54 = vadd.f32 %v4577_v29, %v6648_v9 }
 0x3eb   : > { %v2040_v55 = vmul.f32 0.2, %v1954_v61  ;;  %v1969_v25 = vadd.f32 %v5316_v34, %v1824_v22  ;;  %5365 = vmatmul.mubr.f32.vlgmr.msra.gmra.mxu1 %v2055_v19  ;;  %v4579_v26 = vpop.f32.mrf.mxu1  ;;  %2194 = vmatprep.mubr.f32.mxu0 %v5888_v33  ;;  %vm2024_vm3 = vcmp.ge.f32.partialorder %v1954_v61, 0.0  ;;  %v2057_v27 = vsel %vm2025_vm2, %v1959_v38, %v2041_v37 }
 0x3ec   : > { %v1963_v28 = vpop.f32.mrf.mxu0  ;;  %2073 = vst [vmem:[%s6656_s7 + $0x18] sm:$0xff] %v2057_v27  ;;  %v4580_v12 = vadd.f32 %v4579_v26, %v4578_v23 }
 0x3ed   : > { %v1964_v57 = vadd.f32 %v1963_v28, %v1819_v35  ;;  %v4581_v30 = vpop.f32.mrf.mxu1  ;;  %v2056_v51 = vsel %vm2024_vm3, %v1954_v61, %v2040_v55  ;;  %v2043_v53 = vmul.f32 0.2, %v1969_v25  ;;  %vm2027_vm5 = vcmp.ge.f32.partialorder %v1969_v25, 0.0 }
 0x3ee   : > { %v5319_v32 = vpop.f32.mrf.mxu0  ;;  %2195 = vmatmul.mubr.f32.gmra.mxu0 %v2055_v19  ;;  %2072 = vst [vmem:[%s6656_s7 + $0x10] sm:$0xff] %v2056_v51  ;;  %5367 = vmatprep.mubr.f32.mxu1 %v2056_v51  ;;  %v1849_v42 = vadd.f32 %v4580_v12, %v6648_v9 }
 0x3ef   : > { %v2042_v8 = vmul.f32 0.2, %v1964_v57  ;;  %v1979_v2 = vadd.f32 %v5319_v32, %v1834_v31  ;;  %5368 = vmatmul.mubr.f32.gmra.mxu1 %v2057_v27  ;;  %v4582_v4 = vpop.f32.mrf.mxu1  ;;  %2200 = vmatprep.mubr.f32.mxu0 %v5888_v33  ;;  %vm2026_vm4 = vcmp.ge.f32.partialorder %v1964_v57, 0.0  ;;  %v2059_v50 = vsel %vm2027_vm5, %v1969_v25, %v2043_v53 }
 0x3f0   : > { %v1973_v10 = vpop.f32.mrf.mxu0  ;;  %v4583_v62 = vadd.f32 %v4582_v4, %v4581_v30 }
 0x3f1   : > { %v1974_v0 = vadd.f32 %v1973_v10, %v1829_v6  ;;  %v4584_v58 = vpop.f32.mrf.mxu1  ;;  %v2058_v56 = vsel %vm2026_vm4, %v1964_v57, %v2042_v8  ;;  %v2045_v60 = vmul.f32 0.2, %v1979_v2  ;;  %vm2029_vm7 = vcmp.ge.f32.partialorder %v1979_v2, 0.0  ;;  %v4108_v10 = vld [vmem:[%s7320_s1 + $0x300] sm:$0xff] }
 0x3f2   : > { %v5322_v11 = vpop.f32.mrf.mxu0  ;;  %2201 = vmatmul.mubr.f32.gmra.mxu0 %v2056_v51  ;;  %5370 = vmatprep.mubr.f32.mxu1 %v2058_v56  ;;  %v1854_v13 = vadd.f32 %v4583_v62, %v6648_v9 }
 0x3f3   : > { %v2044_v49 = vmul.f32 0.2, %v1974_v0  ;;  %v1989_v52 = vadd.f32 %v5322_v11, %v1844_v54  ;;  %5371 = vmatmul.mubr.f32.gmra.mxu1 %v2059_v50  ;;  %v4585_v7 = vpop.f32.mrf.mxu1  ;;  %2206 = vmatprep.mubr.f32.mxu0 %v5888_v33  ;;  %vm2028_vm6 = vcmp.ge.f32.partialorder %v1974_v0, 0.0  ;;  %v2061_v15 = vsel %vm2029_vm7, %v1979_v2, %v2045_v60 }
 0x3f4   : > { %v1983_v46 = vpop.f32.mrf.mxu0  ;;  %v4586_v5 = vadd.f32 %v4585_v7, %v4584_v58 }
 0x3f5   : > { %v1984_v47 = vadd.f32 %v1983_v46, %v1839_v48  ;;  %v4587_v3 = vpop.f32.mrf.mxu1  ;;  %v2060_v44 = vsel %vm2028_vm6, %v1974_v0, %v2044_v49  ;;  %v2047_v45 = vmul.f32 0.2, %v1989_v52  ;;  %vm2031_vm9 = vcmp.ge.f32.partialorder %v1989_v52, 0.0 }
 0x3f6   : > { %v5325_v14 = vpop.f32.mrf.mxu0  ;;  %2207 = vmatmul.mubr.f32.gmra.mxu0 %v2057_v27  ;;  %5373 = vmatprep.mubr.f32.mxu1 %v2060_v44  ;;  %v1859_v36 = vadd.f32 %v4586_v5, %v6648_v9 }
 0x3f7   : > { %v2046_v43 = vmul.f32 0.2, %v1984_v47  ;;  %v1999_v63 = vadd.f32 %v5325_v14, %v1854_v13  ;;  %5374 = vmatmul.mubr.f32.gmra.mxu1 %v2061_v15  ;;  %v4588_v17 = vpop.f32.mrf.mxu1  ;;  %2212 = vmatprep.mubr.f32.mxu0 %v5888_v33  ;;  %vm2030_vm8 = vcmp.ge.f32.partialorder %v1984_v47, 0.0  ;;  %v2063_v59 = vsel %vm2031_vm9, %v1989_v52, %v2047_v45 }
 0x3f8   : > { %v4589_v18 = vadd.f32 %v4588_v17, %v4587_v3  ;;  %v1993_v40 = vpop.f32.mrf.mxu0 }
 0x3f9   : > { %v1994_v41 = vadd.f32 %v1993_v40, %v1849_v42  ;;  %v4590_v1 = vpop.f32.mrf.mxu1  ;;  %v2062_v19 = vsel %vm2030_vm8, %v1984_v47, %v2046_v43  ;;  %v2049_v20 = vmul.f32 0.2, %v1999_v63  ;;  %vm2033_vm11 = vcmp.ge.f32.partialorder %v1999_v63, 0.0 }
 0x3fa   : > { %v1864_v38 = vadd.f32 %v4589_v18, %v6648_v9  ;;  %v5328_v39 = vpop.f32.mrf.mxu0  ;;  %2213 = vmatmul.mubr.f32.gmra.mxu0 %v2058_v56  ;;  %5376 = vmatprep.mubr.f32.mxu1 %v2062_v19 }
 0x3fb   : > { %v2048_v21 = vmul.f32 0.2, %v1994_v41  ;;  %5377 = vmatmul.mubr.f32.gmra.mxu1 %v2063_v59  ;;  %v4591_v22 = vpop.f32.mrf.mxu1  ;;  %2218 = vmatprep.mubr.f32.mxu0 %v5888_v33  ;;  %vm2032_vm10 = vcmp.ge.f32.partialorder %v1994_v41, 0.0  ;;  %v2065_v26 = vsel %vm2033_vm11, %v1999_v63, %v2049_v20 }
 0x3fc   : > { %v2009_v37 = vadd.f32 %v5328_v39, %v1864_v38  ;;  %v4592_v61 = vadd.f32 %v4591_v22, %v4590_v1  ;;  %v2003_v23 = vpop.f32.mrf.mxu0 }
 0x3fd   : > { %v2004_v24 = vadd.f32 %v2003_v23, %v1859_v36  ;;  %v4593_v34 = vpop.f32.mrf.mxu1  ;;  %v2064_v35 = vsel %vm2032_vm10, %v1994_v41, %v2048_v21 }
 0x3fe   : > { %v2051_v55 = vmul.f32 0.2, %v2009_v37  ;;  %v5331_v25 = vpop.f32.mrf.mxu0  ;;  %2219 = vmatmul.mubr.f32.gmra.mxu0 %v2059_v50  ;;  %5379 = vmatprep.mubr.f32.mxu1 %v2064_v35  ;;  %v1869_v27 = vadd.f32 %v4592_v61, %v6648_v9  ;;  %vm2035_vm12 = vcmp.ge.f32.partialorder %v2009_v37, 0.0 }
 0x3ff   : > { %v2050_v28 = vmul.f32 0.2, %v2004_v24  ;;  %5380 = vmatmul.mubr.f32.gmra.mxu1 %v2065_v26  ;;  %v4594_v29 = vpop.f32.mrf.mxu1  ;;  %2224 = vmatprep.mubr.f32.mxu0 %v5888_v33  ;;  %vm2034_vm13 = vcmp.ge.f32.partialorder %v2004_v24, 0.0 }
 0x400   : > { %v4595_v57 = vadd.f32 %v4594_v29, %v4593_v34  ;;  %v2013_v30 = vpop.f32.mrf.mxu0  ;;  %v2067_v31 = vsel %vm2035_vm12, %v2009_v37, %v2051_v55  ;;  %v4125_v29 = vld [vmem:[%s7320_s1 + $0x388] sm:$0xff] }
 0x401   : > { %v2014_v51 = vadd.f32 %v2013_v30, %v1869_v27  ;;  %v2066_v16 = vsel %vm2034_vm13, %v2004_v24, %v2050_v28  ;;  %v4110_v27 = vld [vmem:[%s7320_s1 + $0x310] sm:$0xff]  ;;  %v4111_v30 = vld [vmem:[%s7320_s1 + $0x318] sm:$0xff] }
 0x402   : > { %v1874_v53 = vadd.f32 %v4595_v57, %v6648_v9  ;;  %2225 = vmatmul.mubr.f32.gmra.mxu0 %v2060_v44  ;;  %5382 = vmatprep.mubr.f32.mxu1 %v2066_v16  ;;  %v4124_v9 = vld [vmem:[%s7320_s1 + $0x380] sm:$0xff]  ;;  %v4126_v57 = vld [vmem:[%s7320_s1 + $0x390] sm:$0xff] }
 0x403   : > { %v2052_v32 = vmul.f32 0.2, %v2014_v51  ;;  %5383 = vmatmul.mubr.f32.gmra.mxu1 %v2067_v31  ;;  %2230 = vmatprep.mubr.f32.mxu0 %v5888_v33  ;;  %vm2036_vm14 = vcmp.ge.f32.partialorder %v2014_v51, 0.0 }
 0x404   : > { %v2019_v6 = vadd.f32 %v5331_v25, %v1874_v53  ;;  %v4128_v53 = vld [vmem:[%s7320_s1 + $0x3a0] sm:$0xff] }
 0x405   : > { %v2068_v8 = vsel %vm2036_vm14, %v2014_v51, %v2052_v32  ;;  %v4113_v32 = vld [vmem:[%s7320_s1 + $0x328] sm:$0xff] }
 0x406   : > { %2231 = vmatmul.mubr.f32.gmra.mxu0 %v2061_v15  ;;  %5385 = vmatprep.mubr.f32.mxu1 %v2068_v8  ;;  %vm2037_vm15 = vcmp.ge.f32.partialorder %v2019_v6, 0.0  ;;  %v2053_v2 = vmul.f32 0.2, %v2019_v6 }
 0x407   : > { %2236 = vmatprep.mubr.f32.mxu0 %v5888_v33 }
 0x408   : > { %v2069_v4 = vsel %vm2037_vm15, %v2019_v6, %v2053_v2  ;;  %v4114_v6 = vld [vmem:[%s7320_s1 + $0x330] sm:$0xff] }
 0x409   : > { %5386 = vmatmul.mubr.f32.gmra.mxu1 %v2069_v4  ;;  %v4130_v2 = vld [vmem:[%s7320_s1 + $0x3b0] sm:$0xff] }
 0x40a   : > { %2237 = vmatmul.mubr.f32.gmra.mxu0 %v2062_v19  ;;  %5420 = vmatprep.mubr.f32.mxu1 %v4124_v9  ;;  %v4116_v9 = vld [vmem:[%s7320_s1 + $0x340] sm:$0xff] }
 0x40b   : > { %2242 = vmatprep.mubr.f32.mxu0 %v5888_v33 }
 0x40e   : > { %2243 = vmatmul.mubr.f32.gmra.mxu0 %v2063_v59 }
 0x40f   : > { %2248 = vmatprep.mubr.f32.mxu0 %v5888_v33 }
 0x412   : > { %2249 = vmatmul.mubr.f32.gmra.mxu0 %v2064_v35 }
 0x413   : > { %2254 = vmatprep.mubr.f32.mxu0 %v5888_v33 }
 0x416   : > { %2255 = vmatmul.mubr.f32.gmra.mxu0 %v2065_v26  ;;  %v4109_v26 = vld [vmem:[%s7320_s1 + $0x308] sm:$0xff] }
 0x417   : > { %2260 = vmatprep.mubr.f32.mxu0 %v5888_v33 }
 0x41a   : > { %2261 = vmatmul.mubr.f32.gmra.mxu0 %v2066_v16  ;;  %v4127_v16 = vld [vmem:[%s7320_s1 + $0x398] sm:$0xff] }
 0x41b   : > { %2266 = vmatprep.mubr.f32.mxu0 %v5888_v33 }
 0x41e   : > { %2267 = vmatmul.mubr.f32.gmra.mxu0 %v2067_v31  ;;  %v4112_v31 = vld [vmem:[%s7320_s1 + $0x320] sm:$0xff] }
 0x41f   : > { %2272 = vmatprep.mubr.f32.mxu0 %v5888_v33 }
 0x422   : > { %2273 = vmatmul.mubr.f32.gmra.mxu0 %v2068_v8  ;;  %v4129_v8 = vld [vmem:[%s7320_s1 + $0x3a8] sm:$0xff] }
 0x423   : > { %2278 = vmatprep.mubr.f32.mxu0 %v5888_v33 }
 0x426   : > { %2279 = vmatmul.mubr.f32.gmra.mxu0 %v2069_v4  ;;  %v4115_v4 = vld [vmem:[%s7320_s1 + $0x338] sm:$0xff] }
 0x427   : > { %5476 = vmatprep.mubr.f32.mxu0 %v4108_v10  ;;  %v4131_v10 = vld [vmem:[%s7320_s1 + $0x3b8] sm:$0xff] }
 0x4aa   : > { %v6697_v62 = vpop.f32.mrf.mxu0 }
 0x4ab   : > { %v6727_v5 = vpop.f32.mrf.mxu1 }
 0x4ac   : > { %v6699_v0 = vpop.f32.mrf.mxu0 }
 0x4ad   : > { %v6729_v42 = vpop.f32.mrf.mxu1 }
 0x4ae   : > { %v6701_v58 = vpop.f32.mrf.mxu0 }
 0x4af   : > { %v6731_v17 = vpop.f32.mrf.mxu1 }
 0x4b0   : > { %v6703_v54 = vpop.f32.mrf.mxu0 }
 0x4b1   : > { %v6733_v41 = vpop.f32.mrf.mxu1 }
 0x4b2   : > { %v6705_v56 = vpop.f32.mrf.mxu0 }
 0x4b3   : > { %v6735_v20 = vpop.f32.mrf.mxu1 }
 0x4b4   : > { %v6707_v12 = vpop.f32.mrf.mxu0 }
 0x4b5   : > { %v6737_v59 = vpop.f32.mrf.mxu1 }
 0x4b6   : > { %v6709_v60 = vpop.f32.mrf.mxu0 }
 0x4b7   : > { %v6739_v36 = vpop.f32.mrf.mxu1 }
 0x4b8   : > { %v6711_v11 = vpop.f32.mrf.mxu0 }
 0x4b9   : > { %v6741_v61 = vpop.f32.mrf.mxu1 }
 0x4ba   : > { %v6713_v50 = vpop.f32.mrf.mxu0 }
 0x4bb   : > { %v6743_v23 = vpop.f32.mrf.mxu1 }
 0x4bc   : > { %v6715_v48 = vpop.f32.mrf.mxu0 }
 0x4bd   : > { %v6745_v24 = vpop.f32.mrf.mxu1 }
 0x4be   : > { %v6717_v49 = vpop.f32.mrf.mxu0 }
 0x4bf   : > { %v6747_v34 = vpop.f32.mrf.mxu1 }
 0x4c0   : > { %v6719_v52 = vpop.f32.mrf.mxu0 }
 0x4c1   : > { %v6755_v35 = vpop.f32.mrf.mxu1 }
 0x4c2   : > { %v6721_v7 = vpop.f32.mrf.mxu0 }
 0x4c3   : > { %v5384_v55 = vpop.f32.mrf.mxu1 }
 0x4c4   : > { %v6723_v46 = vpop.f32.mrf.mxu0 }
 0x4c5   : > { %v2411_v25 = vpop.f32.mrf.mxu1 }
 0x4c6   : > { %v2232_v47 = vpop.f32.mrf.mxu0 }
 0x4c8   : > { %v6725_v3 = vpop.f32.mrf.mxu0 }
 0x4c9   : > { %v5387_v28 = vpop.f32.mrf.mxu1 }
 0x4ca   : > { %v2238_v13 = vpop.f32.mrf.mxu0 }
 0x4cb   : > { %v2421_v51 = vpop.f32.mrf.mxu1 }
 0x4cc   : > { %v2240_v44 = vpop.f32.mrf.mxu0 }
 0x4ce   : > { %v2244_v45 = vpop.f32.mrf.mxu0 }
 0x4d0   : > { %v2246_v14 = vpop.f32.mrf.mxu0 }
 0x4d2   : > { %v2250_v15 = vpop.f32.mrf.mxu0 }
 0x4d4   : > { %v2252_v43 = vpop.f32.mrf.mxu0 }
 0x4d6   : > { %v2256_v63 = vpop.f32.mrf.mxu0 }
 0x4d8   : > { %v2258_v18 = vpop.f32.mrf.mxu0 }
 0x4da   : > { %v2262_v40 = vpop.f32.mrf.mxu0 }
 0x4dc   : > { %v2264_v1 = vpop.f32.mrf.mxu0 }
 0x4de   : > { %v2268_v19 = vpop.f32.mrf.mxu0 }
 0x4e0   : > { %v2270_v38 = vpop.f32.mrf.mxu0 }
 0x4e2   : > { %v2274_v39 = vpop.f32.mrf.mxu0 }
 0x4e4   : > { %v2276_v21 = vpop.f32.mrf.mxu0 }
 0x4e6   : > { %v2280_v22 = vpop.f32.mrf.mxu0 }
 0x4e7   : > { %5444 = vmatprep.subr.mxu0 %v2280_v22 }
 0x4e8   : > { %v2282_v37 = vpop.f32.mrf.mxu0  ;;  %5445 = vmatpush3.msra.mxu0 %v2280_v22  ;;  %v3049_v22 = vld [vmem:[#allocation4 + $0x2e0] sm:$0xff] }
 0x4e9   : > { %5388 = vmatprep.subr.mxu1 %v2282_v37  ;;  %5446 = vmatprep.subr.mxu0 %v2274_v39 }
 0x4ea   : > { %5389 = vmatpush3.msra.mxu1 %v2282_v37  ;;  %5447 = vmatpush3.msra.mxu0 %v2274_v39  ;;  %v3052_v39 = vld [vmem:[#allocation4 + $0x2f8] sm:$0xff] }
 0x4eb   : > { %5390 = vmatprep.subr.mxu1 %v2276_v21  ;;  %5448 = vmatprep.subr.mxu0 %v2268_v19  ;;  %v3044_v37 = vld [vmem:[#allocation4 + $0x2b8] sm:$0xff] }
 0x4ec   : > { %5391 = vmatpush3.msra.mxu1 %v2276_v21  ;;  %5449 = vmatpush3.msra.mxu0 %v2268_v19  ;;  %v4155_v19 = vld [vmem:[%s7320_s1 + $0x478] sm:$0xff]  ;;  %v3047_v21 = vld [vmem:[#allocation4 + $0x2d0] sm:$0xff] }
 0x4ed   : > { %5392 = vmatprep.subr.mxu1 %v2270_v38  ;;  %5450 = vmatprep.subr.mxu0 %v2262_v40 }
 0x4ee   : > { %5393 = vmatpush3.msra.mxu1 %v2270_v38  ;;  %5451 = vmatpush3.msra.mxu0 %v2262_v40  ;;  %v4152_v40 = vld [vmem:[%s7320_s1 + $0x460] sm:$0xff]  ;;  %v3050_v38 = vld [vmem:[#allocation4 + $0x2e8] sm:$0xff] }
 0x4ef   : > { %5394 = vmatprep.subr.mxu1 %v2264_v1  ;;  %5452 = vmatprep.subr.mxu0 %v2256_v63 }
 0x4f0   : > { %5395 = vmatpush3.msra.mxu1 %v2264_v1  ;;  %5453 = vmatpush3.msra.mxu0 %v2256_v63  ;;  %v4149_v63 = vld [vmem:[%s7320_s1 + $0x448] sm:$0xff]  ;;  %v4154_v1 = vld [vmem:[%s7320_s1 + $0x470] sm:$0xff] }
 0x4f1   : > { %5396 = vmatprep.subr.mxu1 %v2258_v18  ;;  %5454 = vmatprep.subr.mxu0 %v2250_v15 }
 0x4f2   : > { %5397 = vmatpush3.msra.mxu1 %v2258_v18  ;;  %5455 = vmatpush3.msra.mxu0 %v2250_v15  ;;  %v4146_v15 = vld [vmem:[%s7320_s1 + $0x430] sm:$0xff]  ;;  %v4151_v18 = vld [vmem:[%s7320_s1 + $0x458] sm:$0xff] }
 0x4f3   : > { %5398 = vmatprep.subr.mxu1 %v2252_v43  ;;  %5456 = vmatprep.subr.mxu0 %v2244_v45 }
 0x4f4   : > { %5399 = vmatpush3.msra.mxu1 %v2252_v43  ;;  %5457 = vmatpush3.msra.mxu0 %v2244_v45  ;;  %v4143_v45 = vld [vmem:[%s7320_s1 + $0x418] sm:$0xff]  ;;  %v4148_v43 = vld [vmem:[%s7320_s1 + $0x440] sm:$0xff] }
 0x4f5   : > { %5400 = vmatprep.subr.mxu1 %v2246_v14  ;;  %5458 = vmatprep.subr.mxu0 %v2238_v13 }
 0x4f6   : > { %5401 = vmatpush3.msra.mxu1 %v2246_v14  ;;  %5459 = vmatpush3.msra.mxu0 %v2238_v13  ;;  %v4141_v13 = vld [vmem:[%s7320_s1 + $0x408] sm:$0xff] }
 0x4f7   : > { %5402 = vmatprep.subr.mxu1 %v2240_v44  ;;  %5460 = vmatprep.subr.mxu0 %v2232_v47  ;;  %v4145_v14 = vld [vmem:[%s7320_s1 + $0x428] sm:$0xff] }
 0x4f8   : > { %5403 = vmatpush3.msra.mxu1 %v2240_v44  ;;  %5461 = vmatpush3.msra.mxu0 %v2232_v47  ;;  %v4139_v47 = vld [vmem:[%s7320_s1 + $0x3f8] sm:$0xff]  ;;  %v4142_v44 = vld [vmem:[%s7320_s1 + $0x410] sm:$0xff] }
 0x4f9   : > { %5404 = vmatprep.subr.mxu1 %v6725_v3  ;;  %5462 = vmatprep.subr.mxu0 %v6721_v7 }
 0x4fa   : > { %5405 = vmatpush3.msra.mxu1 %v6725_v3  ;;  %5463 = vmatpush3.msra.mxu0 %v6721_v7  ;;  %v4138_v7 = vld [vmem:[%s7320_s1 + $0x3f0] sm:$0xff]  ;;  %v4140_v3 = vld [vmem:[%s7320_s1 + $0x400] sm:$0xff] }
 0x4fb   : > { %5406 = vmatprep.subr.mxu1 %v6723_v46  ;;  %5464 = vmatprep.subr.mxu0 %v6717_v49 }
 0x4fc   : > { %5407 = vmatpush3.msra.mxu1 %v6723_v46  ;;  %5465 = vmatpush3.msra.mxu0 %v6717_v49  ;;  %v4122_v49 = vld [vmem:[%s7320_s1 + $0x370] sm:$0xff]  ;;  %v4123_v46 = vld [vmem:[%s7320_s1 + $0x378] sm:$0xff] }
 0x4fd   : > { %5408 = vmatprep.subr.mxu1 %v6719_v52  ;;  %5466 = vmatprep.subr.mxu0 %v6713_v50 }
 0x4fe   : > { %5409 = vmatpush3.msra.mxu1 %v6719_v52  ;;  %5467 = vmatpush3.msra.mxu0 %v6713_v50  ;;  %v4136_v50 = vld [vmem:[%s7320_s1 + $0x3e0] sm:$0xff]  ;;  %v4137_v52 = vld [vmem:[%s7320_s1 + $0x3e8] sm:$0xff] }
 0x4ff   : > { %5410 = vmatprep.subr.mxu1 %v6715_v48  ;;  %5468 = vmatprep.subr.mxu0 %v6709_v60 }
 0x500   : > { %5411 = vmatpush3.msra.mxu1 %v6715_v48  ;;  %5469 = vmatpush3.msra.mxu0 %v6709_v60  ;;  %v4120_v60 = vld [vmem:[%s7320_s1 + $0x360] sm:$0xff]  ;;  %v4121_v48 = vld [vmem:[%s7320_s1 + $0x368] sm:$0xff] }
 0x501   : > { %5412 = vmatprep.subr.mxu1 %v6711_v11  ;;  %5470 = vmatprep.subr.mxu0 %v6705_v56 }
 0x502   : > { %5413 = vmatpush3.msra.mxu1 %v6711_v11  ;;  %5471 = vmatpush3.msra.mxu0 %v6705_v56  ;;  %v4134_v56 = vld [vmem:[%s7320_s1 + $0x3d0] sm:$0xff]  ;;  %v4135_v11 = vld [vmem:[%s7320_s1 + $0x3d8] sm:$0xff] }
 0x503   : > { %5414 = vmatprep.subr.mxu1 %v6707_v12  ;;  %5472 = vmatprep.subr.mxu0 %v6701_v58 }
 0x504   : > { %5415 = vmatpush3.msra.mxu1 %v6707_v12  ;;  %5473 = vmatpush3.msra.mxu0 %v6701_v58  ;;  %v4118_v58 = vld [vmem:[%s7320_s1 + $0x350] sm:$0xff]  ;;  %v4119_v12 = vld [vmem:[%s7320_s1 + $0x358] sm:$0xff] }
 0x505   : > { %5416 = vmatprep.subr.mxu1 %v6703_v54  ;;  %5474 = vmatprep.subr.mxu0 %v6697_v62 }
 0x506   : > { %5417 = vmatpush3.msra.mxu1 %v6703_v54  ;;  %5475 = vmatpush3.msra.mxu0 %v6697_v62  ;;  %v4132_v62 = vld [vmem:[%s7320_s1 + $0x3c0] sm:$0xff]  ;;  %v4133_v54 = vld [vmem:[%s7320_s1 + $0x3c8] sm:$0xff] }
 0x507   : > { %5418 = vmatprep.subr.mxu1 %v6699_v0  ;;  %5477 = vmatmul.mubr.f32.vlgmr.msra.gmra.mxu0 %v4109_v26  ;;  %v3036_v26 = vld [vmem:[#allocation4 + $0x278] sm:$0xff] }
 0x508   : > { %5419 = vmatpush3.msra.mxu1 %v6699_v0  ;;  %5479 = vmatprep.mubr.f32.mxu0 %v4110_v27  ;;  %v4117_v0 = vld [vmem:[%s7320_s1 + $0x348] sm:$0xff]  ;;  %v3035_v27 = vld [vmem:[#allocation4 + $0x270] sm:$0xff] }
 0x509   : > { %5421 = vmatmul.mubr.f32.vlgmr.msra.gmra.mxu1 %v4125_v29  ;;  %5500 = vmatprep.subr.mxu1 %v5387_v28  ;;  %v3033_v29 = vld [vmem:[#allocation4 + $0x260] sm:$0xff] }
 0x50a   : > { %5501 = vmatpush3.msra.mxu1 %v5387_v28  ;;  %5423 = vmatprep.mubr.f32.mxu1 %v4126_v57  ;;  %v3037_v28 = vld [vmem:[#allocation4 + $0x280] sm:$0xff]  ;;  %v3032_v57 = vld [vmem:[#allocation4 + $0x258] sm:$0xff] }
 0x50b   : > { %5502 = vmatprep.subr.mxu1 %v2421_v51  ;;  %5480 = vmatmul.mubr.f32.gmra.mxu0 %v4111_v30  ;;  %v3034_v30 = vld [vmem:[#allocation4 + $0x268] sm:$0xff] }
 0x50c   : > { %5503 = vmatpush3.msra.mxu1 %v2421_v51  ;;  %5482 = vmatprep.mubr.f32.mxu0 %v4112_v31  ;;  %v3030_v31 = vld [vmem:[#allocation4 + $0x248] sm:$0xff]  ;;  %v3029_v51 = vld [vmem:[#allocation4 + $0x240] sm:$0xff] }
 0x50d   : > { %5424 = vmatmul.mubr.f32.gmra.mxu1 %v4127_v16  ;;  %5504 = vmatprep.subr.mxu1 %v5384_v55  ;;  %v3031_v16 = vld [vmem:[#allocation4 + $0x250] sm:$0xff] }
 0x50e   : > { %5505 = vmatpush3.msra.mxu1 %v5384_v55  ;;  %5426 = vmatprep.mubr.f32.mxu1 %v4128_v53  ;;  %v3038_v55 = vld [vmem:[#allocation4 + $0x288] sm:$0xff]  ;;  %v3027_v53 = vld [vmem:[#allocation4 + $0x230] sm:$0xff] }
 0x50f   : > { %5506 = vmatprep.subr.mxu1 %v2411_v25  ;;  %5483 = vmatmul.mubr.f32.gmra.mxu0 %v4113_v32  ;;  %v3026_v32 = vld [vmem:[#allocation4 + $0x228] sm:$0xff] }
 0x510   : > { %5507 = vmatpush3.msra.mxu1 %v2411_v25  ;;  %5485 = vmatprep.mubr.f32.mxu0 %v4114_v6  ;;  %v3040_v25 = vld [vmem:[#allocation4 + $0x298] sm:$0xff] }
 0x511   : > { %5427 = vmatmul.mubr.f32.gmra.mxu1 %v4129_v8  ;;  %5508 = vmatprep.subr.mxu1 %v6747_v34  ;;  %v3028_v6 = vld [vmem:[#allocation4 + $0x238] sm:$0xff] }
 0x512   : > { %5509 = vmatpush3.msra.mxu1 %v6747_v34  ;;  %5429 = vmatprep.mubr.f32.mxu1 %v4130_v2  ;;  %v3043_v34 = vld [vmem:[#allocation4 + $0x2b0] sm:$0xff]  ;;  %v3024_v8 = vld [vmem:[#allocation4 + $0x218] sm:$0xff] }
 0x513   : > { %5510 = vmatprep.subr.mxu1 %v6755_v35  ;;  %5486 = vmatmul.mubr.f32.gmra.mxu0 %v4115_v4  ;;  %v3023_v2 = vld [vmem:[#allocation4 + $0x210] sm:$0xff]  ;;  %v3025_v4 = vld [vmem:[#allocation4 + $0x220] sm:$0xff] }
 0x514   : > { %5511 = vmatpush3.msra.mxu1 %v6755_v35  ;;  %5488 = vmatprep.mubr.f32.mxu0 %v4116_v9  ;;  %v3039_v35 = vld [vmem:[#allocation4 + $0x290] sm:$0xff]  ;;  %v3021_v9 = vld [vmem:[#allocation4 + $0x200] sm:$0xff] }
 0x515   : > { %5430 = vmatmul.mubr.f32.gmra.mxu1 %v4131_v10  ;;  %5512 = vmatprep.subr.mxu1 %v6743_v23  ;;  %v3020_v10 = vld [vmem:[#allocation4 + $0x1f8] sm:$0xff] }
 0x516   : > { %5513 = vmatpush3.msra.mxu1 %v6743_v23  ;;  %5432 = vmatprep.mubr.f32.mxu1 %v4132_v62  ;;  %v3042_v23 = vld [vmem:[#allocation4 + $0x2a8] sm:$0xff] }
 0x517   : > { %5514 = vmatprep.subr.mxu1 %v6745_v24  ;;  %5489 = vmatmul.mubr.f32.gmra.mxu0 %v4117_v0  ;;  %v3022_v62 = vld [vmem:[#allocation4 + $0x208] sm:$0xff] }
 0x518   : > { %5515 = vmatpush3.msra.mxu1 %v6745_v24  ;;  %5491 = vmatprep.mubr.f32.mxu0 %v4118_v58  ;;  %v3041_v24 = vld [vmem:[#allocation4 + $0x2a0] sm:$0xff]  ;;  %v3018_v0 = vld [vmem:[#allocation4 + $0x1e8] sm:$0xff] }
 0x519   : > { %5433 = vmatmul.mubr.f32.gmra.mxu1 %v4133_v54  ;;  %5516 = vmatprep.subr.mxu1 %v6739_v36  ;;  %v3017_v58 = vld [vmem:[#allocation4 + $0x1e0] sm:$0xff]  ;;  %v3019_v54 = vld [vmem:[#allocation4 + $0x1f0] sm:$0xff] }
 0x51a   : > { %5517 = vmatpush3.msra.mxu1 %v6739_v36  ;;  %5435 = vmatprep.mubr.f32.mxu1 %v4134_v56  ;;  %v3045_v36 = vld [vmem:[#allocation4 + $0x2c0] sm:$0xff]  ;;  %v3015_v56 = vld [vmem:[#allocation4 + $0x1d0] sm:$0xff] }
 0x51b   : > { %5518 = vmatprep.subr.mxu1 %v6741_v61  ;;  %5492 = vmatmul.mubr.f32.gmra.mxu0 %v4119_v12  ;;  %v3014_v12 = vld [vmem:[#allocation4 + $0x1c8] sm:$0xff] }
 0x51c   : > { %5519 = vmatpush3.msra.mxu1 %v6741_v61  ;;  %5494 = vmatprep.mubr.f32.mxu0 %v4120_v60  ;;  %v3046_v61 = vld [vmem:[#allocation4 + $0x2c8] sm:$0xff]  ;;  %v3016_v60 = vld [vmem:[#allocation4 + $0x1d8] sm:$0xff] }
 0x51d   : > { %5436 = vmatmul.mubr.f32.gmra.mxu1 %v4135_v11  ;;  %5520 = vmatprep.subr.mxu1 %v6735_v20  ;;  %v3012_v11 = vld [vmem:[#allocation4 + $0x1b8] sm:$0xff] }
 0x51e   : > { %5521 = vmatpush3.msra.mxu1 %v6735_v20  ;;  %5438 = vmatprep.mubr.f32.mxu1 %v4136_v50  ;;  %v3051_v20 = vld [vmem:[#allocation4 + $0x2f0] sm:$0xff] }
 0x51f   : > { %5522 = vmatprep.subr.mxu1 %v6737_v59  ;;  %5495 = vmatmul.mubr.f32.gmra.mxu0 %v4121_v48  ;;  %v3011_v50 = vld [vmem:[#allocation4 + $0x1b0] sm:$0xff]  ;;  %v3013_v48 = vld [vmem:[#allocation4 + $0x1c0] sm:$0xff] }
 0x520   : > { %5523 = vmatpush3.msra.mxu1 %v6737_v59  ;;  %5497 = vmatprep.mubr.f32.mxu0 %v4122_v49  ;;  %v3048_v59 = vld [vmem:[#allocation4 + $0x2d8] sm:$0xff]  ;;  %v3009_v49 = vld [vmem:[#allocation4 + $0x1a0] sm:$0xff] }
 0x521   : > { %5439 = vmatmul.mubr.f32.gmra.mxu1 %v4137_v52  ;;  %5524 = vmatprep.subr.mxu1 %v6731_v17  ;;  %v3008_v52 = vld [vmem:[#allocation4 + $0x198] sm:$0xff] }
 0x522   : > { %5525 = vmatpush3.msra.mxu1 %v6731_v17  ;;  %5441 = vmatprep.mubr.f32.mxu1 %v4138_v7  ;;  %v4150_v17 = vld [vmem:[%s7320_s1 + $0x450] sm:$0xff]  ;;  %v3010_v7 = vld [vmem:[#allocation4 + $0x1a8] sm:$0xff] }
 0x523   : > { %5526 = vmatprep.subr.mxu1 %v6733_v41  ;;  %5498 = vmatmul.mubr.f32.gmra.mxu0 %v4123_v46  ;;  %v3006_v46 = vld [vmem:[#allocation4 + $0x188] sm:$0xff] }
 0x524   : > { %5527 = vmatpush3.msra.mxu1 %v6733_v41  ;;  %3117 = vmatprep.mubr.f32.mxu0 %v5888_v33  ;;  %v4153_v41 = vld [vmem:[%s7320_s1 + $0x468] sm:$0xff] }
 0x525   : > { %5442 = vmatmul.mubr.f32.gmra.mxu1 %v4139_v47  ;;  %5528 = vmatprep.subr.mxu1 %v6727_v5  ;;  %v3005_v47 = vld [vmem:[#allocation4 + $0x180] sm:$0xff] }
 0x526   : > { %5529 = vmatpush3.msra.mxu1 %v6727_v5  ;;  %5532 = vmatprep.mubr.f32.mxu1 %v4140_v3  ;;  %v4144_v5 = vld [vmem:[%s7320_s1 + $0x420] sm:$0xff]  ;;  %v3007_v3 = vld [vmem:[#allocation4 + $0x190] sm:$0xff] }
 0x527   : > { %5530 = vmatprep.subr.mxu1 %v6729_v42  ;;  %3053 = vmatprep.subr.mxu0 %v3051_v20 }
 0x528   : > { %5531 = vmatpush3.msra.mxu1 %v6729_v42  ;;  %v4147_v42 = vld [vmem:[%s7320_s1 + $0x438] sm:$0xff]  ;;  %3054 = vmatpush1.msra.mxu0 %v3050_v38 }
 0x529   : > { %5533 = vmatmul.mubr.f32.vlgmr.msra.gmra.mxu1 %v4141_v13  ;;  %5556 = vmatprep.subr.mxu1 %v3052_v39 }
 0x52a   : > { %5535 = vmatprep.mubr.f32.mxu1 %v4142_v44  ;;  %3055 = vmatprep.subr.mxu0 %v3048_v59 }
 0x52b   : > { %5557 = vmatpush3.msra.mxu1 %v3052_v39  ;;  %3056 = vmatpush1.msra.mxu0 %v3047_v21 }
 0x52c   : > { %5558 = vmatprep.subr.mxu1 %v3049_v22  ;;  %3057 = vmatprep.subr.mxu0 %v3045_v36 }
 0x52d   : > { %5536 = vmatmul.mubr.f32.gmra.mxu1 %v4143_v45  ;;  %3058 = vmatpush1.msra.mxu0 %v3044_v37 }
 0x52e   : > { %5538 = vmatprep.mubr.f32.mxu1 %v4144_v5  ;;  %5559 = vmatpush3.msra.mxu1 %v3049_v22 }
 0x52f   : > { %5560 = vmatprep.subr.mxu1 %v3046_v61  ;;  %3059 = vmatprep.subr.mxu0 %v3042_v23 }
 0x530   : > { %5561 = vmatpush3.msra.mxu1 %v3046_v61  ;;  %3060 = vmatpush1.msra.mxu0 %v3041_v24 }
 0x531   : > { %5539 = vmatmul.mubr.f32.gmra.mxu1 %v4145_v14  ;;  %5562 = vmatprep.subr.mxu1 %v3043_v34 }
 0x532   : > { %5541 = vmatprep.mubr.f32.mxu1 %v4146_v15  ;;  %3061 = vmatprep.subr.mxu0 %v3039_v35 }
 0x533   : > { %5563 = vmatpush3.msra.mxu1 %v3043_v34  ;;  %3062 = vmatpush1.msra.mxu0 %v3038_v55  ;;  %v6961_v34 = vld [vmem:[%s7323_s4 + $0x2] ss:$0 sm:$0xff] }
 0x534   : > { %5564 = vmatprep.subr.mxu1 %v3040_v25  ;;  %3063 = vmatprep.subr.mxu0 %v3036_v26 }
 0x535   : > { %5542 = vmatmul.mubr.f32.gmra.mxu1 %v4147_v42  ;;  %3064 = vmatpush1.msra.mxu0 %v3035_v27 }
 0x536   : > { %5544 = vmatprep.mubr.f32.mxu1 %v4148_v43  ;;  %5565 = vmatpush3.msra.mxu1 %v3040_v25 }
 0x537   : > { %5566 = vmatprep.subr.mxu1 %v3037_v28  ;;  %3065 = vmatprep.subr.mxu0 %v3033_v29 }
 0x538   : > { %5567 = vmatpush3.msra.mxu1 %v3037_v28  ;;  %3066 = vmatpush1.msra.mxu0 %v3032_v57 }
 0x539   : > { %5545 = vmatmul.mubr.f32.gmra.mxu1 %v4149_v63  ;;  %5568 = vmatprep.subr.mxu1 %v3034_v30 }
 0x53a   : > { %5547 = vmatprep.mubr.f32.mxu1 %v4150_v17  ;;  %3067 = vmatprep.subr.mxu0 %v3030_v31 }
 0x53b   : > { %5569 = vmatpush3.msra.mxu1 %v3034_v30  ;;  %3068 = vmatpush1.msra.mxu0 %v3029_v51 }
 0x53c   : > { %5570 = vmatprep.subr.mxu1 %v3031_v16  ;;  %3069 = vmatprep.subr.mxu0 %v3027_v53 }
 0x53d   : > { %5548 = vmatmul.mubr.f32.gmra.mxu1 %v4151_v18  ;;  %3070 = vmatpush1.msra.mxu0 %v3026_v32 }
 0x53e   : > { %5550 = vmatprep.mubr.f32.mxu1 %v4152_v40  ;;  %5571 = vmatpush3.msra.mxu1 %v3031_v16 }
 0x53f   : > { %5572 = vmatprep.subr.mxu1 %v3028_v6  ;;  %3071 = vmatprep.subr.mxu0 %v3024_v8 }
 0x540   : > { %5573 = vmatpush3.msra.mxu1 %v3028_v6  ;;  %3072 = vmatpush1.msra.mxu0 %v3023_v2 }
 0x541   : > { %5551 = vmatmul.mubr.f32.gmra.mxu1 %v4153_v41  ;;  %5574 = vmatprep.subr.mxu1 %v3025_v4 }
 0x542   : > { %5553 = vmatprep.mubr.f32.mxu1 %v4154_v1  ;;  %3073 = vmatprep.subr.mxu0 %v3021_v9 }
 0x543   : > { %5575 = vmatpush3.msra.mxu1 %v3025_v4  ;;  %3074 = vmatpush1.msra.mxu0 %v3020_v10 }
 0x544   : > { %5576 = vmatprep.subr.mxu1 %v3022_v62  ;;  %3075 = vmatprep.subr.mxu0 %v3018_v0 }
 0x545   : > { %5554 = vmatmul.mubr.f32.gmra.mxu1 %v4155_v19  ;;  %3076 = vmatpush1.msra.mxu0 %v3017_v58 }
 0x546   : > { %5577 = vmatpush3.msra.mxu1 %v3022_v62  ;;  %3077 = vmatprep.subr.mxu0 %v3015_v56 }
 0x547   : > { %5578 = vmatprep.subr.mxu1 %v3019_v54  ;;  %3078 = vmatpush1.msra.mxu0 %v3014_v12 }
 0x548   : > { %5579 = vmatpush3.msra.mxu1 %v3019_v54  ;;  %3079 = vmatprep.subr.mxu0 %v3012_v11 }
 0x549   : > { %5580 = vmatprep.subr.mxu1 %v3016_v60  ;;  %3080 = vmatpush1.msra.mxu0 %v3011_v50 }
 0x54a   : > { %5581 = vmatpush3.msra.mxu1 %v3016_v60  ;;  %3081 = vmatprep.subr.mxu0 %v3009_v49 }
 0x54b   : > { %5582 = vmatprep.subr.mxu1 %v3013_v48  ;;  %3082 = vmatpush1.msra.mxu0 %v3008_v52 }
 0x54c   : > { %5583 = vmatpush3.msra.mxu1 %v3013_v48  ;;  %3083 = vmatprep.subr.mxu0 %v3006_v46 }
 0x54d   : > { %5584 = vmatprep.subr.mxu1 %v3010_v7  ;;  %3084 = vmatpush1.msra.mxu0 %v3005_v47 }
 0x54e   : > { %5585 = vmatpush3.msra.mxu1 %v3010_v7 }
 0x54f   : > { %5586 = vmatprep.subr.mxu1 %v3007_v3 }
 0x550   : > { %5587 = vmatpush3.msra.mxu1 %v3007_v3 }
 0x5c7   : > { %v5478_v13 = vpop.f32.mrf.mxu0 }
 0x5c9   : > { %v5422_v44 = vpop.f32.mrf.mxu1  ;;  %v2675_v5 = vpop.f32.mrf.mxu0 }
 0x5ca   : > { %v2681_v24 = vadd.f32 %v5478_v13, %v5422_v44 }
 0x5cb   : > { %v2530_v45 = vpop.f32.mrf.mxu1  ;;  %v5481_v42 = vpop.f32.mrf.mxu0 }
 0x5cc   : > { %v2676_v55 = vadd.f32 %v2675_v5, %v2530_v45 }
 0x5cd   : > { %v5425_v14 = vpop.f32.mrf.mxu1  ;;  %v2685_v63 = vpop.f32.mrf.mxu0 }
 0x5ce   : > { %v2691_v28 = vadd.f32 %v5481_v42, %v5425_v14 }
 0x5cf   : > { %v2540_v15 = vpop.f32.mrf.mxu1  ;;  %v5484_v40 = vpop.f32.mrf.mxu0 }
 0x5d0   : > { %v2686_v16 = vadd.f32 %v2685_v63, %v2540_v15 }
 0x5d1   : > { %v5428_v43 = vpop.f32.mrf.mxu1  ;;  %v2695_v19 = vpop.f32.mrf.mxu0 }
 0x5d2   : > { %v2701_v53 = vadd.f32 %v5484_v40, %v5428_v43 }
 0x5d3   : > { %v2550_v17 = vpop.f32.mrf.mxu1  ;;  %v5487_v39 = vpop.f32.mrf.mxu0 }
 0x5d4   : > { %v2696_v62 = vadd.f32 %v2695_v19, %v2550_v17 }
 0x5d5   : > { %v5431_v18 = vpop.f32.mrf.mxu1  ;;  %v2705_v22 = vpop.f32.mrf.mxu0 }
 0x5d6   : > { %v2711_v50 = vadd.f32 %v5487_v39, %v5431_v18 }
 0x5d7   : > { %v2560_v41 = vpop.f32.mrf.mxu1  ;;  %v5490_v61 = vpop.f32.mrf.mxu0 }
 0x5d8   : > { %v2706_v46 = vadd.f32 %v2705_v22, %v2560_v41 }
 0x5d9   : > { %v5434_v1 = vpop.f32.mrf.mxu1  ;;  %v2715_v26 = vpop.f32.mrf.mxu0 }
 0x5da   : > { %v2721_v47 = vadd.f32 %v5490_v61, %v5434_v1 }
 0x5db   : > { %v6944_v20 = vpop.f32.mrf.mxu1  ;;  %v5493_v32 = vpop.f32.mrf.mxu0 }
 0x5dc   : > { %v2716_v18 = vadd.f32 %v2715_v26, %v6944_v20 }
 0x5dd   : > { %v6946_v38 = vpop.f32.mrf.mxu1  ;;  %v2725_v54 = vpop.f32.mrf.mxu0 }
 0x5de   : > { %v2731_v19 = vadd.f32 %v5493_v32, %v6946_v38 }
 0x5df   : > { %v6948_v59 = vpop.f32.mrf.mxu1  ;;  %v5496_v44 = vpop.f32.mrf.mxu0 }
 0x5e0   : > { %v2726_v26 = vadd.f32 %v2725_v54, %v6948_v59 }
 0x5e1   : > { %v6950_v21 = vpop.f32.mrf.mxu1  ;;  %v2735_v39 = vpop.f32.mrf.mxu0 }
 0x5e3   : > { %v6952_v36 = vpop.f32.mrf.mxu1 }
 0x5e5   : > { %v6954_v37 = vpop.f32.mrf.mxu1 }
 0x5e7   : > { %v6956_v23 = vpop.f32.mrf.mxu1 }
 0x5e9   : > { %v5534_v35 = vpop.f32.mrf.mxu1 }
 0x5ea   : > { %v2917_v25 = vadd.f32 %v5534_v35, %v2681_v24 }
 0x5eb   : > { %v2837_v27 = vpop.f32.mrf.mxu1 }
 0x5ec   : > { %v2939_v29 = vadd.f32 %v6961_v34, %v2917_v25  ;;  %v2916_v57 = vadd.f32 %v2837_v27, %v2676_v55 }
 0x5ed   : > { %v5537_v30 = vpop.f32.mrf.mxu1 }
 0x5ee   : > { %v2938_v31 = vadd.f32 %v6961_v34, %v2916_v57  ;;  %v2919_v51 = vadd.f32 %v5537_v30, %v2691_v28  ;;  %v2971_v6 = vmul.f32 0.2, %v2939_v29  ;;  %vm2955_vm0 = vcmp.ge.f32.partialorder %v2939_v29, 0.0  ;;  %v5499_v57 = vpop.f32.mrf.mxu0 }
 0x5ef   : > { %v2847_v8 = vpop.f32.mrf.mxu1 }
 0x5f0   : > { %vm2954_vm1 = vcmp.ge.f32.partialorder %v2938_v31, 0.0  ;;  %v2970_v2 = vmul.f32 0.2, %v2938_v31  ;;  %v2941_v4 = vadd.f32 %v6961_v34, %v2919_v51  ;;  %v2918_v9 = vadd.f32 %v2847_v8, %v2686_v16 }
 0x5f1   : > { %v5540_v10 = vpop.f32.mrf.mxu1  ;;  %v2987_v56 = vsel %vm2955_vm0, %v2939_v29, %v2971_v6  ;;  %v2741_v29 = vadd.f32 %v5496_v44, %v6950_v21  ;;  %v2736_v6 = vadd.f32 %v2735_v39, %v6952_v36 }
 0x5f2   : > { %v2986_v0 = vsel %vm2954_vm1, %v2938_v31, %v2970_v2  ;;  %v2921_v58 = vadd.f32 %v5540_v10, %v2701_v53  ;;  %v2973_v12 = vmul.f32 0.2, %v2941_v4  ;;  %v2940_v60 = vadd.f32 %v6961_v34, %v2918_v9  ;;  %v2745_v9 = vpop.f32.mrf.mxu0 }
 0x5f3   : > { %v2857_v11 = vpop.f32.mrf.mxu1  ;;  %3118 = vmatmul.mubr.f32.vlgmr.msra.gmra.mxu0 %v2986_v0  ;;  %5588 = vmatprep.mubr.f32.mxu1 %v2986_v0  ;;  %vm2957_vm2 = vcmp.ge.f32.partialorder %v2941_v4, 0.0 }
 0x5f4   : > { %v2943_v48 = vadd.f32 %v6961_v34, %v2921_v58  ;;  %v2920_v49 = vadd.f32 %v2857_v11, %v2696_v62  ;;  %5589 = vmatmul.mubr.f32.vlgmr.msra.gmra.mxu1 %v2987_v56  ;;  %3123 = vmatprep.mubr.f32.mxu0 %v5888_v33  ;;  %vm2956_vm3 = vcmp.ge.f32.partialorder %v2940_v60, 0.0  ;;  %v2972_v7 = vmul.f32 0.2, %v2940_v60 }
 0x5f5   : > { %v5543_v52 = vpop.f32.mrf.mxu1  ;;  %v2989_v15 = vsel %vm2957_vm2, %v2941_v4, %v2973_v12  ;;  %v2751_v4 = vadd.f32 %v5499_v57, %v6954_v37  ;;  %v2746_v12 = vadd.f32 %v2745_v9, %v6956_v23 }
 0x5f6   : > { %v2942_v3 = vadd.f32 %v6961_v34, %v2920_v49  ;;  %v2923_v13 = vadd.f32 %v5543_v52, %v2711_v50  ;;  %v2975_v45 = vmul.f32 0.2, %v2943_v48  ;;  %v2988_v14 = vsel %vm2956_vm3, %v2940_v60, %v2972_v7 }
 0x5f7   : > { %v2867_v5 = vpop.f32.mrf.mxu1  ;;  %3124 = vmatmul.mubr.f32.gmra.mxu0 %v2987_v56  ;;  %vm2959_vm4 = vcmp.ge.f32.partialorder %v2943_v48, 0.0  ;;  %5591 = vmatprep.mubr.f32.mxu1 %v2988_v14 }
 0x5f8   : > { %v2945_v42 = vadd.f32 %v6961_v34, %v2923_v13  ;;  %v2922_v43 = vadd.f32 %v2867_v5, %v2706_v46  ;;  %3129 = vmatprep.mubr.f32.mxu0 %v5888_v33  ;;  %vm2958_vm5 = vcmp.ge.f32.partialorder %v2942_v3, 0.0  ;;  %v2974_v63 = vmul.f32 0.2, %v2942_v3  ;;  %5592 = vmatmul.mubr.f32.gmra.mxu1 %v2989_v15 }
 0x5f9   : > { %v5546_v17 = vpop.f32.mrf.mxu1  ;;  %v2991_v24 = vsel %vm2959_vm4, %v2943_v48, %v2975_v45 }
 0x5fa   : > { %v2944_v40 = vadd.f32 %v6961_v34, %v2922_v43  ;;  %v2925_v41 = vadd.f32 %v5546_v17, %v2721_v47  ;;  %v2990_v1 = vsel %vm2958_vm5, %v2942_v3, %v2974_v63  ;;  %v2977_v22 = vmul.f32 0.2, %v2945_v42 }
 0x5fb   : > { %v2877_v61 = vpop.f32.mrf.mxu1  ;;  %3130 = vmatmul.mubr.f32.gmra.mxu0 %v2988_v14  ;;  %5594 = vmatprep.mubr.f32.mxu1 %v2990_v1  ;;  %vm2961_vm6 = vcmp.ge.f32.partialorder %v2945_v42, 0.0  ;;  %v4158_v14 = vld [vmem:[%s7320_s1 + $0x480] sm:$0xff] }
 0x5fc   : > { %v2947_v35 = vadd.f32 %v6961_v34, %v2925_v41  ;;  %v2924_v55 = vadd.f32 %v2877_v61, %v2716_v18  ;;  %3135 = vmatprep.mubr.f32.mxu0 %v5888_v33  ;;  %vm2960_vm7 = vcmp.ge.f32.partialorder %v2944_v40, 0.0  ;;  %v2976_v20 = vmul.f32 0.2, %v2944_v40  ;;  %5595 = vmatmul.mubr.f32.gmra.mxu1 %v2991_v24 }
 0x5fd   : > { %v5549_v25 = vpop.f32.mrf.mxu1  ;;  %v2993_v51 = vsel %vm2961_vm6, %v2945_v42, %v2977_v22 }
 0x5fe   : > { %v2946_v38 = vadd.f32 %v6961_v34, %v2924_v55  ;;  %v2927_v27 = vadd.f32 %v5549_v25, %v2731_v19  ;;  %v2992_v28 = vsel %vm2960_vm7, %v2944_v40, %v2976_v20  ;;  %v2979_v30 = vmul.f32 0.2, %v2947_v35 }
 0x5ff   : > { %v2887_v31 = vpop.f32.mrf.mxu1  ;;  %3136 = vmatmul.mubr.f32.gmra.mxu0 %v2989_v15  ;;  %5597 = vmatprep.mubr.f32.mxu1 %v2992_v28  ;;  %vm2963_vm8 = vcmp.ge.f32.partialorder %v2947_v35, 0.0 }
 0x600   : > { %v2949_v16 = vadd.f32 %v6961_v34, %v2927_v27  ;;  %v2926_v53 = vadd.f32 %v2887_v31, %v2726_v26  ;;  %3141 = vmatprep.mubr.f32.mxu0 %v5888_v33  ;;  %vm2962_vm9 = vcmp.ge.f32.partialorder %v2946_v38, 0.0  ;;  %v2978_v59 = vmul.f32 0.2, %v2946_v38  ;;  %5598 = vmatmul.mubr.f32.gmra.mxu1 %v2993_v51 }
 0x601   : > { %v5552_v32 = vpop.f32.mrf.mxu1  ;;  %v2995_v0 = vsel %vm2963_vm8, %v2947_v35, %v2979_v30 }
 0x602   : > { %v2948_v21 = vadd.f32 %v6961_v34, %v2926_v53  ;;  %v2929_v8 = vadd.f32 %v5552_v32, %v2741_v29  ;;  %v2994_v2 = vsel %vm2962_vm9, %v2946_v38, %v2978_v59  ;;  %v2981_v10 = vmul.f32 0.2, %v2949_v16 }
 0x603   : > { %v2897_v62 = vpop.f32.mrf.mxu1  ;;  %3142 = vmatmul.mubr.f32.gmra.mxu0 %v2990_v1  ;;  %5600 = vmatprep.mubr.f32.mxu1 %v2994_v2  ;;  %vm2965_vm10 = vcmp.ge.f32.partialorder %v2949_v16, 0.0 }
 0x604   : > { %v2951_v58 = vadd.f32 %v6961_v34, %v2929_v8  ;;  %v2928_v54 = vadd.f32 %v2897_v62, %v2736_v6  ;;  %3147 = vmatprep.mubr.f32.mxu0 %v5888_v33  ;;  %vm2964_vm11 = vcmp.ge.f32.partialorder %v2948_v21, 0.0  ;;  %v2980_v36 = vmul.f32 0.2, %v2948_v21  ;;  %5601 = vmatmul.mubr.f32.gmra.mxu1 %v2995_v0 }
 0x605   : > { %v5555_v56 = vpop.f32.mrf.mxu1  ;;  %v2997_v49 = vsel %vm2965_vm10, %v2949_v16, %v2981_v10 }
 0x606   : > { %v2950_v37 = vadd.f32 %v6961_v34, %v2928_v54  ;;  %v2931_v60 = vadd.f32 %v5555_v56, %v2751_v4  ;;  %v2996_v11 = vsel %vm2964_vm11, %v2948_v21, %v2980_v36  ;;  %v2983_v50 = vmul.f32 0.2, %v2951_v58 }
 0x607   : > { %v2907_v48 = vpop.f32.mrf.mxu1  ;;  %3148 = vmatmul.mubr.f32.gmra.mxu0 %v2991_v24  ;;  %5603 = vmatprep.mubr.f32.mxu1 %v2996_v11  ;;  %vm2967_vm13 = vcmp.ge.f32.partialorder %v2951_v58, 0.0 }
 0x608   : > { %v2953_v52 = vadd.f32 %v6961_v34, %v2931_v60  ;;  %v2930_v7 = vadd.f32 %v2907_v48, %v2746_v12  ;;  %3153 = vmatprep.mubr.f32.mxu0 %v5888_v33  ;;  %vm2966_vm12 = vcmp.ge.f32.partialorder %v2950_v37, 0.0  ;;  %v2982_v46 = vmul.f32 0.2, %v2950_v37  ;;  %5604 = vmatmul.mubr.f32.gmra.mxu1 %v2997_v49  ;;  %v4160_v60 = vld [vmem:[%s7320_s1 + $0x490] sm:$0xff] }
 0x609   : > { %v2999_v13 = vsel %vm2967_vm13, %v2951_v58, %v2983_v50  ;;  %v4175_v50 = vld [vmem:[%s7320_s1 + $0x508] sm:$0xff]  ;;  %v4176_v48 = vld [vmem:[%s7320_s1 + $0x510] sm:$0xff] }
 0x60a   : > { %v2952_v23 = vadd.f32 %v6961_v34, %v2930_v7  ;;  %v2998_v47 = vsel %vm2966_vm12, %v2950_v37, %v2982_v46  ;;  %v2985_v3 = vmul.f32 0.2, %v2953_v52  ;;  %vm2969_vm15 = vcmp.ge.f32.partialorder %v2953_v52, 0.0  ;;  %v4174_v34 = vld [vmem:[%s7320_s1 + $0x500] sm:$0xff]  ;;  %v4159_v37 = vld [vmem:[%s7320_s1 + $0x488] sm:$0xff]  ;;  %v4177_v46 = vld [vmem:[%s7320_s1 + $0x518] sm:$0xff] }
 0x60b   : > { %3154 = vmatmul.mubr.f32.gmra.mxu0 %v2992_v28  ;;  %5606 = vmatprep.mubr.f32.mxu1 %v2998_v47 }
 0x60c   : > { %3159 = vmatprep.mubr.f32.mxu0 %v5888_v33  ;;  %vm2968_vm14 = vcmp.ge.f32.partialorder %v2952_v23, 0.0  ;;  %v2984_v44 = vmul.f32 0.2, %v2952_v23  ;;  %5607 = vmatmul.mubr.f32.gmra.mxu1 %v2999_v13  ;;  %v3001_v5 = vsel %vm2969_vm15, %v2953_v52, %v2985_v3  ;;  %v4162_v52 = vld [vmem:[%s7320_s1 + $0x4a0] sm:$0xff]  ;;  %v4164_v3 = vld [vmem:[%s7320_s1 + $0x4b0] sm:$0xff] }
 0x60e   : > { %v3000_v45 = vsel %vm2968_vm14, %v2952_v23, %v2984_v44  ;;  %v4178_v23 = vld [vmem:[%s7320_s1 + $0x520] sm:$0xff]  ;;  %v4180_v44 = vld [vmem:[%s7320_s1 + $0x530] sm:$0xff] }
 0x60f   : > { %3160 = vmatmul.mubr.f32.gmra.mxu0 %v2993_v51  ;;  %5609 = vmatprep.mubr.f32.mxu1 %v3000_v45 }
 0x610   : > { %3165 = vmatprep.mubr.f32.mxu0 %v5888_v33  ;;  %5610 = vmatmul.mubr.f32.gmra.mxu1 %v3001_v5 }
 0x611   : > { %5644 = vmatprep.mubr.f32.mxu1 %v4174_v34  ;;  %v4181_v34 = vld [vmem:[%s7320_s1 + $0x538] sm:$0xff] }
 0x613   : > { %3166 = vmatmul.mubr.f32.gmra.mxu0 %v2994_v2 }
 0x614   : > { %3171 = vmatprep.mubr.f32.mxu0 %v5888_v33 }
 0x617   : > { %3172 = vmatmul.mubr.f32.gmra.mxu0 %v2995_v0 }
 0x618   : > { %3177 = vmatprep.mubr.f32.mxu0 %v5888_v33 }
 0x61b   : > { %3178 = vmatmul.mubr.f32.gmra.mxu0 %v2996_v11 }
 0x61c   : > { %3183 = vmatprep.mubr.f32.mxu0 %v5888_v33 }
 0x61f   : > { %3184 = vmatmul.mubr.f32.gmra.mxu0 %v2997_v49  ;;  %v4161_v49 = vld [vmem:[%s7320_s1 + $0x498] sm:$0xff] }
 0x620   : > { %3189 = vmatprep.mubr.f32.mxu0 %v5888_v33 }
 0x623   : > { %3190 = vmatmul.mubr.f32.gmra.mxu0 %v2998_v47  ;;  %v4163_v47 = vld [vmem:[%s7320_s1 + $0x4a8] sm:$0xff] }
 0x624   : > { %3195 = vmatprep.mubr.f32.mxu0 %v5888_v33 }
 0x627   : > { %3196 = vmatmul.mubr.f32.gmra.mxu0 %v2999_v13  ;;  %v4179_v13 = vld [vmem:[%s7320_s1 + $0x528] sm:$0xff] }
 0x628   : > { %3201 = vmatprep.mubr.f32.mxu0 %v5888_v33 }
 0x62b   : > { %3202 = vmatmul.mubr.f32.gmra.mxu0 %v3000_v45  ;;  %v4165_v45 = vld [vmem:[%s7320_s1 + $0x4b8] sm:$0xff] }
 0x62c   : > { %3207 = vmatprep.mubr.f32.mxu0 %v5888_v33 }
 0x62f   : > { %3208 = vmatmul.mubr.f32.gmra.mxu0 %v3001_v5  ;;  %v4166_v5 = vld [vmem:[%s7320_s1 + $0x4c0] sm:$0xff] }
 0x630   : > { %5700 = vmatprep.mubr.f32.mxu0 %v4158_v14  ;;  %v4182_v14 = vld [vmem:[%s7320_s1 + $0x540] sm:$0xff] }
 0x6b3   : > { %v7011_v15 = vpop.f32.mrf.mxu0 }
 0x6b4   : > { %v7041_v25 = vpop.f32.mrf.mxu1 }
 0x6b5   : > { %v7013_v42 = vpop.f32.mrf.mxu0 }
 0x6b6   : > { %v7043_v27 = vpop.f32.mrf.mxu1 }
 0x6b7   : > { %v7015_v43 = vpop.f32.mrf.mxu0 }
 0x6b8   : > { %v7045_v57 = vpop.f32.mrf.mxu1 }
 0x6b9   : > { %v7017_v63 = vpop.f32.mrf.mxu0 }
 0x6ba   : > { %v7047_v51 = vpop.f32.mrf.mxu1 }
 0x6bb   : > { %v7019_v33 = vpop.f32.mrf.mxu0 }
 0x6bc   : > { %v7049_v59 = vpop.f32.mrf.mxu1 }
 0x6bd   : > { %v7021_v17 = vpop.f32.mrf.mxu0 }
 0x6be   : > { %v7051_v21 = vpop.f32.mrf.mxu1 }
 0x6bf   : > { %v7023_v18 = vpop.f32.mrf.mxu0 }
 0x6c0   : > { %v7053_v4 = vpop.f32.mrf.mxu1 }
 0x6c1   : > { %v7025_v40 = vpop.f32.mrf.mxu0 }
 0x6c2   : > { %v7055_v62 = vpop.f32.mrf.mxu1 }
 0x6c3   : > { %v7027_v41 = vpop.f32.mrf.mxu0 }
 0x6c4   : > { %v7057_v0 = vpop.f32.mrf.mxu1 }
 0x6c5   : > { %v7029_v1 = vpop.f32.mrf.mxu0 }
 0x6c6   : > { %v7059_v58 = vpop.f32.mrf.mxu1 }
 0x6c7   : > { %v7031_v19 = vpop.f32.mrf.mxu0 }
 0x6c8   : > { %v7061_v54 = vpop.f32.mrf.mxu1 }
 0x6c9   : > { %v7033_v39 = vpop.f32.mrf.mxu0 }
 0x6ca   : > { %v7065_v36 = vpop.f32.mrf.mxu1 }
 0x6cb   : > { %v7035_v22 = vpop.f32.mrf.mxu0 }
 0x6cc   : > { %v5608_v56 = vpop.f32.mrf.mxu1 }
 0x6cd   : > { %v7037_v61 = vpop.f32.mrf.mxu0 }
 0x6ce   : > { %v3340_v12 = vpop.f32.mrf.mxu1 }
 0x6cf   : > { %v3161_v24 = vpop.f32.mrf.mxu0 }
 0x6d0   : > { %v5611_v11 = vpop.f32.mrf.mxu1 }
 0x6d1   : > { %v7039_v35 = vpop.f32.mrf.mxu0 }
 0x6d2   : > { %v3350_v7 = vpop.f32.mrf.mxu1 }
 0x6d3   : > { %v3167_v55 = vpop.f32.mrf.mxu0 }
 0x6d5   : > { %v3169_v20 = vpop.f32.mrf.mxu0 }
 0x6d7   : > { %v3173_v26 = vpop.f32.mrf.mxu0 }
 0x6d9   : > { %v3175_v38 = vpop.f32.mrf.mxu0 }
 0x6db   : > { %v3179_v28 = vpop.f32.mrf.mxu0 }
 0x6dd   : > { %v3181_v29 = vpop.f32.mrf.mxu0 }
 0x6df   : > { %v3185_v30 = vpop.f32.mrf.mxu0 }
 0x6e1   : > { %v3187_v31 = vpop.f32.mrf.mxu0 }
 0x6e3   : > { %v3191_v16 = vpop.f32.mrf.mxu0 }
 0x6e5   : > { %v3193_v53 = vpop.f32.mrf.mxu0 }
 0x6e7   : > { %v3197_v32 = vpop.f32.mrf.mxu0 }
 0x6e9   : > { %v3199_v6 = vpop.f32.mrf.mxu0 }
 0x6eb   : > { %v3203_v8 = vpop.f32.mrf.mxu0 }
 0x6ed   : > { %v3205_v2 = vpop.f32.mrf.mxu0 }
 0x6ef   : > { %v3209_v9 = vpop.f32.mrf.mxu0 }
 0x6f0   : > { %5668 = vmatprep.subr.mxu0 %v3209_v9 }
 0x6f1   : > { %v3211_v10 = vpop.f32.mrf.mxu0  ;;  %5669 = vmatpush3.msra.mxu0 %v3209_v9 }
 0x6f2   : > { %5612 = vmatprep.subr.mxu1 %v3211_v10  ;;  %5670 = vmatprep.subr.mxu0 %v3203_v8 }
 0x6f3   : > { %5613 = vmatpush3.msra.mxu1 %v3211_v10  ;;  %5671 = vmatpush3.msra.mxu0 %v3203_v8 }
 0x6f4   : > { %5614 = vmatprep.subr.mxu1 %v3205_v2  ;;  %5672 = vmatprep.subr.mxu0 %v3197_v32 }
 0x6f5   : > { %5615 = vmatpush3.msra.mxu1 %v3205_v2  ;;  %5673 = vmatpush3.msra.mxu0 %v3197_v32 }
 0x6f6   : > { %5616 = vmatprep.subr.mxu1 %v3199_v6  ;;  %5674 = vmatprep.subr.mxu0 %v3191_v16 }
 0x6f7   : > { %5617 = vmatpush3.msra.mxu1 %v3199_v6  ;;  %5675 = vmatpush3.msra.mxu0 %v3191_v16  ;;  %v4204_v16 = vld [vmem:[%s7320_s1 + $0x5f0] sm:$0xff] }
 0x6f8   : > { %5618 = vmatprep.subr.mxu1 %v3193_v53  ;;  %5676 = vmatprep.subr.mxu0 %v3185_v30 }
 0x6f9   : > { %5619 = vmatpush3.msra.mxu1 %v3193_v53  ;;  %5677 = vmatpush3.msra.mxu0 %v3185_v30  ;;  %v4201_v30 = vld [vmem:[%s7320_s1 + $0x5d8] sm:$0xff] }
 0x6fa   : > { %5620 = vmatprep.subr.mxu1 %v3187_v31  ;;  %5678 = vmatprep.subr.mxu0 %v3179_v28  ;;  %v4205_v53 = vld [vmem:[%s7320_s1 + $0x5f8] sm:$0xff] }
 0x6fb   : > { %5621 = vmatpush3.msra.mxu1 %v3187_v31  ;;  %5679 = vmatpush3.msra.mxu0 %v3179_v28  ;;  %v4198_v28 = vld [vmem:[%s7320_s1 + $0x5c0] sm:$0xff] }
 0x6fc   : > { %5622 = vmatprep.subr.mxu1 %v3181_v29  ;;  %5680 = vmatprep.subr.mxu0 %v3173_v26  ;;  %v4202_v31 = vld [vmem:[%s7320_s1 + $0x5e0] sm:$0xff] }
 0x6fd   : > { %5623 = vmatpush3.msra.mxu1 %v3181_v29  ;;  %5681 = vmatpush3.msra.mxu0 %v3173_v26  ;;  %v4195_v26 = vld [vmem:[%s7320_s1 + $0x5a8] sm:$0xff] }
 0x6fe   : > { %5624 = vmatprep.subr.mxu1 %v3175_v38  ;;  %5682 = vmatprep.subr.mxu0 %v3167_v55  ;;  %v4199_v29 = vld [vmem:[%s7320_s1 + $0x5c8] sm:$0xff] }
 0x6ff   : > { %5625 = vmatpush3.msra.mxu1 %v3175_v38  ;;  %5683 = vmatpush3.msra.mxu0 %v3167_v55  ;;  %v4192_v55 = vld [vmem:[%s7320_s1 + $0x590] sm:$0xff] }
 0x700   : > { %5626 = vmatprep.subr.mxu1 %v3169_v20  ;;  %5684 = vmatprep.subr.mxu0 %v3161_v24  ;;  %v4196_v38 = vld [vmem:[%s7320_s1 + $0x5b0] sm:$0xff] }
 0x701   : > { %5627 = vmatpush3.msra.mxu1 %v3169_v20  ;;  %5685 = vmatpush3.msra.mxu0 %v3161_v24  ;;  %v4190_v24 = vld [vmem:[%s7320_s1 + $0x580] sm:$0xff]  ;;  %v4193_v20 = vld [vmem:[%s7320_s1 + $0x598] sm:$0xff] }
 0x702   : > { %5628 = vmatprep.subr.mxu1 %v7039_v35  ;;  %5686 = vmatprep.subr.mxu0 %v7035_v22 }
 0x703   : > { %5629 = vmatpush3.msra.mxu1 %v7039_v35  ;;  %5687 = vmatpush3.msra.mxu0 %v7035_v22  ;;  %v4173_v22 = vld [vmem:[%s7320_s1 + $0x4f8] sm:$0xff]  ;;  %v4191_v35 = vld [vmem:[%s7320_s1 + $0x588] sm:$0xff] }
 0x704   : > { %5630 = vmatprep.subr.mxu1 %v7037_v61  ;;  %5688 = vmatprep.subr.mxu0 %v7031_v19 }
 0x705   : > { %5631 = vmatpush3.msra.mxu1 %v7037_v61  ;;  %5689 = vmatpush3.msra.mxu0 %v7031_v19  ;;  %v4187_v19 = vld [vmem:[%s7320_s1 + $0x568] sm:$0xff]  ;;  %v4189_v61 = vld [vmem:[%s7320_s1 + $0x578] sm:$0xff] }
 0x706   : > { %5632 = vmatprep.subr.mxu1 %v7033_v39  ;;  %5690 = vmatprep.subr.mxu0 %v7027_v41 }
 0x707   : > { %5633 = vmatpush3.msra.mxu1 %v7033_v39  ;;  %5691 = vmatpush3.msra.mxu0 %v7027_v41  ;;  %v4171_v41 = vld [vmem:[%s7320_s1 + $0x4e8] sm:$0xff]  ;;  %v4188_v39 = vld [vmem:[%s7320_s1 + $0x570] sm:$0xff] }
 0x708   : > { %5634 = vmatprep.subr.mxu1 %v7029_v1  ;;  %5692 = vmatprep.subr.mxu0 %v7023_v18 }
 0x709   : > { %5635 = vmatpush3.msra.mxu1 %v7029_v1  ;;  %5693 = vmatpush3.msra.mxu0 %v7023_v18  ;;  %v4185_v18 = vld [vmem:[%s7320_s1 + $0x558] sm:$0xff]  ;;  %v4172_v1 = vld [vmem:[%s7320_s1 + $0x4f0] sm:$0xff] }
 0x70a   : > { %5636 = vmatprep.subr.mxu1 %v7025_v40  ;;  %5694 = vmatprep.subr.mxu0 %v7019_v33 }
 0x70b   : > { %5637 = vmatpush3.msra.mxu1 %v7025_v40  ;;  %5695 = vmatpush3.msra.mxu0 %v7019_v33  ;;  %v4169_v33 = vld [vmem:[%s7320_s1 + $0x4d8] sm:$0xff]  ;;  %v4186_v40 = vld [vmem:[%s7320_s1 + $0x560] sm:$0xff] }
 0x70c   : > { %5638 = vmatprep.subr.mxu1 %v7021_v17  ;;  %5696 = vmatprep.subr.mxu0 %v7015_v43 }
 0x70d   : > { %5639 = vmatpush3.msra.mxu1 %v7021_v17  ;;  %5697 = vmatpush3.msra.mxu0 %v7015_v43  ;;  %v4183_v43 = vld [vmem:[%s7320_s1 + $0x548] sm:$0xff]  ;;  %v4170_v17 = vld [vmem:[%s7320_s1 + $0x4e0] sm:$0xff] }
 0x70e   : > { %5640 = vmatprep.subr.mxu1 %v7017_v63  ;;  %5698 = vmatprep.subr.mxu0 %v7011_v15 }
 0x70f   : > { %5641 = vmatpush3.msra.mxu1 %v7017_v63  ;;  %5699 = vmatpush3.msra.mxu0 %v7011_v15  ;;  %v4167_v15 = vld [vmem:[%s7320_s1 + $0x4c8] sm:$0xff]  ;;  %v4184_v63 = vld [vmem:[%s7320_s1 + $0x550] sm:$0xff] }
 0x710   : > { %5642 = vmatprep.subr.mxu1 %v7013_v42  ;;  %5701 = vmatmul.mubr.f32.vlgmr.msra.gmra.mxu0 %v4159_v37 }
 0x711   : > { %5643 = vmatpush3.msra.mxu1 %v7013_v42  ;;  %5703 = vmatprep.mubr.f32.mxu0 %v4160_v60  ;;  %v4168_v42 = vld [vmem:[%s7320_s1 + $0x4d0] sm:$0xff] }
 0x712   : > { %5645 = vmatmul.mubr.f32.vlgmr.msra.gmra.mxu1 %v4175_v50  ;;  %5724 = vmatprep.subr.mxu1 %v5611_v11 }
 0x713   : > { %5725 = vmatpush3.msra.mxu1 %v5611_v11  ;;  %5647 = vmatprep.mubr.f32.mxu1 %v4176_v48 }
 0x714   : > { %5726 = vmatprep.subr.mxu1 %v3350_v7  ;;  %5704 = vmatmul.mubr.f32.gmra.mxu0 %v4161_v49 }
 0x715   : > { %5727 = vmatpush3.msra.mxu1 %v3350_v7  ;;  %5706 = vmatprep.mubr.f32.mxu0 %v4162_v52 }
 0x716   : > { %5648 = vmatmul.mubr.f32.gmra.mxu1 %v4177_v46  ;;  %5728 = vmatprep.subr.mxu1 %v5608_v56 }
 0x717   : > { %5729 = vmatpush3.msra.mxu1 %v5608_v56  ;;  %5650 = vmatprep.mubr.f32.mxu1 %v4178_v23 }
 0x718   : > { %5730 = vmatprep.subr.mxu1 %v3340_v12  ;;  %5707 = vmatmul.mubr.f32.gmra.mxu0 %v4163_v47  ;;  %v7270_v47 = vld [vmem:[%s7323_s4 + $0x3] ss:$0 sm:$0xff] }
 0x719   : > { %5731 = vmatpush3.msra.mxu1 %v3340_v12  ;;  %5709 = vmatprep.mubr.f32.mxu0 %v4164_v3 }
 0x71a   : > { %5651 = vmatmul.mubr.f32.gmra.mxu1 %v4179_v13  ;;  %5732 = vmatprep.subr.mxu1 %v7061_v54 }
 0x71b   : > { %5733 = vmatpush3.msra.mxu1 %v7061_v54  ;;  %5653 = vmatprep.mubr.f32.mxu1 %v4180_v44 }
 0x71c   : > { %5734 = vmatprep.subr.mxu1 %v7065_v36  ;;  %5710 = vmatmul.mubr.f32.gmra.mxu0 %v4165_v45 }
 0x71d   : > { %5735 = vmatpush3.msra.mxu1 %v7065_v36  ;;  %5712 = vmatprep.mubr.f32.mxu0 %v4166_v5 }
 0x71e   : > { %5654 = vmatmul.mubr.f32.gmra.mxu1 %v4181_v34  ;;  %5736 = vmatprep.subr.mxu1 %v7057_v0 }
 0x71f   : > { %5737 = vmatpush3.msra.mxu1 %v7057_v0  ;;  %5656 = vmatprep.mubr.f32.mxu1 %v4182_v14 }
 0x720   : > { %5738 = vmatprep.subr.mxu1 %v7059_v58  ;;  %5713 = vmatmul.mubr.f32.gmra.mxu0 %v4167_v15 }
 0x721   : > { %5739 = vmatpush3.msra.mxu1 %v7059_v58  ;;  %5715 = vmatprep.mubr.f32.mxu0 %v4168_v42 }
 0x722   : > { %5657 = vmatmul.mubr.f32.gmra.mxu1 %v4183_v43  ;;  %5740 = vmatprep.subr.mxu1 %v7053_v4 }
 0x723   : > { %5741 = vmatpush3.msra.mxu1 %v7053_v4  ;;  %5659 = vmatprep.mubr.f32.mxu1 %v4184_v63 }
 0x724   : > { %5742 = vmatprep.subr.mxu1 %v7055_v62  ;;  %5716 = vmatmul.mubr.f32.gmra.mxu0 %v4169_v33 }
 0x725   : > { %5743 = vmatpush3.msra.mxu1 %v7055_v62  ;;  %5718 = vmatprep.mubr.f32.mxu0 %v4170_v17 }
 0x726   : > { %5660 = vmatmul.mubr.f32.gmra.mxu1 %v4185_v18  ;;  %5744 = vmatprep.subr.mxu1 %v7049_v59 }
 0x727   : > { %5745 = vmatpush3.msra.mxu1 %v7049_v59  ;;  %5662 = vmatprep.mubr.f32.mxu1 %v4186_v40 }
 0x728   : > { %5746 = vmatprep.subr.mxu1 %v7051_v21  ;;  %5719 = vmatmul.mubr.f32.gmra.mxu0 %v4171_v41 }
 0x729   : > { %5747 = vmatpush3.msra.mxu1 %v7051_v21  ;;  %5721 = vmatprep.mubr.f32.mxu0 %v4172_v1 }
 0x72a   : > { %5663 = vmatmul.mubr.f32.gmra.mxu1 %v4187_v19  ;;  %5748 = vmatprep.subr.mxu1 %v7045_v57 }
 0x72b   : > { %5749 = vmatpush3.msra.mxu1 %v7045_v57  ;;  %5665 = vmatprep.mubr.f32.mxu1 %v4188_v39  ;;  %v4200_v57 = vld [vmem:[%s7320_s1 + $0x5d0] sm:$0xff] }
 0x72c   : > { %5750 = vmatprep.subr.mxu1 %v7047_v51  ;;  %5722 = vmatmul.mubr.f32.gmra.mxu0 %v4173_v22 }
 0x72d   : > { %5751 = vmatpush3.msra.mxu1 %v7047_v51  ;;  %v4203_v51 = vld [vmem:[%s7320_s1 + $0x5e8] sm:$0xff] }
 0x72e   : > { %5666 = vmatmul.mubr.f32.gmra.mxu1 %v4189_v61  ;;  %5752 = vmatprep.subr.mxu1 %v7041_v25 }
 0x72f   : > { %5753 = vmatpush3.msra.mxu1 %v7041_v25  ;;  %5756 = vmatprep.mubr.f32.mxu1 %v4190_v24  ;;  %v4194_v25 = vld [vmem:[%s7320_s1 + $0x5a0] sm:$0xff] }
 0x730   : > { %5754 = vmatprep.subr.mxu1 %v7043_v27 }
 0x731   : > { %5755 = vmatpush3.msra.mxu1 %v7043_v27  ;;  %v4197_v27 = vld [vmem:[%s7320_s1 + $0x5b8] sm:$0xff] }
 0x732   : > { %5757 = vmatmul.mubr.f32.vlgmr.msra.gmra.mxu1 %v4191_v35 }
 0x733   : > { %5759 = vmatprep.mubr.f32.mxu1 %v4192_v55 }
 0x736   : > { %5760 = vmatmul.mubr.f32.gmra.mxu1 %v4193_v20 }
 0x737   : > { %5762 = vmatprep.mubr.f32.mxu1 %v4194_v25 }
 0x73a   : > { %5763 = vmatmul.mubr.f32.gmra.mxu1 %v4195_v26 }
 0x73b   : > { %5765 = vmatprep.mubr.f32.mxu1 %v4196_v38 }
 0x73e   : > { %5766 = vmatmul.mubr.f32.gmra.mxu1 %v4197_v27 }
 0x73f   : > { %5768 = vmatprep.mubr.f32.mxu1 %v4198_v28 }
 0x742   : > { %5769 = vmatmul.mubr.f32.gmra.mxu1 %v4199_v29 }
 0x743   : > { %5771 = vmatprep.mubr.f32.mxu1 %v4200_v57 }
 0x746   : > { %5772 = vmatmul.mubr.f32.gmra.mxu1 %v4201_v30 }
 0x747   : > { %5774 = vmatprep.mubr.f32.mxu1 %v4202_v31 }
 0x74a   : > { %5775 = vmatmul.mubr.f32.gmra.mxu1 %v4203_v51 }
 0x74b   : > { %5777 = vmatprep.mubr.f32.mxu1 %v4204_v16 }
 0x74e   : > { %5778 = vmatmul.mubr.f32.gmra.mxu1 %v4205_v53 }
 0x7d0   : > { %v5702_v59 = vpop.f32.mrf.mxu0 }
 0x7d2   : > { %v5646_v32 = vpop.f32.mrf.mxu1  ;;  %v3604_v21 = vpop.f32.mrf.mxu0 }
 0x7d3   : > { %v3610_v23 = vadd.f32 %v5702_v59, %v5646_v32 }
 0x7d4   : > { %v3459_v6 = vpop.f32.mrf.mxu1  ;;  %v5705_v4 = vpop.f32.mrf.mxu0 }
 0x7d5   : > { %v3605_v13 = vadd.f32 %v3604_v21, %v3459_v6 }
 0x7d6   : > { %v5649_v8 = vpop.f32.mrf.mxu1  ;;  %v3614_v10 = vpop.f32.mrf.mxu0 }
 0x7d7   : > { %v3620_v34 = vadd.f32 %v5705_v4, %v5649_v8 }
 0x7d8   : > { %v3469_v2 = vpop.f32.mrf.mxu1  ;;  %v5708_v58 = vpop.f32.mrf.mxu0 }
 0x7d9   : > { %v3615_v43 = vadd.f32 %v3614_v10, %v3469_v2 }
 0x7da   : > { %v5652_v9 = vpop.f32.mrf.mxu1  ;;  %v3624_v56 = vpop.f32.mrf.mxu0 }
 0x7db   : > { %v3630_v40 = vadd.f32 %v5708_v58, %v5652_v9 }
 0x7dc   : > { %v3479_v62 = vpop.f32.mrf.mxu1  ;;  %v5711_v60 = vpop.f32.mrf.mxu0 }
 0x7dd   : > { %v3625_v39 = vadd.f32 %v3624_v56, %v3479_v62 }
 0x7de   : > { %v5655_v0 = vpop.f32.mrf.mxu1  ;;  %v3634_v48 = vpop.f32.mrf.mxu0 }
 0x7df   : > { %v3640_v55 = vadd.f32 %v5711_v60, %v5655_v0 }
 0x7e0   : > { %v3489_v54 = vpop.f32.mrf.mxu1  ;;  %v5714_v7 = vpop.f32.mrf.mxu0 }
 0x7e1   : > { %v3635_v38 = vadd.f32 %v3634_v48, %v3489_v54 }
 0x7e2   : > { %v5658_v36 = vpop.f32.mrf.mxu1  ;;  %v3644_v45 = vpop.f32.mrf.mxu0 }
 0x7e3   : > { %v3650_v30 = vadd.f32 %v5714_v7, %v5658_v36 }
 0x7e4   : > { %v3499_v12 = vpop.f32.mrf.mxu1  ;;  %v5717_v17 = vpop.f32.mrf.mxu0 }
 0x7e5   : > { %v3645_v53 = vadd.f32 %v3644_v45, %v3499_v12 }
 0x7e6   : > { %v5661_v37 = vpop.f32.mrf.mxu1  ;;  %v3654_v24 = vpop.f32.mrf.mxu0 }
 0x7e7   : > { %v3660_v8 = vadd.f32 %v5717_v17, %v5661_v37 }
 0x7e8   : > { %v7257_v11 = vpop.f32.mrf.mxu1  ;;  %v5720_v29 = vpop.f32.mrf.mxu0 }
 0x7e9   : > { %v3655_v10 = vadd.f32 %v3654_v24, %v7257_v11 }
 0x7ea   : > { %v7259_v50 = vpop.f32.mrf.mxu1  ;;  %v3664_v6 = vpop.f32.mrf.mxu0 }
 0x7eb   : > { %v3670_v36 = vadd.f32 %v5720_v29, %v7259_v50 }
 0x7ec   : > { %v7261_v49 = vpop.f32.mrf.mxu1  ;;  %v5723_v58 = vpop.f32.mrf.mxu0 }
 0x7ed   : > { %v3665_v60 = vadd.f32 %v3664_v6, %v7261_v49 }
 0x7ee   : > { %v7263_v52 = vpop.f32.mrf.mxu1  ;;  %v3674_v7 = vpop.f32.mrf.mxu0 }
 0x7f0   : > { %v7265_v46 = vpop.f32.mrf.mxu1 }
 0x7f1   : > { %v3675_v45 = vadd.f32 %v3674_v7, %v7265_v46 }
 0x7f2   : > { %v5758_v3 = vpop.f32.mrf.mxu1 }
 0x7f3   : > { %v3846_v44 = vadd.f32 %v5758_v3, %v3610_v23  ;;  %v3680_v3 = vadd.f32 %v5723_v58, %v7263_v52 }
 0x7f4   : > { %v3766_v5 = vpop.f32.mrf.mxu1 }
 0x7f5   : > { %v3868_v14 = vadd.f32 %v7270_v47, %v3846_v44  ;;  %v3845_v15 = vadd.f32 %v3766_v5, %v3605_v13 }
 0x7f6   : > { %v5761_v42 = vpop.f32.mrf.mxu1 }
 0x7f7   : > { %3884 = vst [vmem:[%s7277_s18 + $0x8] sm:$0xff] %v3868_v14  ;;  %v3867_v63 = vadd.f32 %v7270_v47, %v3845_v15  ;;  %v3848_v33 = vadd.f32 %v5761_v42, %v3620_v34 }
 0x7f8   : > { %v3776_v18 = vpop.f32.mrf.mxu1 }
 0x7f9   : > { %3883 = vst [vmem:[%s7277_s18] sm:$0xff] %v3867_v63  ;;  %v3870_v41 = vadd.f32 %v7270_v47, %v3848_v33  ;;  %v3847_v1 = vadd.f32 %v3776_v18, %v3615_v43 }
 0x7fa   : > { %v5764_v19 = vpop.f32.mrf.mxu1 }
 0x7fb   : > { %3886 = vst [vmem:[%s7277_s18 + $0x18] sm:$0xff] %v3870_v41  ;;  %v3869_v22 = vadd.f32 %v7270_v47, %v3847_v1  ;;  %v3850_v61 = vadd.f32 %v5764_v19, %v3630_v40 }
 0x7fc   : > { %v3786_v35 = vpop.f32.mrf.mxu1 }
 0x7fd   : > { %3885 = vst [vmem:[%s7277_s18 + $0x10] sm:$0xff] %v3869_v22  ;;  %v3872_v20 = vadd.f32 %v7270_v47, %v3850_v61  ;;  %v3849_v25 = vadd.f32 %v3786_v35, %v3625_v39 }
 0x7fe   : > { %v5767_v26 = vpop.f32.mrf.mxu1 }
 0x7ff   : > { %3888 = vst [vmem:[%s7277_s18 + $0x28] sm:$0xff] %v3872_v20  ;;  %v3871_v27 = vadd.f32 %v7270_v47, %v3849_v25  ;;  %v3852_v28 = vadd.f32 %v5767_v26, %v3640_v55 }
 0x800   : > { %v3796_v57 = vpop.f32.mrf.mxu1 }
 0x801   : > { %3887 = vst [vmem:[%s7277_s18 + $0x20] sm:$0xff] %v3871_v27  ;;  %v3874_v31 = vadd.f32 %v7270_v47, %v3852_v28  ;;  %v3851_v51 = vadd.f32 %v3796_v57, %v3635_v38 }
 0x802   : > { %v5770_v16 = vpop.f32.mrf.mxu1 }
 0x803   : > { %3890 = vst [vmem:[%s7277_s18 + $0x38] sm:$0xff] %v3874_v31  ;;  %v3873_v59 = vadd.f32 %v7270_v47, %v3851_v51  ;;  %v3854_v32 = vadd.f32 %v5770_v16, %v3650_v30 }
 0x804   : > { %v3806_v21 = vpop.f32.mrf.mxu1 }
 0x805   : > { %3889 = vst [vmem:[%s7277_s18 + $0x30] sm:$0xff] %v3873_v59  ;;  %v3876_v2 = vadd.f32 %v7270_v47, %v3854_v32  ;;  %v3853_v4 = vadd.f32 %v3806_v21, %v3645_v53 }
 0x806   : > { %v5773_v9 = vpop.f32.mrf.mxu1 }
 0x807   : > { %3892 = vst [vmem:[%s7277_s18 + $0x48] sm:$0xff] %v3876_v2  ;;  %v3875_v62 = vadd.f32 %v7270_v47, %v3853_v4  ;;  %v3856_v0 = vadd.f32 %v5773_v9, %v3660_v8 }
 0x808   : > { %v3816_v54 = vpop.f32.mrf.mxu1 }
 0x809   : > { %3891 = vst [vmem:[%s7277_s18 + $0x40] sm:$0xff] %v3875_v62  ;;  %v3878_v56 = vadd.f32 %v7270_v47, %v3856_v0  ;;  %v3855_v12 = vadd.f32 %v3816_v54, %v3655_v10 }
 0x80a   : > { %v5776_v37 = vpop.f32.mrf.mxu1 }
 0x80b   : > { %3894 = vst [vmem:[%s7277_s18 + $0x58] sm:$0xff] %v3878_v56  ;;  %v3877_v11 = vadd.f32 %v7270_v47, %v3855_v12  ;;  %v3858_v48 = vadd.f32 %v5776_v37, %v3670_v36 }
 0x80c   : > { %v3826_v23 = vpop.f32.mrf.mxu1 }
 0x80d   : > { %3893 = vst [vmem:[%s7277_s18 + $0x50] sm:$0xff] %v3877_v11  ;;  %v3880_v50 = vadd.f32 %v7270_v47, %v3858_v48  ;;  %v3857_v13 = vadd.f32 %v3826_v23, %v3665_v60 }
 0x80e   : > { %v5779_v44 = vpop.f32.mrf.mxu1 }
 0x80f   : > { %3896 = vst [vmem:[%s7277_s18 + $0x68] sm:$0xff] %v3880_v50  ;;  %v3879_v49 = vadd.f32 %v7270_v47, %v3857_v13  ;;  %v3860_v5 = vadd.f32 %v5779_v44, %v3680_v3 }
 0x810   : > { %v3836_v34 = vpop.f32.mrf.mxu1 }
 0x811   : > { %3895 = vst [vmem:[%s7277_s18 + $0x60] sm:$0xff] %v3879_v49  ;;  %v3882_v14 = vadd.f32 %v7270_v47, %v3860_v5  ;;  %v3859_v15 = vadd.f32 %v3836_v34, %v3675_v45 }
 0x813   : > { %3898 = vst [vmem:[%s7277_s18 + $0x78] sm:$0xff] %v3882_v14  ;;  %v3881_v42 = vadd.f32 %v7270_v47, %v3859_v15 }
 0x815   : > { %3897 = vst [vmem:[%s7277_s18 + $0x70] sm:$0xff] %v3881_v42 }
 0x816 PF: > { %s19_s21 = sadd.s32 1, %s5880_s21  }
 0x817   : > { %p16_p2 = scmp.ge.s32.totalorder %s19_s21, 4  }
 0x819   :  { %18 = sbr.rel (!%p16_p2) target bundleno = 2 (0x2), region = 107 }
 0x81e   :  { %3936 = vsyncpa [#allocation3], 1 }
 0x81f   :  { %3938 = vsyncpa [#allocation3 + $0x1], 1 }
 0x820   :  { %3939 = vsyncpa [#allocation5], 1 }

</bundles_post_ra>
